<compile_context>
chip_gen: v7x
topology: tpu7x:2x2x1
jax: 0.10.0
libtpu: 0.0.40
codegen_flags: <defaults>
</compile_context>

<pallas_src>
import functools

import jax
import jax.numpy as jnp
import numpy as np
from jax import lax
from jax.experimental import pallas as pl
from jax.experimental.pallas import tpu as pltpu


def _round_up(x, m):
    return (x + m - 1) // m * m


# ----------------------------------------------------------------------------
# Pallas kernel: one LSTM layer per grid step (weights streamed), FC head on
# the last layer.  All per-timestep accesses are sublane/tile aligned.
# ----------------------------------------------------------------------------
def _lstm_ar_kernel(x_ref, wih_ref, whh_ref, b_ref, fcw_ref, fcb_ref,
                    y_ref, hn_ref, cn_ref, seq_ref, gx_ref, *,
                    seq_len, batch_pad, in_pad, hidden_pad, chunk,
                    static_unroll):
    T, Bp, Ip, Hp = seq_len, batch_pad, in_pad, hidden_pad
    G = 4 * Hp
    lyr = pl.program_id(0)
    last_lyr = pl.num_programs(0) - 1

    # Hoisted per-layer constants (review item: don't re-load W_hh every step).
    w_hh = whh_ref[...]           # (Hp, G) bf16
    bias = b_ref[...]             # (1, G)  f32, fused b_ih + b_hh

    def sigmoid(v):
        # exp on EUP + approx reciprocal on EUP -> off the VPU critical path.
        return pl.reciprocal(1.0 + jnp.exp(-v), approx=True)

    def lstm_step(gx_t, h, c):
        # gx_t already holds x_t @ W_ih^T + (b_ih + b_hh); only the recurrent
        # matmul is done per step (bf16 operands, f32 accumulate).
        gates = gx_t + jnp.dot(h.astype(jnp.bfloat16), w_hh,
                               preferred_element_type=jnp.float32)
        # Lane-aligned gate slices (gate k lives at lane offset k*Hp).
        i_g = sigmoid(gates[:, 0 * Hp:1 * Hp])
        f_g = sigmoid(gates[:, 1 * Hp:2 * Hp])
        g_g = jnp.tanh(gates[:, 2 * Hp:3 * Hp])
        o_g = sigmoid(gates[:, 3 * Hp:4 * Hp])
        c_new = f_g * c + i_g * g_g
        h_new = o_g * jnp.tanh(c_new)
        return h_new, c_new

    def step(rg, rs, carry):
        # rg: row offset into gx scratch (chunk-local), rs: row offset into the
        # hidden-sequence scratch (global).  Both are multiples of Bp (>=16),
        # i.e. tile aligned for f32 and bf16.
        h, c = carry
        h_new, c_new = lstm_step(gx_ref[pl.ds(rg, Bp), :], h, c)
        seq_ref[pl.ds(rs, Bp), :] = h_new.astype(seq_ref.dtype)
        return h_new, c_new

    h = jnp.zeros((Bp, Hp), jnp.float32)
    c = jnp.zeros((Bp, Hp), jnp.float32)

    n_chunks = (T + chunk - 1) // chunk          # static
    for ci in range(n_chunks):
        t0 = ci * chunk
        clen = min(chunk, T - t0)
        r0, r1 = t0 * Bp, (t0 + clen) * Bp       # static, multiples of Bp

        # ---- x-projection for this time chunk: one MXU slab, bias fused ----
        # Layer 0 reads the padded input x; layers > 0 read the previous
        # layer's hidden sequence (bf16 scratch).  Zero-padded W_ih rows make
        # any junk lanes of the input contribute 0.
        @pl.when(lyr == 0)
        def _(r0=r0, r1=r1):
            gx_ref[0:(r1 - r0), :] = (
                jnp.dot(x_ref[r0:r1, :], wih_ref[:Ip, :],
                        preferred_element_type=jnp.float32) + bias)

        @pl.when(lyr > 0)
        def _(r0=r0, r1=r1):
            gx_ref[0:(r1 - r0), :] = (
                jnp.dot(seq_ref[r0:r1, :], wih_ref[:Hp, :],
                        preferred_element_type=jnp.float32) + bias)

        # ---- recurrence over this chunk ------------------------------------
        if static_unroll:
            for tr in range(clen):               # static row offsets
                h, c = step(tr * Bp, (t0 + tr) * Bp, (h, c))
        else:
            def dyn_step(tr, carry, t0=t0):
                rg = pl.multiple_of(tr * Bp, Bp)
                rs = pl.multiple_of((t0 + tr) * Bp, Bp)
                return step(rg, rs, carry)
            h, c = lax.fori_loop(0, clen, dyn_step, (h, c),
                                 unroll=min(8, clen))

    hn_ref[...] = h
    cn_ref[...] = c

    # FC head: y = h_T(top layer) @ W_fc^T + b_fc   (== out_seq[:, -1, :] @ ...)
    @pl.when(lyr == last_lyr)
    def _():
        y_ref[...] = (jnp.dot(h, fcw_ref[...],
                              preferred_element_type=jnp.float32)
                      + fcb_ref[...])


# ----------------------------------------------------------------------------
# Wrapper: parameter packing (glue) + pallas_call
# ----------------------------------------------------------------------------
def _pack_gate_cols(w_t, H, Hp):
    """(rows, 4H) -> (rows, 4*Hp): gate k's H columns placed at offset k*Hp."""
    rows = w_t.shape[0]
    out = jnp.zeros((rows, 4 * Hp), w_t.dtype)
    for k in range(4):
        out = out.at[:, k * Hp:k * Hp + H].set(w_t[:, k * H:(k + 1) * H])
    return out


def lstm_ar_forward(x, params, *, hidden_size, num_layers):
    B, T, I = x.shape
    H = hidden_size
    SUB = 16                               # bf16 sublane-packing tile
    Bp = _round_up(B, SUB)                 # tile-aligned batch rows
    Ip = _round_up(I, 128)                 # lane-aligned input width
    Hp = _round_up(H, 128)                 # lane-aligned hidden width
    Fmax = max(Ip, Hp)                     # common row count for stacked W_ih
    G = 4 * Hp
    # Time chunk for the x-projection slab (>= ~256 MXU rows when T is long).
    chunk = T if T <= 32 else min(T, max(1, (256 + Bp - 1) // Bp))

    # time-major, batch/lane padded, flattened input: (T*Bp, Ip), bf16 operand
    x_tm = jnp.transpose(x, (1, 0, 2)).astype(jnp.float32)            # (T, B, I)
    x2d = jnp.pad(x_tm, ((0, 0), (0, Bp - B), (0, Ip - I)))           # (T, Bp, Ip)
    x2d = x2d.reshape(T * Bp, Ip).astype(jnp.bfloat16)

    wih_l, whh_l, b_l = [], [], []
    for layer in range(num_layers):
        w_ih_t = _pack_gate_cols(
            params[f"w_ih_{layer}"].T.astype(jnp.float32), H, Hp)     # (in, 4Hp)
        w_ih_t = jnp.pad(w_ih_t, ((0, Fmax - w_ih_t.shape[0]), (0, 0)))
        wih_l.append(w_ih_t)                                          # (Fmax, 4Hp)
        w_hh_t = _pack_gate_cols(
            params[f"w_hh_{layer}"].T.astype(jnp.float32), H, Hp)     # (H, 4Hp)
        whh_l.append(jnp.pad(w_hh_t, ((0, Hp - H), (0, 0))))          # (Hp, 4Hp)
        bias = (params[f"b_ih_{layer}"] + params[f"b_hh_{layer}"]).reshape(1, 4 * H)
        b_l.append(_pack_gate_cols(bias.astype(jnp.float32), H, Hp))  # (1, 4Hp)
    wih = jnp.stack(wih_l).astype(jnp.bfloat16)                       # (L, Fmax, 4Hp)
    whh = jnp.stack(whh_l).astype(jnp.bfloat16)                       # (L, Hp, 4Hp)
    bb = jnp.stack(b_l)                                               # (L, 1, 4Hp) f32

    fcw = jnp.pad(params["fc_w"].T.astype(jnp.float32),
                  ((0, Hp - H), (0, Ip - I)))                         # (Hp, Ip)
    fcb = jnp.pad(params["fc_b"].astype(jnp.float32).reshape(1, I),
                  ((0, 0), (0, Ip - I)))                              # (1, Ip)

    # ---- VMEM budget: actual buffers (streamed blocks double-buffered) ------
    resident = x2d.size * 2 + fcw.size * 4 + fcb.size * 4
    streamed = 2 * (Fmax * G * 2 + Hp * G * 2 + G * 4)     # 2x per-layer blocks
    outs = Bp * Ip * 4 + 2 * 2 * Bp * Hp * 4               # y + hn/cn blocks
    scratch = T * Bp * Hp * 2 + chunk * Bp * G * 4         # seq (bf16) + gx (f32)
    needed = resident + streamed + outs + scratch + (4 << 20)
    try:
        vmem_cap = int(pltpu.get_tpu_info().vmem_capacity_bytes)
    except Exception:
        vmem_cap = 128 << 20
    headroom = max(vmem_cap // 8, 8 << 20)                 # compiler scratch headroom
    vmem_limit = int(min(max(needed, 32 << 20), vmem_cap - headroom))

    kernel = functools.partial(
        _lstm_ar_kernel, seq_len=T, batch_pad=Bp, in_pad=Ip, hidden_pad=Hp,
        chunk=chunk, static_unroll=(T <= 32))

    grid_spec = pltpu.PrefetchScalarGridSpec(
        num_scalar_prefetch=0,
        grid=(num_layers,),                                # sequential layer axis
        in_specs=[
            pl.BlockSpec((T * Bp, Ip), lambda l: (0, 0)),          # x (resident)
            pl.BlockSpec((None, Fmax, G), lambda l: (l, 0, 0)),    # W_ih (streamed)
            pl.BlockSpec((None, Hp, G), lambda l: (l, 0, 0)),      # W_hh (streamed)
            pl.BlockSpec((None, 1, G), lambda l: (l, 0, 0)),       # bias (streamed)
            pl.BlockSpec((Hp, Ip), lambda l: (0, 0)),              # fc_w (resident)
            pl.BlockSpec((1, Ip), lambda l: (0, 0)),               # fc_b (resident)
        ],
        out_specs=(
            pl.BlockSpec((Bp, Ip), lambda l: (0, 0)),              # y (last layer)
            pl.BlockSpec((None, Bp, Hp), lambda l: (l, 0, 0)),     # h_n
            pl.BlockSpec((None, Bp, Hp), lambda l: (l, 0, 0)),     # c_n
        ),
        scratch_shapes=[
            pltpu.VMEM((T * Bp, Hp), jnp.bfloat16),     # hidden seq -> next layer
            pltpu.VMEM((chunk * Bp, G), jnp.float32),   # per-chunk x-projection
        ],
    )

    y_pad, hn_pad, cn_pad = pl.pallas_call(
        kernel,
        out_shape=(
            jax.ShapeDtypeStruct((Bp, Ip), jnp.float32),
            jax.ShapeDtypeStruct((num_layers, Bp, Hp), jnp.float32),
            jax.ShapeDtypeStruct((num_layers, Bp, Hp), jnp.float32),
        ),
        grid_spec=grid_spec,
        compiler_params=pltpu.CompilerParams(
            dimension_semantics=("arbitrary",),
            vmem_limit_bytes=vmem_limit),
    )(x2d, wih, whh, bb, fcw, fcb)

    return y_pad[:B, :I], (hn_pad[:, :B, :H], cn_pad[:, :B, :H])


# ----------------------------------------------------------------------------
# Deterministic parameter init (same shapes as nn.LSTM / nn.Linear)
# ----------------------------------------------------------------------------
def init_params(key, input_size, hidden_size, num_layers):
    H = hidden_size
    bound = 1.0 / np.sqrt(H)
    keys = jax.random.split(key, 4 * num_layers + 2)
    ki = 0
    params = {}
    for layer in range(num_layers):
        in_dim = input_size if layer == 0 else H
        params[f"w_ih_{layer}"] = jax.random.uniform(
            keys[ki], (4 * H, in_dim), jnp.float32, -bound, bound); ki += 1
        params[f"w_hh_{layer}"] = jax.random.uniform(
            keys[ki], (4 * H, H), jnp.float32, -bound, bound); ki += 1
        params[f"b_ih_{layer}"] = jax.random.uniform(
            keys[ki], (4 * H,), jnp.float32, -bound, bound); ki += 1
        params[f"b_hh_{layer}"] = jax.random.uniform(
            keys[ki], (4 * H,), jnp.float32, -bound, bound); ki += 1
    params["fc_w"] = jax.random.uniform(
        keys[ki], (input_size, H), jnp.float32, -bound, bound); ki += 1
    params["fc_b"] = jax.random.uniform(
        keys[ki], (input_size,), jnp.float32, -bound, bound)
    return params


# ----------------------------------------------------------------------------
# Pure-JAX f32 reference of the PyTorch forward (for correctness check)
# ----------------------------------------------------------------------------
def reference_forward(x, params, *, hidden_size, num_layers):
    B, T, I = x.shape
    H = hidden_size
    inp = x
    h_n, c_n = [], []
    for layer in range(num_layers):
        w_ih = params[f"w_ih_{layer}"]
        w_hh = params[f"w_hh_{layer}"]
        b = params[f"b_ih_{layer}"] + params[f"b_hh_{layer}"]
        h = jnp.zeros((B, H), jnp.float32)
        c = jnp.zeros((B, H), jnp.float32)
        outs = []
        for t in range(T):
            gates = inp[:, t, :] @ w_ih.T + h @ w_hh.T + b
            i_g = jax.nn.sigmoid(gates[:, :H])
            f_g = jax.nn.sigmoid(gates[:, H:2 * H])
            g_g = jnp.tanh(gates[:, 2 * H:3 * H])
            o_g = jax.nn.sigmoid(gates[:, 3 * H:])
            c = f_g * c + i_g * g_g
            h = o_g * jnp.tanh(c)
            outs.append(h)
        inp = jnp.stack(outs, axis=1)
        h_n.append(h)
        c_n.append(c)
    y = inp[:, -1, :] @ params["fc_w"].T + params["fc_b"]
    return y, (jnp.stack(h_n), jnp.stack(c_n))


if __name__ == "__main__":
    B, T, I, H, L = 2, 8, 4, 32, 2  # batch, seq, input_size, hidden_size, num_layers
    key = jax.random.PRNGKey(0)
    k_x, k_p = jax.random.split(key)
    x = jax.random.normal(k_x, (B, T, I), jnp.float32)
    params = init_params(k_p, I, H, L)

    # dropout=0.0 (PyTorch applies it only between layers during training),
    # so no dropout path is needed here.
    y, (h_n, c_n) = lstm_ar_forward(x, params, hidden_size=H, num_layers=L)
    jax.block_until_ready((y, h_n, c_n))

    y_ref, (h_ref, c_ref) = reference_forward(x, params, hidden_size=H, num_layers=L)
    # Tolerance reflects bf16 MXU operands (f32 accumulation / gate math).
    assert np.allclose(np.asarray(y), np.asarray(y_ref), atol=5e-2, rtol=5e-2)
    assert np.allclose(np.asarray(h_n), np.asarray(h_ref), atol=5e-2, rtol=5e-2)
    assert np.allclose(np.asarray(c_n), np.asarray(c_ref), atol=5e-2, rtol=5e-2)

    print("KERNEL_OK")
</pallas_src>

<mosaic_0001>
module attributes {stable_mosaic.version = 11 : i64} {
  func.func @_lstm_ar_kernel(%arg0: i32, %arg1: memref<128x128xbf16, #tpu.memory_space<vmem>>, %arg2: memref<1x128x512xbf16, #tpu.memory_space<vmem>>, %arg3: memref<1x128x512xbf16, #tpu.memory_space<vmem>>, %arg4: memref<1x1x512xf32, #tpu.memory_space<vmem>>, %arg5: memref<128x128xf32, #tpu.memory_space<vmem>>, %arg6: memref<1x128xf32, #tpu.memory_space<vmem>>, %arg7: memref<16x128xf32, #tpu.memory_space<vmem>>, %arg8: memref<1x16x128xf32, #tpu.memory_space<vmem>>, %arg9: memref<1x16x128xf32, #tpu.memory_space<vmem>>, %arg10: memref<128x128xbf16, #tpu.memory_space<vmem>>, %arg11: memref<128x512xf32, #tpu.memory_space<vmem>>) attributes {dimension_semantics = [#tpu.dimension_semantics<arbitrary>], iteration_bounds = array<i64: 2>, scalar_prefetch = 0 : i64, scratch_operands = 2 : i64, tpu.core_type = #tpu.core_type<tc>, window_params = [{pipeline_mode = #tpu.pipeline_mode<synchronous>, transform_indices = @transform_0, window_bounds = array<i64: 128, 128>}, {transform_indices = @transform_1, window_bounds = array<i64: 1, 128, 512>}, {transform_indices = @transform_2, window_bounds = array<i64: 1, 128, 512>}, {transform_indices = @transform_3, window_bounds = array<i64: 1, 1, 512>}, {pipeline_mode = #tpu.pipeline_mode<synchronous>, transform_indices = @transform_4, window_bounds = array<i64: 128, 128>}, {pipeline_mode = #tpu.pipeline_mode<synchronous>, transform_indices = @transform_5, window_bounds = array<i64: 1, 128>}, {pipeline_mode = #tpu.pipeline_mode<synchronous>, transform_indices = @transform_6, window_bounds = array<i64: 16, 128>}, {transform_indices = @transform_7, window_bounds = array<i64: 1, 16, 128>}, {transform_indices = @transform_8, window_bounds = array<i64: 1, 16, 128>}]} {
    %c0 = arith.constant 0 : index
    %c0_0 = arith.constant 0 : index
    %c0_1 = arith.constant 0 : index
    %0 = vector.load %arg3[%c0, %c0_0, %c0_1] : memref<1x128x512xbf16, #tpu.memory_space<vmem>>, vector<1x128x512xbf16>
    %1 = vector.shape_cast %0 : vector<1x128x512xbf16> to vector<128x512xbf16>
    %c0_2 = arith.constant 0 : index
    %c0_3 = arith.constant 0 : index
    %c0_4 = arith.constant 0 : index
    %2 = vector.load %arg4[%c0_2, %c0_3, %c0_4] : memref<1x1x512xf32, #tpu.memory_space<vmem>>, vector<1x1x512xf32>
    %3 = vector.shape_cast %2 : vector<1x1x512xf32> to vector<1x512xf32>
    %cst = arith.constant 0.000000e+00 : f32
    %4 = vector.broadcast %cst : f32 to vector<16x128xf32>
    %cst_5 = arith.constant 0.000000e+00 : f32
    %5 = vector.broadcast %cst_5 : f32 to vector<16x128xf32>
    %c0_i32 = arith.constant 0 : i32
    %6 = arith.cmpi eq, %arg0, %c0_i32 : i32
    %7 = arith.extui %6 : i1 to i32
    %c0_i32_6 = arith.constant 0 : i32
    %8 = arith.cmpi ne, %7, %c0_i32_6 : i32
    scf.if %8 {
      %c0_97 = arith.constant 0 : index
      %c0_98 = arith.constant 0 : index
      %293 = vector.load %arg1[%c0_97, %c0_98] : memref<128x128xbf16, #tpu.memory_space<vmem>>, vector<128x128xbf16>
      %c0_99 = arith.constant 0 : index
      %c0_100 = arith.constant 0 : index
      %c0_101 = arith.constant 0 : index
      %294 = vector.load %arg2[%c0_99, %c0_100, %c0_101] : memref<1x128x512xbf16, #tpu.memory_space<vmem>>, vector<1x128x512xbf16>
      %295 = vector.shape_cast %294 : vector<1x128x512xbf16> to vector<128x512xbf16>
      %cst_102 = arith.constant dense<0.000000e+00> : vector<128x512xf32>
      %296 = tpu.matmul %293, %295, %cst_102 {dimension_numbers = #tpu.dot_dimension_numbers<[1], [0], [0], [1], [0, 0, 1, 1], [], []>} : vector<128x128xbf16>, vector<128x512xbf16>, vector<128x512xf32> -> vector<128x512xf32>
      %297 = vector.broadcast %3 : vector<1x512xf32> to vector<128x512xf32>
      %298 = arith.addf %296, %297 : vector<128x512xf32>
      %c0_103 = arith.constant 0 : index
      %c0_104 = arith.constant 0 : index
      %299 = vector.load %arg11[%c0_103, %c0_104] : memref<128x512xf32, #tpu.memory_space<vmem>>, vector<128x512xf32>
      tpu.vector_store %arg11[%c0_103, %c0_104], %298 {strides = array<i32>} : memref<128x512xf32, #tpu.memory_space<vmem>>, vector<128x512xf32>,
    } else {
    }
    %c0_i32_7 = arith.constant 0 : i32
    %9 = arith.cmpi sgt, %arg0, %c0_i32_7 : i32
    %10 = arith.extui %9 : i1 to i32
    %c0_i32_8 = arith.constant 0 : i32
    %11 = arith.cmpi ne, %10, %c0_i32_8 : i32
    scf.if %11 {
      %c0_97 = arith.constant 0 : index
      %c0_98 = arith.constant 0 : index
      %293 = vector.load %arg10[%c0_97, %c0_98] : memref<128x128xbf16, #tpu.memory_space<vmem>>, vector<128x128xbf16>
      %c0_99 = arith.constant 0 : index
      %c0_100 = arith.constant 0 : index
      %c0_101 = arith.constant 0 : index
      %294 = vector.load %arg2[%c0_99, %c0_100, %c0_101] : memref<1x128x512xbf16, #tpu.memory_space<vmem>>, vector<1x128x512xbf16>
      %295 = vector.shape_cast %294 : vector<1x128x512xbf16> to vector<128x512xbf16>
      %cst_102 = arith.constant dense<0.000000e+00> : vector<128x512xf32>
      %296 = tpu.matmul %293, %295, %cst_102 {dimension_numbers = #tpu.dot_dimension_numbers<[1], [0], [0], [1], [0, 0, 1, 1], [], []>} : vector<128x128xbf16>, vector<128x512xbf16>, vector<128x512xf32> -> vector<128x512xf32>
      %297 = vector.broadcast %3 : vector<1x512xf32> to vector<128x512xf32>
      %298 = arith.addf %296, %297 : vector<128x512xf32>
      %c0_103 = arith.constant 0 : index
      %c0_104 = arith.constant 0 : index
      %299 = vector.load %arg11[%c0_103, %c0_104] : memref<128x512xf32, #tpu.memory_space<vmem>>, vector<128x512xf32>
      tpu.vector_store %arg11[%c0_103, %c0_104], %298 {strides = array<i32>} : memref<128x512xf32, #tpu.memory_space<vmem>>, vector<128x512xf32>,
    } else {
    }
    %c0_9 = arith.constant 0 : index
    %c0_10 = arith.constant 0 : index
    %12 = vector.load %arg11[%c0_9, %c0_10] : memref<128x512xf32, #tpu.memory_space<vmem>>, vector<16x512xf32>
    %13 = arith.truncf %4 : vector<16x128xf32> to vector<16x128xbf16>
    %cst_11 = arith.constant dense<0.000000e+00> : vector<16x512xf32>
    %14 = tpu.matmul %13, %1, %cst_11 {dimension_numbers = #tpu.dot_dimension_numbers<[1], [0], [0], [1], [0, 0, 1, 1], [], []>} : vector<16x128xbf16>, vector<128x512xbf16>, vector<16x512xf32> -> vector<16x512xf32>
    %15 = arith.addf %12, %14 : vector<16x512xf32>
    %16 = vector.extract_strided_slice %15 {offsets = [0, 0], sizes = [16, 128], strides = [1, 1]} : vector<16x512xf32> to vector<16x128xf32>
    %cst_12 = arith.constant 0.000000e+00 : f32
    %17 = vector.broadcast %cst_12 : f32 to vector<16x128xf32>
    %18 = arith.subf %17, %16 : vector<16x128xf32>
    %19 = math.exp %18 : vector<16x128xf32>
    %cst_13 = arith.constant 1.000000e+00 : f32
    %20 = vector.broadcast %cst_13 : f32 to vector<16x128xf32>
    %21 = arith.addf %20, %19 : vector<16x128xf32>
    %22 = tpu.reciprocal %21 {approx = true} : vector<16x128xf32> -> vector<16x128xf32>
    %23 = vector.extract_strided_slice %15 {offsets = [0, 128], sizes = [16, 128], strides = [1, 1]} : vector<16x512xf32> to vector<16x128xf32>
    %cst_14 = arith.constant 0.000000e+00 : f32
    %24 = vector.broadcast %cst_14 : f32 to vector<16x128xf32>
    %25 = arith.subf %24, %23 : vector<16x128xf32>
    %26 = math.exp %25 : vector<16x128xf32>
    %cst_15 = arith.constant 1.000000e+00 : f32
    %27 = vector.broadcast %cst_15 : f32 to vector<16x128xf32>
    %28 = arith.addf %27, %26 : vector<16x128xf32>
    %29 = tpu.reciprocal %28 {approx = true} : vector<16x128xf32> -> vector<16x128xf32>
    %30 = vector.extract_strided_slice %15 {offsets = [0, 256], sizes = [16, 128], strides = [1, 1]} : vector<16x512xf32> to vector<16x128xf32>
    %31 = math.tanh %30 : vector<16x128xf32>
    %32 = vector.extract_strided_slice %15 {offsets = [0, 384], sizes = [16, 128], strides = [1, 1]} : vector<16x512xf32> to vector<16x128xf32>
    %cst_16 = arith.constant 0.000000e+00 : f32
    %33 = vector.broadcast %cst_16 : f32 to vector<16x128xf32>
    %34 = arith.subf %33, %32 : vector<16x128xf32>
    %35 = math.exp %34 : vector<16x128xf32>
    %cst_17 = arith.constant 1.000000e+00 : f32
    %36 = vector.broadcast %cst_17 : f32 to vector<16x128xf32>
    %37 = arith.addf %36, %35 : vector<16x128xf32>
    %38 = tpu.reciprocal %37 {approx = true} : vector<16x128xf32> -> vector<16x128xf32>
    %39 = arith.mulf %29, %5 : vector<16x128xf32>
    %40 = arith.mulf %22, %31 : vector<16x128xf32>
    %41 = arith.addf %39, %40 : vector<16x128xf32>
    %42 = math.tanh %41 : vector<16x128xf32>
    %43 = arith.mulf %38, %42 : vector<16x128xf32>
    %44 = arith.truncf %43 : vector<16x128xf32> to vector<16x128xbf16>
    %c0_18 = arith.constant 0 : index
    %c0_19 = arith.constant 0 : index
    %45 = vector.load %arg10[%c0_18, %c0_19] : memref<128x128xbf16, #tpu.memory_space<vmem>>, vector<16x128xbf16>
    tpu.vector_store %arg10[%c0_18, %c0_19], %44 {strides = array<i32>} : memref<128x128xbf16, #tpu.memory_space<vmem>>, vector<16x128xbf16>,
    %c16 = arith.constant 16 : index
    %c0_20 = arith.constant 0 : index
    %46 = vector.load %arg11[%c16, %c0_20] : memref<128x512xf32, #tpu.memory_space<vmem>>, vector<16x512xf32>
    %47 = arith.truncf %43 : vector<16x128xf32> to vector<16x128xbf16>
    %cst_21 = arith.constant dense<0.000000e+00> : vector<16x512xf32>
    %48 = tpu.matmul %47, %1, %cst_21 {dimension_numbers = #tpu.dot_dimension_numbers<[1], [0], [0], [1], [0, 0, 1, 1], [], []>} : vector<16x128xbf16>, vector<128x512xbf16>, vector<16x512xf32> -> vector<16x512xf32>
    %49 = arith.addf %46, %48 : vector<16x512xf32>
    %50 = vector.extract_strided_slice %49 {offsets = [0, 0], sizes = [16, 128], strides = [1, 1]} : vector<16x512xf32> to vector<16x128xf32>
    %cst_22 = arith.constant 0.000000e+00 : f32
    %51 = vector.broadcast %cst_22 : f32 to vector<16x128xf32>
    %52 = arith.subf %51, %50 : vector<16x128xf32>
    %53 = math.exp %52 : vector<16x128xf32>
    %cst_23 = arith.constant 1.000000e+00 : f32
    %54 = vector.broadcast %cst_23 : f32 to vector<16x128xf32>
    %55 = arith.addf %54, %53 : vector<16x128xf32>
    %56 = tpu.reciprocal %55 {approx = true} : vector<16x128xf32> -> vector<16x128xf32>
    %57 = vector.extract_strided_slice %49 {offsets = [0, 128], sizes = [16, 128], strides = [1, 1]} : vector<16x512xf32> to vector<16x128xf32>
    %cst_24 = arith.constant 0.000000e+00 : f32
    %58 = vector.broadcast %cst_24 : f32 to vector<16x128xf32>
    %59 = arith.subf %58, %57 : vector<16x128xf32>
    %60 = math.exp %59 : vector<16x128xf32>
    %cst_25 = arith.constant 1.000000e+00 : f32
    %61 = vector.broadcast %cst_25 : f32 to vector<16x128xf32>
    %62 = arith.addf %61, %60 : vector<16x128xf32>
    %63 = tpu.reciprocal %62 {approx = true} : vector<16x128xf32> -> vector<16x128xf32>
    %64 = vector.extract_strided_slice %49 {offsets = [0, 256], sizes = [16, 128], strides = [1, 1]} : vector<16x512xf32> to vector<16x128xf32>
    %65 = math.tanh %64 : vector<16x128xf32>
    %66 = vector.extract_strided_slice %49 {offsets = [0, 384], sizes = [16, 128], strides = [1, 1]} : vector<16x512xf32> to vector<16x128xf32>
    %cst_26 = arith.constant 0.000000e+00 : f32
    %67 = vector.broadcast %cst_26 : f32 to vector<16x128xf32>
    %68 = arith.subf %67, %66 : vector<16x128xf32>
    %69 = math.exp %68 : vector<16x128xf32>
    %cst_27 = arith.constant 1.000000e+00 : f32
    %70 = vector.broadcast %cst_27 : f32 to vector<16x128xf32>
    %71 = arith.addf %70, %69 : vector<16x128xf32>
    %72 = tpu.reciprocal %71 {approx = true} : vector<16x128xf32> -> vector<16x128xf32>
    %73 = arith.mulf %63, %41 : vector<16x128xf32>
    %74 = arith.mulf %56, %65 : vector<16x128xf32>
    %75 = arith.addf %73, %74 : vector<16x128xf32>
    %76 = math.tanh %75 : vector<16x128xf32>
    %77 = arith.mulf %72, %76 : vector<16x128xf32>
    %78 = arith.truncf %77 : vector<16x128xf32> to vector<16x128xbf16>
    %c16_28 = arith.constant 16 : index
    %c0_29 = arith.constant 0 : index
    %79 = vector.load %arg10[%c16_28, %c0_29] : memref<128x128xbf16, #tpu.memory_space<vmem>>, vector<16x128xbf16>
    tpu.vector_store %arg10[%c16_28, %c0_29], %78 {strides = array<i32>} : memref<128x128xbf16, #tpu.memory_space<vmem>>, vector<16x128xbf16>,
    %c32 = arith.constant 32 : index
    %c0_30 = arith.constant 0 : index
    %80 = vector.load %arg11[%c32, %c0_30] : memref<128x512xf32, #tpu.memory_space<vmem>>, vector<16x512xf32>
    %81 = arith.truncf %77 : vector<16x128xf32> to vector<16x128xbf16>
    %cst_31 = arith.constant dense<0.000000e+00> : vector<16x512xf32>
    %82 = tpu.matmul %81, %1, %cst_31 {dimension_numbers = #tpu.dot_dimension_numbers<[1], [0], [0], [1], [0, 0, 1, 1], [], []>} : vector<16x128xbf16>, vector<128x512xbf16>, vector<16x512xf32> -> vector<16x512xf32>
    %83 = arith.addf %80, %82 : vector<16x512xf32>
    %84 = vector.extract_strided_slice %83 {offsets = [0, 0], sizes = [16, 128], strides = [1, 1]} : vector<16x512xf32> to vector<16x128xf32>
    %cst_32 = arith.constant 0.000000e+00 : f32
    %85 = vector.broadcast %cst_32 : f32 to vector<16x128xf32>
    %86 = arith.subf %85, %84 : vector<16x128xf32>
    %87 = math.exp %86 : vector<16x128xf32>
    %cst_33 = arith.constant 1.000000e+00 : f32
    %88 = vector.broadcast %cst_33 : f32 to vector<16x128xf32>
    %89 = arith.addf %88, %87 : vector<16x128xf32>
    %90 = tpu.reciprocal %89 {approx = true} : vector<16x128xf32> -> vector<16x128xf32>
    %91 = vector.extract_strided_slice %83 {offsets = [0, 128], sizes = [16, 128], strides = [1, 1]} : vector<16x512xf32> to vector<16x128xf32>
    %cst_34 = arith.constant 0.000000e+00 : f32
    %92 = vector.broadcast %cst_34 : f32 to vector<16x128xf32>
    %93 = arith.subf %92, %91 : vector<16x128xf32>
    %94 = math.exp %93 : vector<16x128xf32>
    %cst_35 = arith.constant 1.000000e+00 : f32
    %95 = vector.broadcast %cst_35 : f32 to vector<16x128xf32>
    %96 = arith.addf %95, %94 : vector<16x128xf32>
    %97 = tpu.reciprocal %96 {approx = true} : vector<16x128xf32> -> vector<16x128xf32>
    %98 = vector.extract_strided_slice %83 {offsets = [0, 256], sizes = [16, 128], strides = [1, 1]} : vector<16x512xf32> to vector<16x128xf32>
    %99 = math.tanh %98 : vector<16x128xf32>
    %100 = vector.extract_strided_slice %83 {offsets = [0, 384], sizes = [16, 128], strides = [1, 1]} : vector<16x512xf32> to vector<16x128xf32>
    %cst_36 = arith.constant 0.000000e+00 : f32
    %101 = vector.broadcast %cst_36 : f32 to vector<16x128xf32>
    %102 = arith.subf %101, %100 : vector<16x128xf32>
    %103 = math.exp %102 : vector<16x128xf32>
    %cst_37 = arith.constant 1.000000e+00 : f32
    %104 = vector.broadcast %cst_37 : f32 to vector<16x128xf32>
    %105 = arith.addf %104, %103 : vector<16x128xf32>
    %106 = tpu.reciprocal %105 {approx = true} : vector<16x128xf32> -> vector<16x128xf32>
    %107 = arith.mulf %97, %75 : vector<16x128xf32>
    %108 = arith.mulf %90, %99 : vector<16x128xf32>
    %109 = arith.addf %107, %108 : vector<16x128xf32>
    %110 = math.tanh %109 : vector<16x128xf32>
    %111 = arith.mulf %106, %110 : vector<16x128xf32>
    %112 = arith.truncf %111 : vector<16x128xf32> to vector<16x128xbf16>
    %c32_38 = arith.constant 32 : index
    %c0_39 = arith.constant 0 : index
    %113 = vector.load %arg10[%c32_38, %c0_39] : memref<128x128xbf16, #tpu.memory_space<vmem>>, vector<16x128xbf16>
    tpu.vector_store %arg10[%c32_38, %c0_39], %112 {strides = array<i32>} : memref<128x128xbf16, #tpu.memory_space<vmem>>, vector<16x128xbf16>,
    %c48 = arith.constant 48 : index
    %c0_40 = arith.constant 0 : index
    %114 = vector.load %arg11[%c48, %c0_40] : memref<128x512xf32, #tpu.memory_space<vmem>>, vector<16x512xf32>
    %115 = arith.truncf %111 : vector<16x128xf32> to vector<16x128xbf16>
    %cst_41 = arith.constant dense<0.000000e+00> : vector<16x512xf32>
    %116 = tpu.matmul %115, %1, %cst_41 {dimension_numbers = #tpu.dot_dimension_numbers<[1], [0], [0], [1], [0, 0, 1, 1], [], []>} : vector<16x128xbf16>, vector<128x512xbf16>, vector<16x512xf32> -> vector<16x512xf32>
    %117 = arith.addf %114, %116 : vector<16x512xf32>
    %118 = vector.extract_strided_slice %117 {offsets = [0, 0], sizes = [16, 128], strides = [1, 1]} : vector<16x512xf32> to vector<16x128xf32>
    %cst_42 = arith.constant 0.000000e+00 : f32
    %119 = vector.broadcast %cst_42 : f32 to vector<16x128xf32>
    %120 = arith.subf %119, %118 : vector<16x128xf32>
    %121 = math.exp %120 : vector<16x128xf32>
    %cst_43 = arith.constant 1.000000e+00 : f32
    %122 = vector.broadcast %cst_43 : f32 to vector<16x128xf32>
    %123 = arith.addf %122, %121 : vector<16x128xf32>
    %124 = tpu.reciprocal %123 {approx = true} : vector<16x128xf32> -> vector<16x128xf32>
    %125 = vector.extract_strided_slice %117 {offsets = [0, 128], sizes = [16, 128], strides = [1, 1]} : vector<16x512xf32> to vector<16x128xf32>
    %cst_44 = arith.constant 0.000000e+00 : f32
    %126 = vector.broadcast %cst_44 : f32 to vector<16x128xf32>
    %127 = arith.subf %126, %125 : vector<16x128xf32>
    %128 = math.exp %127 : vector<16x128xf32>
    %cst_45 = arith.constant 1.000000e+00 : f32
    %129 = vector.broadcast %cst_45 : f32 to vector<16x128xf32>
    %130 = arith.addf %129, %128 : vector<16x128xf32>
    %131 = tpu.reciprocal %130 {approx = true} : vector<16x128xf32> -> vector<16x128xf32>
    %132 = vector.extract_strided_slice %117 {offsets = [0, 256], sizes = [16, 128], strides = [1, 1]} : vector<16x512xf32> to vector<16x128xf32>
    %133 = math.tanh %132 : vector<16x128xf32>
    %134 = vector.extract_strided_slice %117 {offsets = [0, 384], sizes = [16, 128], strides = [1, 1]} : vector<16x512xf32> to vector<16x128xf32>
    %cst_46 = arith.constant 0.000000e+00 : f32
    %135 = vector.broadcast %cst_46 : f32 to vector<16x128xf32>
    %136 = arith.subf %135, %134 : vector<16x128xf32>
    %137 = math.exp %136 : vector<16x128xf32>
    %cst_47 = arith.constant 1.000000e+00 : f32
    %138 = vector.broadcast %cst_47 : f32 to vector<16x128xf32>
    %139 = arith.addf %138, %137 : vector<16x128xf32>
    %140 = tpu.reciprocal %139 {approx = true} : vector<16x128xf32> -> vector<16x128xf32>
    %141 = arith.mulf %131, %109 : vector<16x128xf32>
    %142 = arith.mulf %124, %133 : vector<16x128xf32>
    %143 = arith.addf %141, %142 : vector<16x128xf32>
    %144 = math.tanh %143 : vector<16x128xf32>
    %145 = arith.mulf %140, %144 : vector<16x128xf32>
    %146 = arith.truncf %145 : vector<16x128xf32> to vector<16x128xbf16>
    %c48_48 = arith.constant 48 : index
    %c0_49 = arith.constant 0 : index
    %147 = vector.load %arg10[%c48_48, %c0_49] : memref<128x128xbf16, #tpu.memory_space<vmem>>, vector<16x128xbf16>
    tpu.vector_store %arg10[%c48_48, %c0_49], %146 {strides = array<i32>} : memref<128x128xbf16, #tpu.memory_space<vmem>>, vector<16x128xbf16>,
    %c64 = arith.constant 64 : index
    %c0_50 = arith.constant 0 : index
    %148 = vector.load %arg11[%c64, %c0_50] : memref<128x512xf32, #tpu.memory_space<vmem>>, vector<16x512xf32>
    %149 = arith.truncf %145 : vector<16x128xf32> to vector<16x128xbf16>
    %cst_51 = arith.constant dense<0.000000e+00> : vector<16x512xf32>
    %150 = tpu.matmul %149, %1, %cst_51 {dimension_numbers = #tpu.dot_dimension_numbers<[1], [0], [0], [1], [0, 0, 1, 1], [], []>} : vector<16x128xbf16>, vector<128x512xbf16>, vector<16x512xf32> -> vector<16x512xf32>
    %151 = arith.addf %148, %150 : vector<16x512xf32>
    %152 = vector.extract_strided_slice %151 {offsets = [0, 0], sizes = [16, 128], strides = [1, 1]} : vector<16x512xf32> to vector<16x128xf32>
    %cst_52 = arith.constant 0.000000e+00 : f32
    %153 = vector.broadcast %cst_52 : f32 to vector<16x128xf32>
    %154 = arith.subf %153, %152 : vector<16x128xf32>
    %155 = math.exp %154 : vector<16x128xf32>
    %cst_53 = arith.constant 1.000000e+00 : f32
    %156 = vector.broadcast %cst_53 : f32 to vector<16x128xf32>
    %157 = arith.addf %156, %155 : vector<16x128xf32>
    %158 = tpu.reciprocal %157 {approx = true} : vector<16x128xf32> -> vector<16x128xf32>
    %159 = vector.extract_strided_slice %151 {offsets = [0, 128], sizes = [16, 128], strides = [1, 1]} : vector<16x512xf32> to vector<16x128xf32>
    %cst_54 = arith.constant 0.000000e+00 : f32
    %160 = vector.broadcast %cst_54 : f32 to vector<16x128xf32>
    %161 = arith.subf %160, %159 : vector<16x128xf32>
    %162 = math.exp %161 : vector<16x128xf32>
    %cst_55 = arith.constant 1.000000e+00 : f32
    %163 = vector.broadcast %cst_55 : f32 to vector<16x128xf32>
    %164 = arith.addf %163, %162 : vector<16x128xf32>
    %165 = tpu.reciprocal %164 {approx = true} : vector<16x128xf32> -> vector<16x128xf32>
    %166 = vector.extract_strided_slice %151 {offsets = [0, 256], sizes = [16, 128], strides = [1, 1]} : vector<16x512xf32> to vector<16x128xf32>
    %167 = math.tanh %166 : vector<16x128xf32>
    %168 = vector.extract_strided_slice %151 {offsets = [0, 384], sizes = [16, 128], strides = [1, 1]} : vector<16x512xf32> to vector<16x128xf32>
    %cst_56 = arith.constant 0.000000e+00 : f32
    %169 = vector.broadcast %cst_56 : f32 to vector<16x128xf32>
    %170 = arith.subf %169, %168 : vector<16x128xf32>
    %171 = math.exp %170 : vector<16x128xf32>
    %cst_57 = arith.constant 1.000000e+00 : f32
    %172 = vector.broadcast %cst_57 : f32 to vector<16x128xf32>
    %173 = arith.addf %172, %171 : vector<16x128xf32>
    %174 = tpu.reciprocal %173 {approx = true} : vector<16x128xf32> -> vector<16x128xf32>
    %175 = arith.mulf %165, %143 : vector<16x128xf32>
    %176 = arith.mulf %158, %167 : vector<16x128xf32>
    %177 = arith.addf %175, %176 : vector<16x128xf32>
    %178 = math.tanh %177 : vector<16x128xf32>
    %179 = arith.mulf %174, %178 : vector<16x128xf32>
    %180 = arith.truncf %179 : vector<16x128xf32> to vector<16x128xbf16>
    %c64_58 = arith.constant 64 : index
    %c0_59 = arith.constant 0 : index
    %181 = vector.load %arg10[%c64_58, %c0_59] : memref<128x128xbf16, #tpu.memory_space<vmem>>, vector<16x128xbf16>
    tpu.vector_store %arg10[%c64_58, %c0_59], %180 {strides = array<i32>} : memref<128x128xbf16, #tpu.memory_space<vmem>>, vector<16x128xbf16>,
    %c80 = arith.constant 80 : index
    %c0_60 = arith.constant 0 : index
    %182 = vector.load %arg11[%c80, %c0_60] : memref<128x512xf32, #tpu.memory_space<vmem>>, vector<16x512xf32>
    %183 = arith.truncf %179 : vector<16x128xf32> to vector<16x128xbf16>
    %cst_61 = arith.constant dense<0.000000e+00> : vector<16x512xf32>
    %184 = tpu.matmul %183, %1, %cst_61 {dimension_numbers = #tpu.dot_dimension_numbers<[1], [0], [0], [1], [0, 0, 1, 1], [], []>} : vector<16x128xbf16>, vector<128x512xbf16>, vector<16x512xf32> -> vector<16x512xf32>
    %185 = arith.addf %182, %184 : vector<16x512xf32>
    %186 = vector.extract_strided_slice %185 {offsets = [0, 0], sizes = [16, 128], strides = [1, 1]} : vector<16x512xf32> to vector<16x128xf32>
    %cst_62 = arith.constant 0.000000e+00 : f32
    %187 = vector.broadcast %cst_62 : f32 to vector<16x128xf32>
    %188 = arith.subf %187, %186 : vector<16x128xf32>
    %189 = math.exp %188 : vector<16x128xf32>
    %cst_63 = arith.constant 1.000000e+00 : f32
    %190 = vector.broadcast %cst_63 : f32 to vector<16x128xf32>
    %191 = arith.addf %190, %189 : vector<16x128xf32>
    %192 = tpu.reciprocal %191 {approx = true} : vector<16x128xf32> -> vector<16x128xf32>
    %193 = vector.extract_strided_slice %185 {offsets = [0, 128], sizes = [16, 128], strides = [1, 1]} : vector<16x512xf32> to vector<16x128xf32>
    %cst_64 = arith.constant 0.000000e+00 : f32
    %194 = vector.broadcast %cst_64 : f32 to vector<16x128xf32>
    %195 = arith.subf %194, %193 : vector<16x128xf32>
    %196 = math.exp %195 : vector<16x128xf32>
    %cst_65 = arith.constant 1.000000e+00 : f32
    %197 = vector.broadcast %cst_65 : f32 to vector<16x128xf32>
    %198 = arith.addf %197, %196 : vector<16x128xf32>
    %199 = tpu.reciprocal %198 {approx = true} : vector<16x128xf32> -> vector<16x128xf32>
    %200 = vector.extract_strided_slice %185 {offsets = [0, 256], sizes = [16, 128], strides = [1, 1]} : vector<16x512xf32> to vector<16x128xf32>
    %201 = math.tanh %200 : vector<16x128xf32>
    %202 = vector.extract_strided_slice %185 {offsets = [0, 384], sizes = [16, 128], strides = [1, 1]} : vector<16x512xf32> to vector<16x128xf32>
    %cst_66 = arith.constant 0.000000e+00 : f32
    %203 = vector.broadcast %cst_66 : f32 to vector<16x128xf32>
    %204 = arith.subf %203, %202 : vector<16x128xf32>
    %205 = math.exp %204 : vector<16x128xf32>
    %cst_67 = arith.constant 1.000000e+00 : f32
    %206 = vector.broadcast %cst_67 : f32 to vector<16x128xf32>
    %207 = arith.addf %206, %205 : vector<16x128xf32>
    %208 = tpu.reciprocal %207 {approx = true} : vector<16x128xf32> -> vector<16x128xf32>
    %209 = arith.mulf %199, %177 : vector<16x128xf32>
    %210 = arith.mulf %192, %201 : vector<16x128xf32>
    %211 = arith.addf %209, %210 : vector<16x128xf32>
    %212 = math.tanh %211 : vector<16x128xf32>
    %213 = arith.mulf %208, %212 : vector<16x128xf32>
    %214 = arith.truncf %213 : vector<16x128xf32> to vector<16x128xbf16>
    %c80_68 = arith.constant 80 : index
    %c0_69 = arith.constant 0 : index
    %215 = vector.load %arg10[%c80_68, %c0_69] : memref<128x128xbf16, #tpu.memory_space<vmem>>, vector<16x128xbf16>
    tpu.vector_store %arg10[%c80_68, %c0_69], %214 {strides = array<i32>} : memref<128x128xbf16, #tpu.memory_space<vmem>>, vector<16x128xbf16>,
    %c96 = arith.constant 96 : index
    %c0_70 = arith.constant 0 : index
    %216 = vector.load %arg11[%c96, %c0_70] : memref<128x512xf32, #tpu.memory_space<vmem>>, vector<16x512xf32>
    %217 = arith.truncf %213 : vector<16x128xf32> to vector<16x128xbf16>
    %cst_71 = arith.constant dense<0.000000e+00> : vector<16x512xf32>
    %218 = tpu.matmul %217, %1, %cst_71 {dimension_numbers = #tpu.dot_dimension_numbers<[1], [0], [0], [1], [0, 0, 1, 1], [], []>} : vector<16x128xbf16>, vector<128x512xbf16>, vector<16x512xf32> -> vector<16x512xf32>
    %219 = arith.addf %216, %218 : vector<16x512xf32>
    %220 = vector.extract_strided_slice %219 {offsets = [0, 0], sizes = [16, 128], strides = [1, 1]} : vector<16x512xf32> to vector<16x128xf32>
    %cst_72 = arith.constant 0.000000e+00 : f32
    %221 = vector.broadcast %cst_72 : f32 to vector<16x128xf32>
    %222 = arith.subf %221, %220 : vector<16x128xf32>
    %223 = math.exp %222 : vector<16x128xf32>
    %cst_73 = arith.constant 1.000000e+00 : f32
    %224 = vector.broadcast %cst_73 : f32 to vector<16x128xf32>
    %225 = arith.addf %224, %223 : vector<16x128xf32>
    %226 = tpu.reciprocal %225 {approx = true} : vector<16x128xf32> -> vector<16x128xf32>
    %227 = vector.extract_strided_slice %219 {offsets = [0, 128], sizes = [16, 128], strides = [1, 1]} : vector<16x512xf32> to vector<16x128xf32>
    %cst_74 = arith.constant 0.000000e+00 : f32
    %228 = vector.broadcast %cst_74 : f32 to vector<16x128xf32>
    %229 = arith.subf %228, %227 : vector<16x128xf32>
    %230 = math.exp %229 : vector<16x128xf32>
    %cst_75 = arith.constant 1.000000e+00 : f32
    %231 = vector.broadcast %cst_75 : f32 to vector<16x128xf32>
    %232 = arith.addf %231, %230 : vector<16x128xf32>
    %233 = tpu.reciprocal %232 {approx = true} : vector<16x128xf32> -> vector<16x128xf32>
    %234 = vector.extract_strided_slice %219 {offsets = [0, 256], sizes = [16, 128], strides = [1, 1]} : vector<16x512xf32> to vector<16x128xf32>
    %235 = math.tanh %234 : vector<16x128xf32>
    %236 = vector.extract_strided_slice %219 {offsets = [0, 384], sizes = [16, 128], strides = [1, 1]} : vector<16x512xf32> to vector<16x128xf32>
    %cst_76 = arith.constant 0.000000e+00 : f32
    %237 = vector.broadcast %cst_76 : f32 to vector<16x128xf32>
    %238 = arith.subf %237, %236 : vector<16x128xf32>
    %239 = math.exp %238 : vector<16x128xf32>
    %cst_77 = arith.constant 1.000000e+00 : f32
    %240 = vector.broadcast %cst_77 : f32 to vector<16x128xf32>
    %241 = arith.addf %240, %239 : vector<16x128xf32>
    %242 = tpu.reciprocal %241 {approx = true} : vector<16x128xf32> -> vector<16x128xf32>
    %243 = arith.mulf %233, %211 : vector<16x128xf32>
    %244 = arith.mulf %226, %235 : vector<16x128xf32>
    %245 = arith.addf %243, %244 : vector<16x128xf32>
    %246 = math.tanh %245 : vector<16x128xf32>
    %247 = arith.mulf %242, %246 : vector<16x128xf32>
    %248 = arith.truncf %247 : vector<16x128xf32> to vector<16x128xbf16>
    %c96_78 = arith.constant 96 : index
    %c0_79 = arith.constant 0 : index
    %249 = vector.load %arg10[%c96_78, %c0_79] : memref<128x128xbf16, #tpu.memory_space<vmem>>, vector<16x128xbf16>
    tpu.vector_store %arg10[%c96_78, %c0_79], %248 {strides = array<i32>} : memref<128x128xbf16, #tpu.memory_space<vmem>>, vector<16x128xbf16>,
    %c112 = arith.constant 112 : index
    %c0_80 = arith.constant 0 : index
    %250 = vector.load %arg11[%c112, %c0_80] : memref<128x512xf32, #tpu.memory_space<vmem>>, vector<16x512xf32>
    %251 = arith.truncf %247 : vector<16x128xf32> to vector<16x128xbf16>
    %cst_81 = arith.constant dense<0.000000e+00> : vector<16x512xf32>
    %252 = tpu.matmul %251, %1, %cst_81 {dimension_numbers = #tpu.dot_dimension_numbers<[1], [0], [0], [1], [0, 0, 1, 1], [], []>} : vector<16x128xbf16>, vector<128x512xbf16>, vector<16x512xf32> -> vector<16x512xf32>
    %253 = arith.addf %250, %252 : vector<16x512xf32>
    %254 = vector.extract_strided_slice %253 {offsets = [0, 0], sizes = [16, 128], strides = [1, 1]} : vector<16x512xf32> to vector<16x128xf32>
    %cst_82 = arith.constant 0.000000e+00 : f32
    %255 = vector.broadcast %cst_82 : f32 to vector<16x128xf32>
    %256 = arith.subf %255, %254 : vector<16x128xf32>
    %257 = math.exp %256 : vector<16x128xf32>
    %cst_83 = arith.constant 1.000000e+00 : f32
    %258 = vector.broadcast %cst_83 : f32 to vector<16x128xf32>
    %259 = arith.addf %258, %257 : vector<16x128xf32>
    %260 = tpu.reciprocal %259 {approx = true} : vector<16x128xf32> -> vector<16x128xf32>
    %261 = vector.extract_strided_slice %253 {offsets = [0, 128], sizes = [16, 128], strides = [1, 1]} : vector<16x512xf32> to vector<16x128xf32>
    %cst_84 = arith.constant 0.000000e+00 : f32
    %262 = vector.broadcast %cst_84 : f32 to vector<16x128xf32>
    %263 = arith.subf %262, %261 : vector<16x128xf32>
    %264 = math.exp %263 : vector<16x128xf32>
    %cst_85 = arith.constant 1.000000e+00 : f32
    %265 = vector.broadcast %cst_85 : f32 to vector<16x128xf32>
    %266 = arith.addf %265, %264 : vector<16x128xf32>
    %267 = tpu.reciprocal %266 {approx = true} : vector<16x128xf32> -> vector<16x128xf32>
    %268 = vector.extract_strided_slice %253 {offsets = [0, 256], sizes = [16, 128], strides = [1, 1]} : vector<16x512xf32> to vector<16x128xf32>
    %269 = math.tanh %268 : vector<16x128xf32>
    %270 = vector.extract_strided_slice %253 {offsets = [0, 384], sizes = [16, 128], strides = [1, 1]} : vector<16x512xf32> to vector<16x128xf32>
    %cst_86 = arith.constant 0.000000e+00 : f32
    %271 = vector.broadcast %cst_86 : f32 to vector<16x128xf32>
    %272 = arith.subf %271, %270 : vector<16x128xf32>
    %273 = math.exp %272 : vector<16x128xf32>
    %cst_87 = arith.constant 1.000000e+00 : f32
    %274 = vector.broadcast %cst_87 : f32 to vector<16x128xf32>
    %275 = arith.addf %274, %273 : vector<16x128xf32>
    %276 = tpu.reciprocal %275 {approx = true} : vector<16x128xf32> -> vector<16x128xf32>
    %277 = arith.mulf %267, %245 : vector<16x128xf32>
    %278 = arith.mulf %260, %269 : vector<16x128xf32>
    %279 = arith.addf %277, %278 : vector<16x128xf32>
    %280 = math.tanh %279 : vector<16x128xf32>
    %281 = arith.mulf %276, %280 : vector<16x128xf32>
    %282 = arith.truncf %281 : vector<16x128xf32> to vector<16x128xbf16>
    %c112_88 = arith.constant 112 : index
    %c0_89 = arith.constant 0 : index
    %283 = vector.load %arg10[%c112_88, %c0_89] : memref<128x128xbf16, #tpu.memory_space<vmem>>, vector<16x128xbf16>
    tpu.vector_store %arg10[%c112_88, %c0_89], %282 {strides = array<i32>} : memref<128x128xbf16, #tpu.memory_space<vmem>>, vector<16x128xbf16>,
    %c0_90 = arith.constant 0 : index
    %c0_91 = arith.constant 0 : index
    %c0_92 = arith.constant 0 : index
    %284 = vector.load %arg8[%c0_90, %c0_91, %c0_92] : memref<1x16x128xf32, #tpu.memory_space<vmem>>, vector<1x16x128xf32>
    %285 = vector.shape_cast %284 : vector<1x16x128xf32> to vector<16x128xf32>
    %286 = vector.shape_cast %281 : vector<16x128xf32> to vector<1x16x128xf32>
    tpu.vector_store %arg8[%c0_90, %c0_91, %c0_92], %286 {strides = array<i32>} : memref<1x16x128xf32, #tpu.memory_space<vmem>>, vector<1x16x128xf32>,
    %c0_93 = arith.constant 0 : index
    %c0_94 = arith.constant 0 : index
    %c0_95 = arith.constant 0 : index
    %287 = vector.load %arg9[%c0_93, %c0_94, %c0_95] : memref<1x16x128xf32, #tpu.memory_space<vmem>>, vector<1x16x128xf32>
    %288 = vector.shape_cast %287 : vector<1x16x128xf32> to vector<16x128xf32>
    %289 = vector.shape_cast %279 : vector<16x128xf32> to vector<1x16x128xf32>
    tpu.vector_store %arg9[%c0_93, %c0_94, %c0_95], %289 {strides = array<i32>} : memref<1x16x128xf32, #tpu.memory_space<vmem>>, vector<1x16x128xf32>,
    %c1_i32 = arith.constant 1 : i32
    %290 = arith.cmpi eq, %arg0, %c1_i32 : i32
    %291 = arith.extui %290 : i1 to i32
    %c0_i32_96 = arith.constant 0 : i32
    %292 = arith.cmpi ne, %291, %c0_i32_96 : i32
    scf.if %292 {
      %c0_97 = arith.constant 0 : index
      %c0_98 = arith.constant 0 : index
      %293 = vector.load %arg5[%c0_97, %c0_98] : memref<128x128xf32, #tpu.memory_space<vmem>>, vector<128x128xf32>
      %cst_99 = arith.constant dense<0.000000e+00> : vector<16x128xf32>
      %294 = tpu.matmul %281, %293, %cst_99 {dimension_numbers = #tpu.dot_dimension_numbers<[1], [0], [0], [1], [0, 0, 1, 1], [], []>} : vector<16x128xf32>, vector<128x128xf32>, vector<16x128xf32> -> vector<16x128xf32>
      %c0_100 = arith.constant 0 : index
      %c0_101 = arith.constant 0 : index
      %295 = vector.load %arg6[%c0_100, %c0_101] : memref<1x128xf32, #tpu.memory_space<vmem>>, vector<1x128xf32>
      %296 = vector.broadcast %295 : vector<1x128xf32> to vector<16x128xf32>
      %297 = arith.addf %294, %296 : vector<16x128xf32>
      %c0_102 = arith.constant 0 : index
      %c0_103 = arith.constant 0 : index
      %298 = vector.load %arg7[%c0_102, %c0_103] : memref<16x128xf32, #tpu.memory_space<vmem>>, vector<16x128xf32>
      tpu.vector_store %arg7[%c0_102, %c0_103], %297 {strides = array<i32>} : memref<16x128xf32, #tpu.memory_space<vmem>>, vector<16x128xf32>,
    } else {
    }
    return
  }
  func.func @transform_0(%arg0: i32) -> (i32, i32) {
    %c0_i32 = arith.constant 0 : i32
    %c0_i32_0 = arith.constant 0 : i32
    %c0_i32_1 = arith.constant 0 : i32
    return %c0_i32, %c0_i32_0 : i32, i32
  }
  func.func @transform_1(%arg0: i32) -> (i32, i32, i32) {
    %c0_i32 = arith.constant 0 : i32
    %c0_i32_0 = arith.constant 0 : i32
    %c0_i32_1 = arith.constant 0 : i32
    return %arg0, %c0_i32, %c0_i32_0 : i32, i32, i32
  }
  func.func @transform_2(%arg0: i32) -> (i32, i32, i32) {
    %c0_i32 = arith.constant 0 : i32
    %c0_i32_0 = arith.constant 0 : i32
    %c0_i32_1 = arith.constant 0 : i32
    return %arg0, %c0_i32, %c0_i32_0 : i32, i32, i32
  }
  func.func @transform_3(%arg0: i32) -> (i32, i32, i32) {
    %c0_i32 = arith.constant 0 : i32
    %c0_i32_0 = arith.constant 0 : i32
    %c0_i32_1 = arith.constant 0 : i32
    return %arg0, %c0_i32, %c0_i32_0 : i32, i32, i32
  }
  func.func @transform_4(%arg0: i32) -> (i32, i32) {
    %c0_i32 = arith.constant 0 : i32
    %c0_i32_0 = arith.constant 0 : i32
    %c0_i32_1 = arith.constant 0 : i32
    return %c0_i32, %c0_i32_0 : i32, i32
  }
  func.func @transform_5(%arg0: i32) -> (i32, i32) {
    %c0_i32 = arith.constant 0 : i32
    %c0_i32_0 = arith.constant 0 : i32
    %c0_i32_1 = arith.constant 0 : i32
    return %c0_i32, %c0_i32_0 : i32, i32
  }
  func.func @transform_6(%arg0: i32) -> (i32, i32) {
    %c0_i32 = arith.constant 0 : i32
    %c0_i32_0 = arith.constant 0 : i32
    %c0_i32_1 = arith.constant 0 : i32
    return %c0_i32, %c0_i32_0 : i32, i32
  }
  func.func @transform_7(%arg0: i32) -> (i32, i32, i32) {
    %c0_i32 = arith.constant 0 : i32
    %c0_i32_0 = arith.constant 0 : i32
    %c0_i32_1 = arith.constant 0 : i32
    return %arg0, %c0_i32, %c0_i32_0 : i32, i32, i32
  }
  func.func @transform_8(%arg0: i32) -> (i32, i32, i32) {
    %c0_i32 = arith.constant 0 : i32
    %c0_i32_0 = arith.constant 0 : i32
    %c0_i32_1 = arith.constant 0 : i32
    return %arg0, %c0_i32, %c0_i32_0 : i32, i32, i32
  }
}

</mosaic_0001>

<bundles_post_ra>
// kernel: tpu_custom_call.1
= control target key start
LH: loop header
LB: loop body
LE: loop exit
PB: predicated region body
PF: predicated region fallthrough
CT: control target
= control target key end

     0   :  { %s5370_s0 = inlined_call_operand.hbm [shape: bf16[128,128], index: 0, kind: input, shape index: {}]   ;;  %s5371_s1 = inlined_call_operand.hbm [shape: bf16[2,128,512], index: 1, kind: input, shape index: {}]   ;;  %s5372_s2 = inlined_call_operand.hbm [shape: bf16[2,128,512], index: 2, kind: input, shape index: {}]   ;;  %s5373_s3 = inlined_call_operand.vmem [shape: f32[2,1,512], index: 3, kind: input, shape index: {}]   ;;  %s5374_s4 = inlined_call_operand.hbm [shape: f32[128,128], index: 4, kind: input, shape index: {}]   ;;  %s5375_s5 = inlined_call_operand.vmem [shape: f32[1,128], index: 5, kind: input, shape index: {}]   ;;  %s5376_s6 = inlined_call_operand.hbm [shape: f32[16,128], index: 6, kind: output, shape index: {0}]   ;;  %s5377_s7 = inlined_call_operand.hbm [shape: f32[2,16,128], index: 7, kind: output, shape index: {1}]   ;;  %s5378_s8 = inlined_call_operand.hbm [shape: f32[2,16,128], index: 8, kind: output, shape index: {2}]  }
   0x1   :  { %5393 = sst [smem:[#allocation26_spill]] %s5371_s1 }
   0x2   :  { %14 = vsyncpa [#allocation5], 0 }
   0x3   :  { %15 = vsyncpa [#allocation8], 0 }
   0x4   :  { %17 = vsyncpa [#allocation8 + $0x1], 0 }
   0x5   :  { %18 = vsyncpa [#allocation11], 0 }
   0x6   :  { %19 = vsyncpa [#allocation6], 0 }
   0x7   :  { %20 = vsyncpa [#allocation14], 0 }
   0x8   :  { %22 = vsyncpa [#allocation14 + $0x1], 0  ;;  %s4181_s27 = smov 0   ;;  %s4183_s28 = smov 0  }
   0x9   :  { %s4185_s29 = smov 0   ;;  %s4187_s30 = smov 0  }
   0xa LB: > { %5394 = sst [smem:[#allocation21_spill]] %s4112_s29  ;;  %s4202_s9 = sadd.s32 1, %s4116_s30   ;;  %s4116_s30 = sphi %s4187_s30, %s5427_s30   ;;  %s4112_s29 = sphi %s4185_s29, %s5429_s29   ;;  %s4108_s28 = sphi %s4183_s28, %s5431_s28   ;;  %s4104_s27 = sphi %s4181_s27, %s5430_s27  }
   0xb   : > { %5395 = sst [smem:[#allocation22_spill]] %s4116_s30  ;;  %s56_s10 = sadd.s32 1, %s4112_s29 }
   0xc   : > { %5396 = sst [smem:[#allocation23_spill]] %s4202_s9  ;;  %s53_s11 = ssub.s32 %s4116_s30, %s4202_s9 }
   0xd   : > { %p63_p0 = scmp.ne.s32.totalorder %s4112_s29, %s4108_s28  ;;  %p54_p1 = scmp.eq.s32.totalorder %s53_s11, 0 }
   0xe   : > { %p64_p2 = scmp.eq.s32.totalorder %s4116_s30, 0  ;;  %p3456_p4 = scmp.lt.s32.totalorder %s4116_s30, 2 }
   0xf   : > { %s4213_s12 = scalar_select %p54_p1, %s4112_s29, %s56_s10  }
  0x10   : > { %p65_p5 = por %p64_p2, %p63_p0  ;;  %s289_s13 = sand.u32 1, %s4116_s30  }
  0x11   : > { %5397 = sst [smem:[#allocation24_spill]] %s4213_s12  ;;  %s291_s14 = sand.u32 1, %s4112_s29  }
  0x12   : > { %s4220_s15 = sshll.u32 %s291_s14, 8  ;;  %s3324_s16 = sshll.u32 %s4116_s30, 12 }
  0x13   : > { %s5398_s1 = sld [smem:[#allocation26_spill]]  ;;  %s293_s20 = scalar_lea.vmem [#allocation7], %s4220_s15 }
  0x14   : > { %s300_s21 = sshll.u32 %s293_s20, 4  ;;  %p4231_p6 = pnand %p3456_p4, %p65_p5  ;;  %s4235_s21 = int_to_ptr.vmem [resolvable:$true] %s300_s21 }
  0x15   : > { %s4237_s23 = scalar_lea.sflag [#allocation8], %s289_s13 }
  0x16   : > { %p5384_p8 = pneg %p4231_p6 }
  0x19   : > { %s4228_s19 = scalar_lea.hbm %s5398_s1, %s3324_s16  ;;  %s3873_s10 = scalar_lea.hbm %s5398_s1, 8192 }
  0x1a   : > { %s3868_s24 = scalar_lea.hbm %s4228_s19, 4096  ;;  %p3874_p11 = scmp.lt.u32.totalorder %s4228_s19, %s5398_s1 }
  0x1b   : > { %p3869_p7 = scmp.ne.s32.totalorder %s4228_s19, %s3868_s24  ;;  %p3875_p12 = scmp.lt.u32.totalorder %s3873_s10, %s3868_s24 }
  0x1c   : > { %p3877_p1 = scmp.lt.u32.totalorder %s3868_s24, %s4228_s19 }
  0x1d   : > { %p3871_p9 = pnand %p5384_p8, %p3869_p7  ;;  %p3876_p13 = por %p3875_p12, %p3874_p11 }
  0x1f   : > { %p3872_p10 = pneg %p3871_p9  ;;  %p3878_p2 = por %p3877_p1, %p3876_p13 }
  0x21   : > { %p3879_p4 = pnand %p3878_p2, %p3872_p10 }
  0x23   : > { %3882 = shalt.err (!%p3879_p4)
}
  0x24   : > { %s3883_s13 = scalar_lea.vmem %s4235_s21, 4096  ;;  %s4118_s17 = smov [#allocation7]  }
  0x25   : > { %p3884_p5 = scmp.ne.s32.totalorder %s4235_s21, %s3883_s13  ;;  %s3888_s18 = sshll.u32 %s4118_s17, 4  ;;  %s3889_s18 = int_to_ptr.vmem [resolvable:$false] %s3888_s18 }
  0x26   : > { %s3890_s20 = scalar_lea.vmem %s3889_s18, 8192  ;;  %p3891_p3 = scmp.lt.s32.totalorder %s4235_s21, %s3889_s18 }
  0x27   : > { %p3886_p7 = pnand %p3884_p5, %p5384_p8  ;;  %p3892_p11 = scmp.lt.s32.totalorder %s3890_s20, %s3883_s13 }
  0x29   : > { %p3887_p9 = pneg %p3886_p7  ;;  %p3893_p12 = por %p3892_p11, %p3891_p3 }
  0x2b   : > { %p3894_p13 = pnand %p3893_p12, %p3887_p9 }
  0x2d   : > { %3897 = shalt.err (!%p3894_p13)
}
  0x2e   : > { %s5380_s24 = smov 256   ;;  %s5381_s25 = smov 16  }
  0x2f   : > { %3443 = dma.hbm_to_vmem [thread:$0]  (!%p4231_p6), %s4228_s19, 4096, %s4235_s21, %s4237_s23, %s5380_s24, %s5380_s24, %s5381_s25  }
  0x30   : > { %s4273_s11 = scalar_lea.hbm %s5372_s2, %s3324_s16  ;;  %s4276_s14 = sadd.s32 4294967295, %s4116_s30  }
  0x31   : > { %s5379_s13 = sadd.s32 4294967294, %s4116_s30   ;;  %p69_p3 = scmp.ne.s32.totalorder %s4108_s28, %s4104_s27 }
  0x32   : > { %p5383_p10 = scmp.eq.s32.totalorder %s4276_s14, 0  ;;  %p5382_p1 = scmp.eq.s32.totalorder %s4276_s14, 1 }
  0x33   : > { %p214_p2 = scmp.eq.s32.totalorder %s5379_s13, 1  ;;  %p3188_p5 = scmp.ge.s32.totalorder %s4116_s30, 1 }
  0x34   : > { %p4287_p4 = por %p5383_p10, %p69_p3  ;;  %p4297_p7 = por %p5382_p1, %p63_p0 }
  0x35   : > { %p4301_p9 = por %p214_p2, %p69_p3  ;;  %p247_p11 = scmp.lt.s32.totalorder %s4116_s30, 3 }
  0x36   : > { %s5400_s19 = scalar_select %p4287_p4, 1, 0 }
  0x37   : > { %s5401_s16 = scalar_select %p4297_p7, 1, 0 }
  0x38   : > { %s5402_s21 = scalar_select %p4301_p9, 1, 0 }
  0x39   : > { %s314_s27 = scalar_lea.vmem [#allocation9], %s4220_s15  ;;  %p4308_p13 = pnand %p3188_p5, %p247_p11 }
  0x3a   : > { %5403 = sst [smem:[#allocation25_spill]] %s5402_s21  ;;  %s321_s17 = sshll.u32 %s314_s27, 4  ;;  %s4324_s17 = int_to_ptr.vmem [resolvable:$true] %s321_s17 }
  0x3b   : > { %s4121_s20 = smov [#allocation4]   ;;  %p3433_p0 = pneg %p4308_p13 }
  0x3c   : > { %s259_s26 = sshll.u32 %s4121_s20, 4  ;;  %s4122_s10 = smov [#allocation10]   ;;  %s4312_s26 = int_to_ptr.vmem [resolvable:$true] %s259_s26 }
  0x3d   : > { %s272_s13 = sshll.u32 %s4122_s10, 4  ;;  %p4318_p3 = pnand %p3433_p0, %p5383_p10  ;;  %s4322_s13 = int_to_ptr.vmem [resolvable:$true] %s272_s13 }
  0x3e   : > { %s3898_s20 = scalar_lea.hbm %s5370_s0, 1024 }
  0x3f   : > { %p3899_p2 = scmp.ne.s32.totalorder %s5370_s0, %s3898_s20  ;;  %p3900_p5 = pneg %p4318_p3 }
  0x40   : > { %p3905_p1 = scmp.lt.u32.totalorder %s3898_s20, %s5370_s0 }
  0x41   : > { %p3901_p11 = pnand %p3900_p5, %p3899_p2 }
  0x43   : > { %p3902_p0 = pneg %p3901_p11 }
  0x45   : > { %p3907_p12 = pnand %p3905_p1, %p3902_p0 }
  0x47   : > { %3910 = shalt.err (!%p3907_p12)
}
  0x48   : > { %s3911_s15 = scalar_lea.vmem %s4312_s26, 1024  ;;  %p3919_p7 = scmp.lt.s32.totalorder %s4312_s26, %s4312_s26 }
  0x49   : > { %p3912_p10 = scmp.ne.s32.totalorder %s4312_s26, %s3911_s15  ;;  %p3920_p2 = scmp.lt.s32.totalorder %s3911_s15, %s3911_s15 }
  0x4b   : > { %p3914_p8 = pnand %p3912_p10, %p3900_p5  ;;  %p3921_p11 = por %p3920_p2, %p3919_p7 }
  0x4d   : > { %p3915_p9 = pneg %p3914_p8 }
  0x4f   : > { %p3922_p4 = pnand %p3921_p11, %p3915_p9 }
  0x51   : > { %3925 = shalt.err (!%p3922_p4)
}
  0x52   : > { %s4123_s1 = smov 64   ;;  %s4124_s12 = smov 4  }
  0x53   : > { %3436 = dma.hbm_to_vmem [thread:$0]  (!%p4318_p3), %s5370_s0, 1024, %s4312_s26, [#allocation5], %s4123_s1, %s4123_s1, %s4124_s12  }
  0x54   : > { %s3926_s29 = scalar_lea.hbm %s5374_s4, 2048 }
  0x55   : > { %p3927_p8 = scmp.ne.s32.totalorder %s5374_s4, %s3926_s29  ;;  %p3933_p4 = scmp.lt.u32.totalorder %s3926_s29, %s5374_s4 }
  0x57   : > { %p3929_p10 = pnand %p3927_p8, %p3900_p5 }
  0x59   : > { %p3930_p1 = pneg %p3929_p10 }
  0x5b   : > { %p3935_p7 = pnand %p3933_p4, %p3930_p1 }
  0x5d   : > { %3938 = shalt.err (!%p3935_p7)
}
  0x5e   : > { %s3939_s26 = scalar_lea.vmem %s4322_s13, 2048  ;;  %p3947_p2 = scmp.lt.s32.totalorder %s4322_s13, %s4322_s13 }
  0x5f   : > { %p3940_p9 = scmp.ne.s32.totalorder %s4322_s13, %s3939_s26  ;;  %p3948_p11 = scmp.lt.s32.totalorder %s3939_s26, %s3939_s26 }
  0x61   : > { %p3942_p12 = pnand %p3940_p9, %p3900_p5  ;;  %p3949_p8 = por %p3948_p11, %p3947_p2 }
  0x63   : > { %p3943_p0 = pneg %p3942_p12 }
  0x65   : > { %p3950_p10 = pnand %p3949_p8, %p3943_p0 }
  0x67   : > { %3953 = shalt.err (!%p3950_p10)
}
  0x68   : > { %s4125_s30 = smov 128   ;;  %s4126_s29 = smov 8  }
  0x69   : > { %3439 = dma.hbm_to_vmem [thread:$0]  (!%p4318_p3), %s5374_s4, 2048, %s4322_s13, [#allocation11], %s4125_s30, %s4125_s30, %s4126_s29  }
  0x6a   : > { %s3954_s1 = scalar_lea.hbm %s4273_s11, 4096  ;;  %p5406_p1 = pneg %p4231_p6 }
  0x6b   : > { %p3955_p5 = scmp.ne.s32.totalorder %s4273_s11, %s3954_s1  ;;  %s3959_s27 = scalar_lea.hbm %s5372_s2, 8192 }
  0x6c   : > { %p3960_p9 = scmp.lt.u32.totalorder %s4273_s11, %s5372_s2  ;;  %p3961_p12 = scmp.lt.u32.totalorder %s3959_s27, %s3954_s1 }
  0x6d   : > { %p3957_p4 = pnand %p3955_p5, %p5406_p1  ;;  %p3963_p2 = scmp.lt.u32.totalorder %s3954_s1, %s4273_s11 }
  0x6e   : > { %p3962_p0 = por %p3961_p12, %p3960_p9 }
  0x6f   : > { %p3958_p7 = pneg %p3957_p4 }
  0x70   : > { %p3964_p11 = por %p3963_p2, %p3962_p0 }
  0x72   : > { %p3965_p8 = pnand %p3964_p11, %p3958_p7 }
  0x74   : > { %3968 = shalt.err (!%p3965_p8)
}
  0x75   : > { %s3969_s24 = scalar_lea.vmem %s4324_s17, 4096  ;;  %p5407_p10 = pmov %p5406_p1 }
  0x76   : > { %p3970_p3 = scmp.ne.s32.totalorder %s4324_s17, %s3969_s24  ;;  %s4127_s13 = smov [#allocation9]  }
  0x77   : > { %s3974_s15 = sshll.u32 %s4127_s13, 4  ;;  %s3975_s15 = int_to_ptr.vmem [resolvable:$false] %s3974_s15 }
  0x78   : > { %p3972_p5 = pnand %p3970_p3, %p5407_p10  ;;  %s3976_s26 = scalar_lea.vmem %s3975_s15, 8192 }
  0x79   : > { %p3977_p4 = scmp.lt.s32.totalorder %s4324_s17, %s3975_s15  ;;  %p3978_p9 = scmp.lt.s32.totalorder %s3976_s26, %s3969_s24 }
  0x7a   : > { %p3973_p1 = pneg %p3972_p5 }
  0x7b   : > { %p3979_p12 = por %p3978_p9, %p3977_p4 }
  0x7d   : > { %p3980_p0 = pnand %p3979_p12, %p3973_p1 }
  0x7f   : > { %3983 = shalt.err (!%p3980_p0)
}
  0x80   : > { %s5408_s30 = smov 16   ;;  %s5409_s29 = smov 256  }
  0x81   : > { %3446 = dma.hbm_to_vmem [thread:$0]  (!%p4231_p6), %s4273_s11, 4096, %s4324_s17, %s4237_s23, %s5409_s29, %s5409_s29, %s5408_s30  }
  0x82   : > { %340 = sbr.rel (%p4308_p13) target bundleno = 3236 (0xca4), region = 44  ;;  %p5410_p7 = scmp.eq.s32.totalorder (!%p4308_p13), %s4276_s14, 0 }
  0x89   : > { %4083 = dma.done.wait (%p5410_p7), [#allocation5], 1024   ;;  %p5411_p2 = pmov %p5410_p7 }
  0x8a   : > { %s346_s22 = sand.u32 1, %s4276_s14   ;;  %s348_s9 = sand.u32 1, %s4108_s28  }
  0x8b   : > { %4085 = vsyncadd (%p5411_p2), [#allocation5], 4294966272  ;;  %s3200_s21 = sshll.u32 %s348_s9, 8  ;;  %s347_s1 = scalar_lea.sflag [#allocation8], %s346_s22 }
  0x8c   : > { %s4415_s12 = scalar_lea.vmem [#allocation7], %s3200_s21  ;;  %p5412_p6 = scmp.ne.s32.totalorder %s5400_s19, 0 }
  0x8e   : > { %4087 = dma.done.wait (%p5412_p6), %s347_s1, 8192  }
  0x8f   : > { %4089 = vsyncadd (%p5412_p6), %s347_s1, 4294959104  ;;  %s4421_s23 = scalar_lea.vmem [#allocation9], %s3200_s21  ;;  %p5413_p13 = pmov %p5411_p2 }
  0x90   : > { %p5414_p11 = pmov %p5411_p2 }
  0x91   : > { %4091 = dma.done.wait (%p5413_p13), [#allocation11], 2048  }
  0x92   : > { %4093 = vsyncadd (%p5414_p11), [#allocation11], 4294965248  ;;  %s4427_s11 = sshll.u32 %s348_s9, 4  ;;  %p410_p8 = scmp.lt.s32.totalorder %s4276_s14, 1  ;;  %v4432_v0 = vld [vmem:[%s4421_s23] sm:$0xff]  ;;  %v4435_v1 = vld [vmem:[%s4421_s23 + $0x8] sm:$0xff] }
  0x93   : > { %v4438_v2 = vld [vmem:[%s4421_s23 + $0x10] sm:$0xff]  ;;  %v4441_v3 = vld [vmem:[%s4421_s23 + $0x18] sm:$0xff]  ;;  %v4444_v4 = vld [vmem:[%s4421_s23 + $0x20] sm:$0xff]  ;;  %s4533_s20 = scalar_lea.vmem [#allocation13], %s4427_s11  ;;  %s4536_s10 = scalar_lea.vmem [#allocation15], %s4427_s11 }
  0x94   : > { %s411_s19 = scalar_select %p410_p8, %s4276_s14, 1  ;;  %v4447_v5 = vld [vmem:[%s4421_s23 + $0x28] sm:$0xff]  ;;  %v4450_v6 = vld [vmem:[%s4421_s23 + $0x30] sm:$0xff]  ;;  %v4453_v7 = vld [vmem:[%s4421_s23 + $0x38] sm:$0xff] }
  0x95   : > { %v4456_v8 = vld [vmem:[%s4421_s23 + $0x40] sm:$0xff]  ;;  %v4459_v9 = vld [vmem:[%s4421_s23 + $0x48] sm:$0xff]  ;;  %v4462_v10 = vld [vmem:[%s4421_s23 + $0x50] sm:$0xff]  ;;  %p5415_p3 = scmp.ne.s32.totalorder %s4276_s14, 0 }
  0x96   : > { %v4465_v11 = vld [vmem:[%s4421_s23 + $0x58] sm:$0xff]  ;;  %s3205_s17 = sshll.u32 %s411_s19, 2  ;;  %v4468_v12 = vld [vmem:[%s4421_s23 + $0x60] sm:$0xff]  ;;  %v4471_v13 = vld [vmem:[%s4421_s23 + $0x68] sm:$0xff]  ;;  %v4128_v35 = vmov (!%p5415_p3), 0  }
  0x97   : > { %v4474_v14 = vld [vmem:[%s4421_s23 + $0x70] sm:$0xff]  ;;  %v4477_v15 = vld [vmem:[%s4421_s23 + $0x78] sm:$0xff]  ;;  %v4480_v16 = vld [vmem:[%s4421_s23 + $0x80] sm:$0xff]  ;;  %s413_s27 = scalar_lea.vmem %s5373_s3, %s3205_s17  ;;  %451 = sbr.rel (%p5415_p3) target bundleno = 464 (0x1d0), region = 64  ;;  %761 = vmatprep.mubr.bf16.mxu0 (!%p5415_p3), %v4128_v35  ;;  %874 = vmatprep.mubr.bf16.mxu1 (!%p5415_p3), %v4128_v35 }
  0x98   : > { %v4483_v17 = vld [vmem:[%s4421_s23 + $0x88] sm:$0xff]  ;;  %v4486_v18 = vld [vmem:[%s4421_s23 + $0x90] sm:$0xff]  ;;  %v4489_v19 = vld [vmem:[%s4421_s23 + $0x98] sm:$0xff] }
  0x99   : > { %v4492_v20 = vld [vmem:[%s4421_s23 + $0xa0] sm:$0xff]  ;;  %v4498_v21 = vld [vmem:[%s4421_s23 + $0xa8] sm:$0xff]  ;;  %v4501_v22 = vld [vmem:[%s4421_s23 + $0xb0] sm:$0xff] }
  0x9a   : > { %v4504_v23 = vld [vmem:[%s4421_s23 + $0xb8] sm:$0xff]  ;;  %v4507_v24 = vld [vmem:[%s4421_s23 + $0xc0] sm:$0xff]  ;;  %v4510_v25 = vld [vmem:[%s4421_s23 + $0xc8] sm:$0xff] }
  0x9b   : > { %v4513_v26 = vld [vmem:[%s4421_s23 + $0xd0] sm:$0xff]  ;;  %v4516_v27 = vld [vmem:[%s4421_s23 + $0xd8] sm:$0xff]  ;;  %v4519_v28 = vld [vmem:[%s4421_s23 + $0xe0] sm:$0xff] }
  0x9c   : > { %v4522_v29 = vld [vmem:[%s4421_s23 + $0xe8] sm:$0xff]  ;;  %v4525_v30 = vld [vmem:[%s4421_s23 + $0xf0] sm:$0xff]  ;;  %v4528_v31 = vld [vmem:[%s4421_s23 + $0xf8] sm:$0xff] }
  0x9d   : > { %v4530_v32 = vld [vmem:[%s413_s27] sm:$0xf]  ;;  %v3508_v33 = vld [vmem:[%s4415_s12 + $0x4] ss:$16 sps:$4 sm:$0xff] (!%p5415_p3)   ;;  %v3510_v34 = vld [vmem:[%s4415_s12 + $0xc] ss:$16 sps:$4 sm:$0xff] (!%p5415_p3)  }
  0x9e   : > { %729 = vmatprep.subr.bf16.mxu0 %v3508_v33  ;;  %v3512_v36 = vld [vmem:[%s4415_s12] ss:$16 sps:$4 sm:$0xff]   ;;  %v3513_v37 = vld [vmem:[%s4415_s12 + $0x8] ss:$16 sps:$4 sm:$0xff]   ;;  %842 = vmatprep.subr.bf16.mxu1 %v3510_v34  ;;  %v3514_v38 = vld [vmem:[%s4415_s12 + $0x24] ss:$16 sps:$4 sm:$0xff]  }
  0x9f   : > { %730 = vmatpush1.bf16.msra.mxu0 %v3512_v36  ;;  %843 = vmatpush1.bf16.msra.mxu1 %v3513_v37  ;;  %v3516_v39 = vld [vmem:[%s4415_s12 + $0x2c] ss:$16 sps:$4 sm:$0xff]   ;;  %v3518_v40 = vld [vmem:[%s4415_s12 + $0x20] ss:$16 sps:$4 sm:$0xff]   ;;  %v3519_v41 = vld [vmem:[%s4415_s12 + $0x28] ss:$16 sps:$4 sm:$0xff]  }
  0xa0   : > { %731 = vmatprep.subr.bf16.mxu0 %v3514_v38  ;;  %844 = vmatprep.subr.bf16.mxu1 %v3516_v39  ;;  %v3520_v42 = vld [vmem:[%s4415_s12 + $0x44] ss:$16 sps:$4 sm:$0xff]   ;;  %v3522_v43 = vld [vmem:[%s4415_s12 + $0x4c] ss:$16 sps:$4 sm:$0xff]   ;;  %v3524_v44 = vld [vmem:[%s4415_s12 + $0x40] ss:$16 sps:$4 sm:$0xff]  }
  0xa1   : > { %v3525_v45 = vld [vmem:[%s4415_s12 + $0x48] ss:$16 sps:$4 sm:$0xff]   ;;  %v3526_v46 = vld [vmem:[%s4415_s12 + $0x64] ss:$16 sps:$4 sm:$0xff]   ;;  %v3528_v47 = vld [vmem:[%s4415_s12 + $0x6c] ss:$16 sps:$4 sm:$0xff]  }
  0xa2   : > { %v3530_v48 = vld [vmem:[%s4415_s12 + $0x60] ss:$16 sps:$4 sm:$0xff]   ;;  %v3531_v49 = vld [vmem:[%s4415_s12 + $0x68] ss:$16 sps:$4 sm:$0xff]   ;;  %v3532_v50 = vld [vmem:[%s4415_s12 + $0x84] ss:$16 sps:$4 sm:$0xff]  }
  0xa3   : > { %732 = vmatpush1.bf16.msra.mxu0 %v3518_v40  ;;  %845 = vmatpush1.bf16.msra.mxu1 %v3519_v41  ;;  %v3534_v51 = vld [vmem:[%s4415_s12 + $0x8c] ss:$16 sps:$4 sm:$0xff]   ;;  %v3536_v52 = vld [vmem:[%s4415_s12 + $0x80] ss:$16 sps:$4 sm:$0xff]   ;;  %v3537_v53 = vld [vmem:[%s4415_s12 + $0x88] ss:$16 sps:$4 sm:$0xff]  }
  0xa4   : > { %733 = vmatprep.subr.bf16.mxu0 %v3520_v42  ;;  %846 = vmatprep.subr.bf16.mxu1 %v3522_v43  ;;  %v3538_v54 = vld [vmem:[%s4415_s12 + $0xa4] ss:$16 sps:$4 sm:$0xff]   ;;  %v3540_v55 = vld [vmem:[%s4415_s12 + $0xac] ss:$16 sps:$4 sm:$0xff]   ;;  %v3542_v56 = vld [vmem:[%s4415_s12 + $0xa0] ss:$16 sps:$4 sm:$0xff]  }
  0xa5   : > { %v3543_v57 = vld [vmem:[%s4415_s12 + $0xa8] ss:$16 sps:$4 sm:$0xff]   ;;  %v3544_v58 = vld [vmem:[%s4415_s12 + $0xc4] ss:$16 sps:$4 sm:$0xff]   ;;  %v3546_v59 = vld [vmem:[%s4415_s12 + $0xcc] ss:$16 sps:$4 sm:$0xff]  }
  0xa6   : > { %v3548_v60 = vld [vmem:[%s4415_s12 + $0xc0] ss:$16 sps:$4 sm:$0xff]   ;;  %v3549_v61 = vld [vmem:[%s4415_s12 + $0xc8] ss:$16 sps:$4 sm:$0xff]   ;;  %v3550_v62 = vld [vmem:[%s4415_s12 + $0xe4] ss:$16 sps:$4 sm:$0xff]  }
  0xa7   : > { %734 = vmatpush1.bf16.msra.mxu0 %v3524_v44  ;;  %847 = vmatpush1.bf16.msra.mxu1 %v3525_v45  ;;  %v3552_v63 = vld [vmem:[%s4415_s12 + $0xec] ss:$16 sps:$4 sm:$0xff]   ;;  %v3554_v33 = vld [vmem:[%s4415_s12 + $0xe0] ss:$16 sps:$4 sm:$0xff]   ;;  %v3555_v34 = vld [vmem:[%s4415_s12 + $0xe8] ss:$16 sps:$4 sm:$0xff]   ;;  %v501_v44 = vlaneseq }
  0xa8   : > { %735 = vmatprep.subr.bf16.mxu0 %v3526_v46  ;;  %848 = vmatprep.subr.bf16.mxu1 %v3528_v47  ;;  %v3556_v36 = vld [vmem:[#allocation4] sm:$0xff]   ;;  %v3557_v37 = vld [vmem:[#allocation4 + $0x8] sm:$0xff]   ;;  %v3558_v38 = vld [vmem:[#allocation4 + $0x10] sm:$0xff]  }
  0xa9   : > { %v3559_v39 = vld [vmem:[#allocation4 + $0x18] sm:$0xff]   ;;  %v3560_v40 = vld [vmem:[#allocation4 + $0x20] sm:$0xff]   ;;  %v3561_v41 = vld [vmem:[#allocation4 + $0x28] sm:$0xff]   ;;  %v502_v45 = vshrl.u32 %v501_v44, 7 }
  0xaa   : > { %v3562_v42 = vld [vmem:[#allocation4 + $0x30] sm:$0xff]   ;;  %v3563_v43 = vld [vmem:[#allocation4 + $0x38] sm:$0xff]  }
  0xab   : > { %736 = vmatpush1.bf16.msra.mxu0 %v3530_v48  ;;  %849 = vmatpush1.bf16.msra.mxu1 %v3531_v49  ;;  %v503_v46 = vsub.s32 0, %v502_v45  ;;  %v511_v47 = vsub.s32 2, %v502_v45  ;;  %v507_v48 = vsub.s32 1, %v502_v45  ;;  %v515_v49 = vsub.s32 3, %v502_v45 }
  0xac   : > { %737 = vmatprep.subr.bf16.mxu0 %v3532_v50  ;;  %850 = vmatprep.subr.bf16.mxu1 %v3534_v51 }
  0xad   : > { %v4589_v50 = vrot.slane %v4530_v32, %v503_v46  ;;  %v4592_v51 = vrot.slane %v4530_v32, %v511_v47 }
  0xaf   : > { %738 = vmatpush1.bf16.msra.mxu0 %v3536_v52  ;;  %851 = vmatpush1.bf16.msra.mxu1 %v3537_v53  ;;  %v4595_v52 = vrot.slane %v4530_v32, %v507_v48 }
  0xb0   : > { %739 = vmatprep.subr.bf16.mxu0 %v3538_v54  ;;  %852 = vmatprep.subr.bf16.mxu1 %v3540_v55 }
  0xb3   : > { %740 = vmatpush1.bf16.msra.mxu0 %v3542_v56  ;;  %853 = vmatpush1.bf16.msra.mxu1 %v3543_v57 }
  0xb4   : > { %741 = vmatprep.subr.bf16.mxu0 %v3544_v58  ;;  %854 = vmatprep.subr.bf16.mxu1 %v3546_v59 }
  0xb7   : > { %742 = vmatpush1.bf16.msra.mxu0 %v3548_v60  ;;  %855 = vmatpush1.bf16.msra.mxu1 %v3549_v61 }
  0xb8   : > { %743 = vmatprep.subr.bf16.mxu0 %v3550_v62  ;;  %856 = vmatprep.subr.bf16.mxu1 %v3552_v63 }
  0xbb   : > { %744 = vmatpush1.bf16.msra.mxu0 %v3554_v33  ;;  %857 = vmatpush1.bf16.msra.mxu1 %v3555_v34 }
  0xbe   : > { %762 = vmatmul.mubr.bf16.vlgmr.msra.gmra.mrb[0].mxu0 %v3556_v36  ;;  %875 = vmatmul.mubr.bf16.vlgmr.msra.gmra.mrb[0].mxu1 %v3556_v36 }
  0xbf   : > { %771 = vmatprep.mubr.bf16.mxu0 %v4128_v35  ;;  %884 = vmatprep.mubr.bf16.mxu1 %v4128_v35 }
  0xc6   : > { %772 = vmatmul.mubr.bf16.gmra.mrb[4].mxu0 %v3557_v37  ;;  %885 = vmatmul.mubr.bf16.gmra.mrb[4].mxu1 %v3557_v37 }
  0xc7   : > { %781 = vmatprep.mubr.bf16.mxu0 %v4128_v35  ;;  %894 = vmatprep.mubr.bf16.mxu1 %v4128_v35 }
  0xce   : > { %782 = vmatmul.mubr.bf16.gmra.mrb[8].mxu0 %v3558_v38  ;;  %895 = vmatmul.mubr.bf16.gmra.mrb[8].mxu1 %v3558_v38 }
  0xcf   : > { %791 = vmatprep.mubr.bf16.mxu0 %v4128_v35  ;;  %904 = vmatprep.mubr.bf16.mxu1 %v4128_v35 }
  0xd6   : > { %792 = vmatmul.mubr.bf16.gmra.mrb[12].mxu0 %v3559_v39  ;;  %905 = vmatmul.mubr.bf16.gmra.mrb[12].mxu1 %v3559_v39 }
  0xd7   : > { %801 = vmatprep.mubr.bf16.mxu0 %v4128_v35  ;;  %914 = vmatprep.mubr.bf16.mxu1 %v4128_v35 }
  0xde   : > { %802 = vmatmul.mubr.bf16.gmra.mrb[16].mxu0 %v3560_v40  ;;  %915 = vmatmul.mubr.bf16.gmra.mrb[16].mxu1 %v3560_v40 }
  0xdf   : > { %811 = vmatprep.mubr.bf16.mxu0 %v4128_v35  ;;  %924 = vmatprep.mubr.bf16.mxu1 %v4128_v35 }
  0xe6   : > { %812 = vmatmul.mubr.bf16.gmra.mrb[20].mxu0 %v3561_v41  ;;  %925 = vmatmul.mubr.bf16.gmra.mrb[20].mxu1 %v3561_v41 }
  0xe7   : > { %821 = vmatprep.mubr.bf16.mxu0 %v4128_v35  ;;  %934 = vmatprep.mubr.bf16.mxu1 %v4128_v35 }
  0xee   : > { %822 = vmatmul.mubr.bf16.gmra.mrb[24].mxu0 %v3562_v42  ;;  %935 = vmatmul.mubr.bf16.gmra.mrb[24].mxu1 %v3562_v42 }
  0xef   : > { %831 = vmatprep.mubr.bf16.mxu0 %v4128_v35  ;;  %944 = vmatprep.mubr.bf16.mxu1 %v4128_v35  ;;  %v4598_v35 = vrot.slane %v4530_v32, %v515_v49 }
  0xf6   : > { %832 = vmatmul.mubr.bf16.gmra.mrb[28].mxu0 %v3563_v43  ;;  %945 = vmatmul.mubr.bf16.gmra.mrb[28].mxu1 %v3563_v43 }
 0x191   : > { %v763_v53 = vpop.f32.mrb[0].mxu0  ;;  %v876_v54 = vpop.f32.mrb[0].mxu1 }
 0x192   : > { %v764_v55 = vadd.f32 %v763_v53, %v4589_v50  ;;  %v877_v56 = vadd.f32 %v876_v54, %v4592_v51  ;;  %v765_v57 = vpop.f32.mrb[1].mxu0  ;;  %v878_v58 = vpop.f32.mrb[1].mxu1 }
 0x193   : > { %v766_v59 = vadd.f32 %v765_v57, %v4595_v52  ;;  %v879_v60 = vadd.f32 %v878_v58, %v4598_v35  ;;  %v767_v61 = vpop.f32.mrb[2].mxu0  ;;  %v880_v62 = vpop.f32.mrb[2].mxu1 }
 0x194   : > { %955 = vst [vmem:[#allocation3] sm:$0xff] %v764_v55  ;;  %957 = vst [vmem:[#allocation3 + $0x10] sm:$0xff] %v877_v56  ;;  %v768_v63 = vadd.f32 %v767_v61, %v4589_v50  ;;  %v881_v33 = vadd.f32 %v880_v62, %v4592_v51  ;;  %v769_v34 = vpop.f32.mrb[3].mxu0  ;;  %v882_v36 = vpop.f32.mrb[3].mxu1 }
 0x195   : > { %956 = vst [vmem:[#allocation3 + $0x8] sm:$0xff] %v766_v59  ;;  %958 = vst [vmem:[#allocation3 + $0x18] sm:$0xff] %v879_v60  ;;  %v770_v37 = vadd.f32 %v769_v34, %v4595_v52  ;;  %v883_v38 = vadd.f32 %v882_v36, %v4598_v35 }
 0x196   : > { %959 = vst [vmem:[#allocation3 + $0x20] sm:$0xff] %v768_v63  ;;  %961 = vst [vmem:[#allocation3 + $0x30] sm:$0xff] %v881_v33 }
 0x197   : > { %960 = vst [vmem:[#allocation3 + $0x28] sm:$0xff] %v770_v37  ;;  %962 = vst [vmem:[#allocation3 + $0x38] sm:$0xff] %v883_v38 }
 0x199   : > { %v773_v39 = vpop.f32.mrb[4].mxu0  ;;  %v886_v40 = vpop.f32.mrb[4].mxu1 }
 0x19a   : > { %v774_v41 = vadd.f32 %v773_v39, %v4589_v50  ;;  %v887_v42 = vadd.f32 %v886_v40, %v4592_v51  ;;  %v775_v43 = vpop.f32.mrb[5].mxu0  ;;  %v888_v44 = vpop.f32.mrb[5].mxu1 }
 0x19b   : > { %v776_v45 = vadd.f32 %v775_v43, %v4595_v52  ;;  %v889_v46 = vadd.f32 %v888_v44, %v4598_v35  ;;  %v777_v47 = vpop.f32.mrb[6].mxu0  ;;  %v890_v48 = vpop.f32.mrb[6].mxu1 }
 0x19c   : > { %963 = vst [vmem:[#allocation3 + $0x40] sm:$0xff] %v774_v41  ;;  %965 = vst [vmem:[#allocation3 + $0x50] sm:$0xff] %v887_v42  ;;  %v778_v49 = vadd.f32 %v777_v47, %v4589_v50  ;;  %v891_v53 = vadd.f32 %v890_v48, %v4592_v51  ;;  %v779_v54 = vpop.f32.mrb[7].mxu0  ;;  %v892_v55 = vpop.f32.mrb[7].mxu1 }
 0x19d   : > { %964 = vst [vmem:[#allocation3 + $0x48] sm:$0xff] %v776_v45  ;;  %966 = vst [vmem:[#allocation3 + $0x58] sm:$0xff] %v889_v46  ;;  %v780_v56 = vadd.f32 %v779_v54, %v4595_v52  ;;  %v893_v57 = vadd.f32 %v892_v55, %v4598_v35 }
 0x19e   : > { %967 = vst [vmem:[#allocation3 + $0x60] sm:$0xff] %v778_v49  ;;  %969 = vst [vmem:[#allocation3 + $0x70] sm:$0xff] %v891_v53 }
 0x19f   : > { %968 = vst [vmem:[#allocation3 + $0x68] sm:$0xff] %v780_v56  ;;  %970 = vst [vmem:[#allocation3 + $0x78] sm:$0xff] %v893_v57 }
 0x1a1   : > { %v783_v58 = vpop.f32.mrb[8].mxu0  ;;  %v896_v59 = vpop.f32.mrb[8].mxu1 }
 0x1a2   : > { %v784_v60 = vadd.f32 %v783_v58, %v4589_v50  ;;  %v897_v61 = vadd.f32 %v896_v59, %v4592_v51  ;;  %v785_v62 = vpop.f32.mrb[9].mxu0  ;;  %v898_v63 = vpop.f32.mrb[9].mxu1 }
 0x1a3   : > { %v786_v33 = vadd.f32 %v785_v62, %v4595_v52  ;;  %v899_v34 = vadd.f32 %v898_v63, %v4598_v35  ;;  %v787_v36 = vpop.f32.mrb[10].mxu0  ;;  %v900_v37 = vpop.f32.mrb[10].mxu1 }
 0x1a4   : > { %971 = vst [vmem:[#allocation3 + $0x80] sm:$0xff] %v784_v60  ;;  %973 = vst [vmem:[#allocation3 + $0x90] sm:$0xff] %v897_v61  ;;  %v788_v38 = vadd.f32 %v787_v36, %v4589_v50  ;;  %v901_v39 = vadd.f32 %v900_v37, %v4592_v51  ;;  %v789_v40 = vpop.f32.mrb[11].mxu0  ;;  %v902_v41 = vpop.f32.mrb[11].mxu1 }
 0x1a5   : > { %972 = vst [vmem:[#allocation3 + $0x88] sm:$0xff] %v786_v33  ;;  %974 = vst [vmem:[#allocation3 + $0x98] sm:$0xff] %v899_v34  ;;  %v790_v42 = vadd.f32 %v789_v40, %v4595_v52  ;;  %v903_v43 = vadd.f32 %v902_v41, %v4598_v35 }
 0x1a6   : > { %975 = vst [vmem:[#allocation3 + $0xa0] sm:$0xff] %v788_v38  ;;  %977 = vst [vmem:[#allocation3 + $0xb0] sm:$0xff] %v901_v39 }
 0x1a7   : > { %976 = vst [vmem:[#allocation3 + $0xa8] sm:$0xff] %v790_v42  ;;  %978 = vst [vmem:[#allocation3 + $0xb8] sm:$0xff] %v903_v43 }
 0x1a9   : > { %v793_v44 = vpop.f32.mrb[12].mxu0  ;;  %v906_v45 = vpop.f32.mrb[12].mxu1 }
 0x1aa   : > { %v794_v46 = vadd.f32 %v793_v44, %v4589_v50  ;;  %v907_v47 = vadd.f32 %v906_v45, %v4592_v51  ;;  %v795_v48 = vpop.f32.mrb[13].mxu0  ;;  %v908_v49 = vpop.f32.mrb[13].mxu1 }
 0x1ab   : > { %v796_v53 = vadd.f32 %v795_v48, %v4595_v52  ;;  %v909_v54 = vadd.f32 %v908_v49, %v4598_v35  ;;  %v797_v55 = vpop.f32.mrb[14].mxu0  ;;  %v910_v56 = vpop.f32.mrb[14].mxu1 }
 0x1ac   : > { %979 = vst [vmem:[#allocation3 + $0xc0] sm:$0xff] %v794_v46  ;;  %981 = vst [vmem:[#allocation3 + $0xd0] sm:$0xff] %v907_v47  ;;  %v798_v57 = vadd.f32 %v797_v55, %v4589_v50  ;;  %v911_v58 = vadd.f32 %v910_v56, %v4592_v51  ;;  %v799_v59 = vpop.f32.mrb[15].mxu0  ;;  %v912_v60 = vpop.f32.mrb[15].mxu1 }
 0x1ad   : > { %980 = vst [vmem:[#allocation3 + $0xc8] sm:$0xff] %v796_v53  ;;  %982 = vst [vmem:[#allocation3 + $0xd8] sm:$0xff] %v909_v54  ;;  %v800_v61 = vadd.f32 %v799_v59, %v4595_v52  ;;  %v913_v62 = vadd.f32 %v912_v60, %v4598_v35 }
 0x1ae   : > { %983 = vst [vmem:[#allocation3 + $0xe0] sm:$0xff] %v798_v57  ;;  %985 = vst [vmem:[#allocation3 + $0xf0] sm:$0xff] %v911_v58 }
 0x1af   : > { %984 = vst [vmem:[#allocation3 + $0xe8] sm:$0xff] %v800_v61  ;;  %986 = vst [vmem:[#allocation3 + $0xf8] sm:$0xff] %v913_v62 }
 0x1b1   : > { %v803_v63 = vpop.f32.mrb[16].mxu0  ;;  %v916_v33 = vpop.f32.mrb[16].mxu1 }
 0x1b2   : > { %v804_v34 = vadd.f32 %v803_v63, %v4589_v50  ;;  %v917_v36 = vadd.f32 %v916_v33, %v4592_v51  ;;  %v805_v37 = vpop.f32.mrb[17].mxu0  ;;  %v918_v38 = vpop.f32.mrb[17].mxu1 }
 0x1b3   : > { %v806_v39 = vadd.f32 %v805_v37, %v4595_v52  ;;  %v919_v40 = vadd.f32 %v918_v38, %v4598_v35  ;;  %v807_v41 = vpop.f32.mrb[18].mxu0  ;;  %v920_v42 = vpop.f32.mrb[18].mxu1 }
 0x1b4   : > { %987 = vst [vmem:[#allocation3 + $0x100] sm:$0xff] %v804_v34  ;;  %989 = vst [vmem:[#allocation3 + $0x110] sm:$0xff] %v917_v36  ;;  %v808_v43 = vadd.f32 %v807_v41, %v4589_v50  ;;  %v921_v44 = vadd.f32 %v920_v42, %v4592_v51  ;;  %v809_v45 = vpop.f32.mrb[19].mxu0  ;;  %v922_v46 = vpop.f32.mrb[19].mxu1 }
 0x1b5   : > { %988 = vst [vmem:[#allocation3 + $0x108] sm:$0xff] %v806_v39  ;;  %990 = vst [vmem:[#allocation3 + $0x118] sm:$0xff] %v919_v40  ;;  %v810_v47 = vadd.f32 %v809_v45, %v4595_v52  ;;  %v923_v48 = vadd.f32 %v922_v46, %v4598_v35 }
 0x1b6   : > { %991 = vst [vmem:[#allocation3 + $0x120] sm:$0xff] %v808_v43  ;;  %993 = vst [vmem:[#allocation3 + $0x130] sm:$0xff] %v921_v44 }
 0x1b7   : > { %992 = vst [vmem:[#allocation3 + $0x128] sm:$0xff] %v810_v47  ;;  %994 = vst [vmem:[#allocation3 + $0x138] sm:$0xff] %v923_v48 }
 0x1b9   : > { %v813_v49 = vpop.f32.mrb[20].mxu0  ;;  %v926_v53 = vpop.f32.mrb[20].mxu1 }
 0x1ba   : > { %v814_v54 = vadd.f32 %v813_v49, %v4589_v50  ;;  %v927_v55 = vadd.f32 %v926_v53, %v4592_v51  ;;  %v815_v56 = vpop.f32.mrb[21].mxu0  ;;  %v928_v57 = vpop.f32.mrb[21].mxu1 }
 0x1bb   : > { %v816_v58 = vadd.f32 %v815_v56, %v4595_v52  ;;  %v929_v59 = vadd.f32 %v928_v57, %v4598_v35  ;;  %v817_v60 = vpop.f32.mrb[22].mxu0  ;;  %v930_v61 = vpop.f32.mrb[22].mxu1 }
 0x1bc   : > { %995 = vst [vmem:[#allocation3 + $0x140] sm:$0xff] %v814_v54  ;;  %997 = vst [vmem:[#allocation3 + $0x150] sm:$0xff] %v927_v55  ;;  %v818_v62 = vadd.f32 %v817_v60, %v4589_v50  ;;  %v931_v63 = vadd.f32 %v930_v61, %v4592_v51  ;;  %v819_v33 = vpop.f32.mrb[23].mxu0  ;;  %v932_v34 = vpop.f32.mrb[23].mxu1 }
 0x1bd   : > { %996 = vst [vmem:[#allocation3 + $0x148] sm:$0xff] %v816_v58  ;;  %998 = vst [vmem:[#allocation3 + $0x158] sm:$0xff] %v929_v59  ;;  %v820_v36 = vadd.f32 %v819_v33, %v4595_v52  ;;  %v933_v37 = vadd.f32 %v932_v34, %v4598_v35 }
 0x1be   : > { %999 = vst [vmem:[#allocation3 + $0x160] sm:$0xff] %v818_v62  ;;  %1001 = vst [vmem:[#allocation3 + $0x170] sm:$0xff] %v931_v63 }
 0x1bf   : > { %1000 = vst [vmem:[#allocation3 + $0x168] sm:$0xff] %v820_v36  ;;  %1002 = vst [vmem:[#allocation3 + $0x178] sm:$0xff] %v933_v37 }
 0x1c1   : > { %v823_v38 = vpop.f32.mrb[24].mxu0  ;;  %v936_v39 = vpop.f32.mrb[24].mxu1 }
 0x1c2   : > { %v824_v40 = vadd.f32 %v823_v38, %v4589_v50  ;;  %v937_v41 = vadd.f32 %v936_v39, %v4592_v51  ;;  %v825_v42 = vpop.f32.mrb[25].mxu0  ;;  %v938_v43 = vpop.f32.mrb[25].mxu1 }
 0x1c3   : > { %v826_v44 = vadd.f32 %v825_v42, %v4595_v52  ;;  %v939_v45 = vadd.f32 %v938_v43, %v4598_v35  ;;  %v827_v46 = vpop.f32.mrb[26].mxu0  ;;  %v940_v47 = vpop.f32.mrb[26].mxu1 }
 0x1c4   : > { %1003 = vst [vmem:[#allocation3 + $0x180] sm:$0xff] %v824_v40  ;;  %1005 = vst [vmem:[#allocation3 + $0x190] sm:$0xff] %v937_v41  ;;  %v828_v48 = vadd.f32 %v827_v46, %v4589_v50  ;;  %v941_v49 = vadd.f32 %v940_v47, %v4592_v51  ;;  %v829_v53 = vpop.f32.mrb[27].mxu0  ;;  %v942_v54 = vpop.f32.mrb[27].mxu1 }
 0x1c5   : > { %1004 = vst [vmem:[#allocation3 + $0x188] sm:$0xff] %v826_v44  ;;  %1006 = vst [vmem:[#allocation3 + $0x198] sm:$0xff] %v939_v45  ;;  %v830_v55 = vadd.f32 %v829_v53, %v4595_v52  ;;  %v943_v56 = vadd.f32 %v942_v54, %v4598_v35 }
 0x1c6   : > { %1007 = vst [vmem:[#allocation3 + $0x1a0] sm:$0xff] %v828_v48  ;;  %1009 = vst [vmem:[#allocation3 + $0x1b0] sm:$0xff] %v941_v49 }
 0x1c7   : > { %1008 = vst [vmem:[#allocation3 + $0x1a8] sm:$0xff] %v830_v55  ;;  %1010 = vst [vmem:[#allocation3 + $0x1b8] sm:$0xff] %v943_v56 }
 0x1c9   : > { %v833_v57 = vpop.f32.mrb[28].mxu0  ;;  %v946_v58 = vpop.f32.mrb[28].mxu1 }
 0x1ca   : > { %v834_v59 = vadd.f32 %v833_v57, %v4589_v50  ;;  %v947_v60 = vadd.f32 %v946_v58, %v4592_v51  ;;  %v835_v61 = vpop.f32.mrb[29].mxu0  ;;  %v948_v62 = vpop.f32.mrb[29].mxu1 }
 0x1cb   : > { %v836_v63 = vadd.f32 %v835_v61, %v4595_v52  ;;  %v949_v33 = vadd.f32 %v948_v62, %v4598_v35  ;;  %v837_v34 = vpop.f32.mrb[30].mxu0  ;;  %v950_v36 = vpop.f32.mrb[30].mxu1 }
 0x1cc   : > { %1011 = vst [vmem:[#allocation3 + $0x1c0] sm:$0xff] %v834_v59  ;;  %1013 = vst [vmem:[#allocation3 + $0x1d0] sm:$0xff] %v947_v60  ;;  %v838_v37 = vadd.f32 %v837_v34, %v4589_v50  ;;  %v951_v38 = vadd.f32 %v950_v36, %v4592_v51  ;;  %v839_v39 = vpop.f32.mrb[31].mxu0  ;;  %v952_v40 = vpop.f32.mrb[31].mxu1 }
 0x1cd   : > { %1012 = vst [vmem:[#allocation3 + $0x1c8] sm:$0xff] %v836_v63  ;;  %1014 = vst [vmem:[#allocation3 + $0x1d8] sm:$0xff] %v949_v33  ;;  %v840_v41 = vadd.f32 %v839_v39, %v4595_v52  ;;  %v953_v42 = vadd.f32 %v952_v40, %v4598_v35 }
 0x1ce   : > { %1015 = vst [vmem:[#allocation3 + $0x1e0] sm:$0xff] %v838_v37  ;;  %1017 = vst [vmem:[#allocation3 + $0x1f0] sm:$0xff] %v951_v38 }
 0x1cf   : > { %1016 = vst [vmem:[#allocation3 + $0x1e8] sm:$0xff] %v840_v41  ;;  %1018 = vst [vmem:[#allocation3 + $0x1f8] sm:$0xff] %v953_v42 }
 0x1d0 PF: > { %p3247_p10 = scmp.le.s32.totalorder %s4276_s14, 0 }
 0x1d1   : > { %v3564_v50 = vld [vmem:[%s4415_s12 + $0x4] ss:$16 sps:$4 sm:$0xff] (!%p3247_p10)   ;;  %v3566_v51 = vld [vmem:[%s4415_s12 + $0xc] ss:$16 sps:$4 sm:$0xff] (!%p3247_p10)   ;;  %v4129_v52 = vmov (!%p3247_p10), 0  }
 0x1d2   : > { %1022 = sbr.rel (%p3247_p10) target bundleno = 773 (0x305), region = 68  ;;  %1276 = vmatprep.mubr.bf16.mxu0 (!%p3247_p10), %v4129_v52  ;;  %1389 = vmatprep.mubr.bf16.mxu1 (!%p3247_p10), %v4129_v52  ;;  %v3568_v35 = vld [vmem:[%s4415_s12] ss:$16 sps:$4 sm:$0xff] (!%p3247_p10)   ;;  %v3569_v43 = vld [vmem:[%s4415_s12 + $0x8] ss:$16 sps:$4 sm:$0xff] (!%p3247_p10)  }
 0x1d3   : > { %1244 = vmatprep.subr.bf16.mxu0 (!%p3247_p10), %v3564_v50  ;;  %1357 = vmatprep.subr.bf16.mxu1 (!%p3247_p10), %v3566_v51  ;;  %v3570_v44 = vld [vmem:[%s4415_s12 + $0x24] ss:$16 sps:$4 sm:$0xff] (!%p3247_p10)   ;;  %v3572_v45 = vld [vmem:[%s4415_s12 + $0x2c] ss:$16 sps:$4 sm:$0xff] (!%p3247_p10)   ;;  %v3574_v46 = vld [vmem:[%s4415_s12 + $0x20] ss:$16 sps:$4 sm:$0xff] (!%p3247_p10)  }
 0x1d4   : > { %1245 = vmatpush1.bf16.msra.mxu0 (!%p3247_p10), %v3568_v35  ;;  %1358 = vmatpush1.bf16.msra.mxu1 (!%p3247_p10), %v3569_v43  ;;  %v3575_v47 = vld [vmem:[%s4415_s12 + $0x28] ss:$16 sps:$4 sm:$0xff] (!%p3247_p10)   ;;  %v3576_v48 = vld [vmem:[%s4415_s12 + $0x44] ss:$16 sps:$4 sm:$0xff] (!%p3247_p10)   ;;  %v3578_v49 = vld [vmem:[%s4415_s12 + $0x4c] ss:$16 sps:$4 sm:$0xff] (!%p3247_p10)  }
 0x1d5   : > { %1246 = vmatprep.subr.bf16.mxu0 (!%p3247_p10), %v3570_v44  ;;  %1359 = vmatprep.subr.bf16.mxu1 (!%p3247_p10), %v3572_v45  ;;  %v3580_v53 = vld [vmem:[%s4415_s12 + $0x40] ss:$16 sps:$4 sm:$0xff] (!%p3247_p10)   ;;  %v3581_v54 = vld [vmem:[%s4415_s12 + $0x48] ss:$16 sps:$4 sm:$0xff] (!%p3247_p10)   ;;  %v3582_v55 = vld [vmem:[%s4415_s12 + $0x64] ss:$16 sps:$4 sm:$0xff] (!%p3247_p10)  }
 0x1d6   : > { %v3584_v56 = vld [vmem:[%s4415_s12 + $0x6c] ss:$16 sps:$4 sm:$0xff] (!%p3247_p10)   ;;  %v3586_v57 = vld [vmem:[%s4415_s12 + $0x60] ss:$16 sps:$4 sm:$0xff] (!%p3247_p10)   ;;  %v3587_v58 = vld [vmem:[%s4415_s12 + $0x68] ss:$16 sps:$4 sm:$0xff] (!%p3247_p10)  }
 0x1d7   : > { %v3588_v59 = vld [vmem:[%s4415_s12 + $0x84] ss:$16 sps:$4 sm:$0xff] (!%p3247_p10)   ;;  %v3590_v60 = vld [vmem:[%s4415_s12 + $0x8c] ss:$16 sps:$4 sm:$0xff] (!%p3247_p10)   ;;  %v3592_v61 = vld [vmem:[%s4415_s12 + $0x80] ss:$16 sps:$4 sm:$0xff] (!%p3247_p10)  }
 0x1d8   : > { %1247 = vmatpush1.bf16.msra.mxu0 (!%p3247_p10), %v3574_v46  ;;  %1360 = vmatpush1.bf16.msra.mxu1 (!%p3247_p10), %v3575_v47  ;;  %v3593_v62 = vld [vmem:[%s4415_s12 + $0x88] ss:$16 sps:$4 sm:$0xff] (!%p3247_p10)   ;;  %v3594_v63 = vld [vmem:[%s4415_s12 + $0xa4] ss:$16 sps:$4 sm:$0xff] (!%p3247_p10)   ;;  %v3596_v33 = vld [vmem:[%s4415_s12 + $0xac] ss:$16 sps:$4 sm:$0xff] (!%p3247_p10)  }
 0x1d9   : > { %1248 = vmatprep.subr.bf16.mxu0 %v3576_v48  ;;  %1361 = vmatprep.subr.bf16.mxu1 %v3578_v49  ;;  %v3598_v34 = vld [vmem:[%s4415_s12 + $0xa0] ss:$16 sps:$4 sm:$0xff]   ;;  %v3599_v36 = vld [vmem:[%s4415_s12 + $0xa8] ss:$16 sps:$4 sm:$0xff]   ;;  %v3600_v37 = vld [vmem:[%s4415_s12 + $0xc4] ss:$16 sps:$4 sm:$0xff]  }
 0x1da   : > { %v3602_v38 = vld [vmem:[%s4415_s12 + $0xcc] ss:$16 sps:$4 sm:$0xff]   ;;  %v3604_v39 = vld [vmem:[%s4415_s12 + $0xc0] ss:$16 sps:$4 sm:$0xff]   ;;  %v3605_v40 = vld [vmem:[%s4415_s12 + $0xc8] ss:$16 sps:$4 sm:$0xff]  }
 0x1db   : > { %v3606_v41 = vld [vmem:[%s4415_s12 + $0xe4] ss:$16 sps:$4 sm:$0xff]   ;;  %v3608_v42 = vld [vmem:[%s4415_s12 + $0xec] ss:$16 sps:$4 sm:$0xff]   ;;  %v3610_v50 = vld [vmem:[%s4415_s12 + $0xe0] ss:$16 sps:$4 sm:$0xff]  }
 0x1dc   : > { %1249 = vmatpush1.bf16.msra.mxu0 %v3580_v53  ;;  %1362 = vmatpush1.bf16.msra.mxu1 %v3581_v54  ;;  %v3611_v51 = vld [vmem:[%s4415_s12 + $0xe8] ss:$16 sps:$4 sm:$0xff]   ;;  %v1023_v35 = vld [vmem:[#allocation2] sm:$0xff]  ;;  %v1025_v44 = vld [vmem:[#allocation2 + $0x10] sm:$0xff]  ;;  %v1064_v53 = vlaneseq }
 0x1dd   : > { %1250 = vmatprep.subr.bf16.mxu0 %v3582_v55  ;;  %1363 = vmatprep.subr.bf16.mxu1 %v3584_v56  ;;  %v1024_v43 = vld [vmem:[#allocation2 + $0x8] sm:$0xff]  ;;  %v1026_v45 = vld [vmem:[#allocation2 + $0x18] sm:$0xff]  ;;  %v1027_v46 = vld [vmem:[#allocation2 + $0x20] sm:$0xff] }
 0x1de   : > { %v1028_v47 = vld [vmem:[#allocation2 + $0x28] sm:$0xff]  ;;  %v1029_v48 = vld [vmem:[#allocation2 + $0x30] sm:$0xff]  ;;  %v1030_v49 = vld [vmem:[#allocation2 + $0x38] sm:$0xff]  ;;  %v1065_v54 = vshrl.u32 %v1064_v53, 7 }
 0x1e0   : > { %1251 = vmatpush1.bf16.msra.mxu0 %v3586_v57  ;;  %1364 = vmatpush1.bf16.msra.mxu1 %v3587_v58  ;;  %v1066_v55 = vsub.s32 0, %v1065_v54  ;;  %v1074_v56 = vsub.s32 2, %v1065_v54  ;;  %v1070_v57 = vsub.s32 1, %v1065_v54  ;;  %v1078_v58 = vsub.s32 3, %v1065_v54 }
 0x1e1   : > { %1252 = vmatprep.subr.bf16.mxu0 %v3588_v59  ;;  %1365 = vmatprep.subr.bf16.mxu1 %v3590_v60 }
 0x1e2   : > { %v4714_v59 = vrot.slane %v4530_v32, %v1066_v55  ;;  %v4717_v60 = vrot.slane %v4530_v32, %v1074_v56 }
 0x1e4   : > { %1253 = vmatpush1.bf16.msra.mxu0 %v3592_v61  ;;  %1366 = vmatpush1.bf16.msra.mxu1 %v3593_v62  ;;  %v4720_v61 = vrot.slane %v4530_v32, %v1070_v57 }
 0x1e5   : > { %1254 = vmatprep.subr.bf16.mxu0 %v3594_v63  ;;  %1367 = vmatprep.subr.bf16.mxu1 %v3596_v33 }
 0x1e8   : > { %1255 = vmatpush1.bf16.msra.mxu0 %v3598_v34  ;;  %1368 = vmatpush1.bf16.msra.mxu1 %v3599_v36 }
 0x1e9   : > { %1256 = vmatprep.subr.bf16.mxu0 %v3600_v37  ;;  %1369 = vmatprep.subr.bf16.mxu1 %v3602_v38 }
 0x1ec   : > { %1257 = vmatpush1.bf16.msra.mxu0 %v3604_v39  ;;  %1370 = vmatpush1.bf16.msra.mxu1 %v3605_v40 }
 0x1ed   : > { %1258 = vmatprep.subr.bf16.mxu0 %v3606_v41  ;;  %1371 = vmatprep.subr.bf16.mxu1 %v3608_v42 }
 0x1f0   : > { %1259 = vmatpush1.bf16.msra.mxu0 %v3610_v50  ;;  %1372 = vmatpush1.bf16.msra.mxu1 %v3611_v51 }
 0x1f3   : > { %1277 = vmatmul.mubr.bf16.vlgmr.msra.gmra.mrb[0].mxu0 %v1023_v35  ;;  %1390 = vmatmul.mubr.bf16.vlgmr.msra.gmra.mrb[0].mxu1 %v1023_v35 }
 0x1f4   : > { %1286 = vmatprep.mubr.bf16.mxu0 %v4129_v52  ;;  %1399 = vmatprep.mubr.bf16.mxu1 %v4129_v52 }
 0x1fb   : > { %1287 = vmatmul.mubr.bf16.gmra.mrb[4].mxu0 %v1024_v43  ;;  %1400 = vmatmul.mubr.bf16.gmra.mrb[4].mxu1 %v1024_v43 }
 0x1fc   : > { %1296 = vmatprep.mubr.bf16.mxu0 %v4129_v52  ;;  %1409 = vmatprep.mubr.bf16.mxu1 %v4129_v52 }
 0x203   : > { %1297 = vmatmul.mubr.bf16.gmra.mrb[8].mxu0 %v1025_v44  ;;  %1410 = vmatmul.mubr.bf16.gmra.mrb[8].mxu1 %v1025_v44 }
 0x204   : > { %1306 = vmatprep.mubr.bf16.mxu0 %v4129_v52  ;;  %1419 = vmatprep.mubr.bf16.mxu1 %v4129_v52 }
 0x20b   : > { %1307 = vmatmul.mubr.bf16.gmra.mrb[12].mxu0 %v1026_v45  ;;  %1420 = vmatmul.mubr.bf16.gmra.mrb[12].mxu1 %v1026_v45 }
 0x20c   : > { %1316 = vmatprep.mubr.bf16.mxu0 %v4129_v52  ;;  %1429 = vmatprep.mubr.bf16.mxu1 %v4129_v52 }
 0x213   : > { %1317 = vmatmul.mubr.bf16.gmra.mrb[16].mxu0 %v1027_v46  ;;  %1430 = vmatmul.mubr.bf16.gmra.mrb[16].mxu1 %v1027_v46 }
 0x214   : > { %1326 = vmatprep.mubr.bf16.mxu0 %v4129_v52  ;;  %1439 = vmatprep.mubr.bf16.mxu1 %v4129_v52 }
 0x21b   : > { %1327 = vmatmul.mubr.bf16.gmra.mrb[20].mxu0 %v1028_v47  ;;  %1440 = vmatmul.mubr.bf16.gmra.mrb[20].mxu1 %v1028_v47 }
 0x21c   : > { %1336 = vmatprep.mubr.bf16.mxu0 %v4129_v52  ;;  %1449 = vmatprep.mubr.bf16.mxu1 %v4129_v52 }
 0x223   : > { %1337 = vmatmul.mubr.bf16.gmra.mrb[24].mxu0 %v1029_v48  ;;  %1450 = vmatmul.mubr.bf16.gmra.mrb[24].mxu1 %v1029_v48 }
 0x224   : > { %1346 = vmatprep.mubr.bf16.mxu0 %v4129_v52  ;;  %1459 = vmatprep.mubr.bf16.mxu1 %v4129_v52  ;;  %v4723_v52 = vrot.slane %v4530_v32, %v1078_v58 }
 0x22b   : > { %1347 = vmatmul.mubr.bf16.gmra.mrb[28].mxu0 %v1030_v49  ;;  %1460 = vmatmul.mubr.bf16.gmra.mrb[28].mxu1 %v1030_v49 }
 0x2c6   : > { %v1278_v62 = vpop.f32.mrb[0].mxu0  ;;  %v1391_v63 = vpop.f32.mrb[0].mxu1 }
 0x2c7   : > { %v1279_v33 = vadd.f32 %v1278_v62, %v4714_v59  ;;  %v1392_v34 = vadd.f32 %v1391_v63, %v4717_v60  ;;  %v1280_v36 = vpop.f32.mrb[1].mxu0  ;;  %v1393_v37 = vpop.f32.mrb[1].mxu1 }
 0x2c8   : > { %v1281_v38 = vadd.f32 %v1280_v36, %v4720_v61  ;;  %v1394_v39 = vadd.f32 %v1393_v37, %v4723_v52  ;;  %v1282_v40 = vpop.f32.mrb[2].mxu0  ;;  %v1395_v41 = vpop.f32.mrb[2].mxu1 }
 0x2c9   : > { %1470 = vst [vmem:[#allocation3] sm:$0xff] %v1279_v33  ;;  %1472 = vst [vmem:[#allocation3 + $0x10] sm:$0xff] %v1392_v34  ;;  %v1283_v42 = vadd.f32 %v1282_v40, %v4714_v59  ;;  %v1396_v32 = vadd.f32 %v1395_v41, %v4717_v60  ;;  %v1284_v50 = vpop.f32.mrb[3].mxu0  ;;  %v1397_v51 = vpop.f32.mrb[3].mxu1 }
 0x2ca   : > { %1471 = vst [vmem:[#allocation3 + $0x8] sm:$0xff] %v1281_v38  ;;  %1473 = vst [vmem:[#allocation3 + $0x18] sm:$0xff] %v1394_v39  ;;  %v1285_v35 = vadd.f32 %v1284_v50, %v4720_v61  ;;  %v1398_v43 = vadd.f32 %v1397_v51, %v4723_v52 }
 0x2cb   : > { %1474 = vst [vmem:[#allocation3 + $0x20] sm:$0xff] %v1283_v42  ;;  %1476 = vst [vmem:[#allocation3 + $0x30] sm:$0xff] %v1396_v32 }
 0x2cc   : > { %1475 = vst [vmem:[#allocation3 + $0x28] sm:$0xff] %v1285_v35  ;;  %1477 = vst [vmem:[#allocation3 + $0x38] sm:$0xff] %v1398_v43 }
 0x2ce   : > { %v1288_v44 = vpop.f32.mrb[4].mxu0  ;;  %v1401_v45 = vpop.f32.mrb[4].mxu1 }
 0x2cf   : > { %v1289_v46 = vadd.f32 %v1288_v44, %v4714_v59  ;;  %v1402_v47 = vadd.f32 %v1401_v45, %v4717_v60  ;;  %v1290_v48 = vpop.f32.mrb[5].mxu0  ;;  %v1403_v49 = vpop.f32.mrb[5].mxu1 }
 0x2d0   : > { %v1291_v53 = vadd.f32 %v1290_v48, %v4720_v61  ;;  %v1404_v54 = vadd.f32 %v1403_v49, %v4723_v52  ;;  %v1292_v55 = vpop.f32.mrb[6].mxu0  ;;  %v1405_v56 = vpop.f32.mrb[6].mxu1 }
 0x2d1   : > { %1478 = vst [vmem:[#allocation3 + $0x40] sm:$0xff] %v1289_v46  ;;  %1480 = vst [vmem:[#allocation3 + $0x50] sm:$0xff] %v1402_v47  ;;  %v1293_v57 = vadd.f32 %v1292_v55, %v4714_v59  ;;  %v1406_v58 = vadd.f32 %v1405_v56, %v4717_v60  ;;  %v1294_v62 = vpop.f32.mrb[7].mxu0  ;;  %v1407_v63 = vpop.f32.mrb[7].mxu1 }
 0x2d2   : > { %1479 = vst [vmem:[#allocation3 + $0x48] sm:$0xff] %v1291_v53  ;;  %1481 = vst [vmem:[#allocation3 + $0x58] sm:$0xff] %v1404_v54  ;;  %v1295_v33 = vadd.f32 %v1294_v62, %v4720_v61  ;;  %v1408_v34 = vadd.f32 %v1407_v63, %v4723_v52 }
 0x2d3   : > { %1482 = vst [vmem:[#allocation3 + $0x60] sm:$0xff] %v1293_v57  ;;  %1484 = vst [vmem:[#allocation3 + $0x70] sm:$0xff] %v1406_v58 }
 0x2d4   : > { %1483 = vst [vmem:[#allocation3 + $0x68] sm:$0xff] %v1295_v33  ;;  %1485 = vst [vmem:[#allocation3 + $0x78] sm:$0xff] %v1408_v34 }
 0x2d6   : > { %v1298_v36 = vpop.f32.mrb[8].mxu0  ;;  %v1411_v37 = vpop.f32.mrb[8].mxu1 }
 0x2d7   : > { %v1299_v38 = vadd.f32 %v1298_v36, %v4714_v59  ;;  %v1412_v39 = vadd.f32 %v1411_v37, %v4717_v60  ;;  %v1300_v40 = vpop.f32.mrb[9].mxu0  ;;  %v1413_v41 = vpop.f32.mrb[9].mxu1 }
 0x2d8   : > { %v1301_v42 = vadd.f32 %v1300_v40, %v4720_v61  ;;  %v1414_v32 = vadd.f32 %v1413_v41, %v4723_v52  ;;  %v1302_v50 = vpop.f32.mrb[10].mxu0  ;;  %v1415_v51 = vpop.f32.mrb[10].mxu1 }
 0x2d9   : > { %1486 = vst [vmem:[#allocation3 + $0x80] sm:$0xff] %v1299_v38  ;;  %1488 = vst [vmem:[#allocation3 + $0x90] sm:$0xff] %v1412_v39  ;;  %v1303_v35 = vadd.f32 %v1302_v50, %v4714_v59  ;;  %v1416_v43 = vadd.f32 %v1415_v51, %v4717_v60  ;;  %v1304_v44 = vpop.f32.mrb[11].mxu0  ;;  %v1417_v45 = vpop.f32.mrb[11].mxu1 }
 0x2da   : > { %1487 = vst [vmem:[#allocation3 + $0x88] sm:$0xff] %v1301_v42  ;;  %1489 = vst [vmem:[#allocation3 + $0x98] sm:$0xff] %v1414_v32  ;;  %v1305_v46 = vadd.f32 %v1304_v44, %v4720_v61  ;;  %v1418_v47 = vadd.f32 %v1417_v45, %v4723_v52 }
 0x2db   : > { %1490 = vst [vmem:[#allocation3 + $0xa0] sm:$0xff] %v1303_v35  ;;  %1492 = vst [vmem:[#allocation3 + $0xb0] sm:$0xff] %v1416_v43 }
 0x2dc   : > { %1491 = vst [vmem:[#allocation3 + $0xa8] sm:$0xff] %v1305_v46  ;;  %1493 = vst [vmem:[#allocation3 + $0xb8] sm:$0xff] %v1418_v47 }
 0x2de   : > { %v1308_v48 = vpop.f32.mrb[12].mxu0  ;;  %v1421_v49 = vpop.f32.mrb[12].mxu1 }
 0x2df   : > { %v1309_v53 = vadd.f32 %v1308_v48, %v4714_v59  ;;  %v1422_v54 = vadd.f32 %v1421_v49, %v4717_v60  ;;  %v1310_v55 = vpop.f32.mrb[13].mxu0  ;;  %v1423_v56 = vpop.f32.mrb[13].mxu1 }
 0x2e0   : > { %v1311_v57 = vadd.f32 %v1310_v55, %v4720_v61  ;;  %v1424_v58 = vadd.f32 %v1423_v56, %v4723_v52  ;;  %v1312_v62 = vpop.f32.mrb[14].mxu0  ;;  %v1425_v63 = vpop.f32.mrb[14].mxu1 }
 0x2e1   : > { %1494 = vst [vmem:[#allocation3 + $0xc0] sm:$0xff] %v1309_v53  ;;  %1496 = vst [vmem:[#allocation3 + $0xd0] sm:$0xff] %v1422_v54  ;;  %v1313_v33 = vadd.f32 %v1312_v62, %v4714_v59  ;;  %v1426_v34 = vadd.f32 %v1425_v63, %v4717_v60  ;;  %v1314_v36 = vpop.f32.mrb[15].mxu0  ;;  %v1427_v37 = vpop.f32.mrb[15].mxu1 }
 0x2e2   : > { %1495 = vst [vmem:[#allocation3 + $0xc8] sm:$0xff] %v1311_v57  ;;  %1497 = vst [vmem:[#allocation3 + $0xd8] sm:$0xff] %v1424_v58  ;;  %v1315_v38 = vadd.f32 %v1314_v36, %v4720_v61  ;;  %v1428_v39 = vadd.f32 %v1427_v37, %v4723_v52 }
 0x2e3   : > { %1498 = vst [vmem:[#allocation3 + $0xe0] sm:$0xff] %v1313_v33  ;;  %1500 = vst [vmem:[#allocation3 + $0xf0] sm:$0xff] %v1426_v34 }
 0x2e4   : > { %1499 = vst [vmem:[#allocation3 + $0xe8] sm:$0xff] %v1315_v38  ;;  %1501 = vst [vmem:[#allocation3 + $0xf8] sm:$0xff] %v1428_v39 }
 0x2e6   : > { %v1318_v40 = vpop.f32.mrb[16].mxu0  ;;  %v1431_v41 = vpop.f32.mrb[16].mxu1 }
 0x2e7   : > { %v1319_v42 = vadd.f32 %v1318_v40, %v4714_v59  ;;  %v1432_v32 = vadd.f32 %v1431_v41, %v4717_v60  ;;  %v1320_v50 = vpop.f32.mrb[17].mxu0  ;;  %v1433_v51 = vpop.f32.mrb[17].mxu1 }
 0x2e8   : > { %v1321_v35 = vadd.f32 %v1320_v50, %v4720_v61  ;;  %v1434_v43 = vadd.f32 %v1433_v51, %v4723_v52  ;;  %v1322_v44 = vpop.f32.mrb[18].mxu0  ;;  %v1435_v45 = vpop.f32.mrb[18].mxu1 }
 0x2e9   : > { %1502 = vst [vmem:[#allocation3 + $0x100] sm:$0xff] %v1319_v42  ;;  %1504 = vst [vmem:[#allocation3 + $0x110] sm:$0xff] %v1432_v32  ;;  %v1323_v46 = vadd.f32 %v1322_v44, %v4714_v59  ;;  %v1436_v47 = vadd.f32 %v1435_v45, %v4717_v60  ;;  %v1324_v48 = vpop.f32.mrb[19].mxu0  ;;  %v1437_v49 = vpop.f32.mrb[19].mxu1 }
 0x2ea   : > { %1503 = vst [vmem:[#allocation3 + $0x108] sm:$0xff] %v1321_v35  ;;  %1505 = vst [vmem:[#allocation3 + $0x118] sm:$0xff] %v1434_v43  ;;  %v1325_v53 = vadd.f32 %v1324_v48, %v4720_v61  ;;  %v1438_v54 = vadd.f32 %v1437_v49, %v4723_v52 }
 0x2eb   : > { %1506 = vst [vmem:[#allocation3 + $0x120] sm:$0xff] %v1323_v46  ;;  %1508 = vst [vmem:[#allocation3 + $0x130] sm:$0xff] %v1436_v47 }
 0x2ec   : > { %1507 = vst [vmem:[#allocation3 + $0x128] sm:$0xff] %v1325_v53  ;;  %1509 = vst [vmem:[#allocation3 + $0x138] sm:$0xff] %v1438_v54 }
 0x2ee   : > { %v1328_v55 = vpop.f32.mrb[20].mxu0  ;;  %v1441_v56 = vpop.f32.mrb[20].mxu1 }
 0x2ef   : > { %v1329_v57 = vadd.f32 %v1328_v55, %v4714_v59  ;;  %v1442_v58 = vadd.f32 %v1441_v56, %v4717_v60  ;;  %v1330_v62 = vpop.f32.mrb[21].mxu0  ;;  %v1443_v63 = vpop.f32.mrb[21].mxu1 }
 0x2f0   : > { %v1331_v33 = vadd.f32 %v1330_v62, %v4720_v61  ;;  %v1444_v34 = vadd.f32 %v1443_v63, %v4723_v52  ;;  %v1332_v36 = vpop.f32.mrb[22].mxu0  ;;  %v1445_v37 = vpop.f32.mrb[22].mxu1 }
 0x2f1   : > { %1510 = vst [vmem:[#allocation3 + $0x140] sm:$0xff] %v1329_v57  ;;  %1512 = vst [vmem:[#allocation3 + $0x150] sm:$0xff] %v1442_v58  ;;  %v1333_v38 = vadd.f32 %v1332_v36, %v4714_v59  ;;  %v1446_v39 = vadd.f32 %v1445_v37, %v4717_v60  ;;  %v1334_v40 = vpop.f32.mrb[23].mxu0  ;;  %v1447_v41 = vpop.f32.mrb[23].mxu1 }
 0x2f2   : > { %1511 = vst [vmem:[#allocation3 + $0x148] sm:$0xff] %v1331_v33  ;;  %1513 = vst [vmem:[#allocation3 + $0x158] sm:$0xff] %v1444_v34  ;;  %v1335_v42 = vadd.f32 %v1334_v40, %v4720_v61  ;;  %v1448_v32 = vadd.f32 %v1447_v41, %v4723_v52 }
 0x2f3   : > { %1514 = vst [vmem:[#allocation3 + $0x160] sm:$0xff] %v1333_v38  ;;  %1516 = vst [vmem:[#allocation3 + $0x170] sm:$0xff] %v1446_v39 }
 0x2f4   : > { %1515 = vst [vmem:[#allocation3 + $0x168] sm:$0xff] %v1335_v42  ;;  %1517 = vst [vmem:[#allocation3 + $0x178] sm:$0xff] %v1448_v32 }
 0x2f6   : > { %v1338_v50 = vpop.f32.mrb[24].mxu0  ;;  %v1451_v51 = vpop.f32.mrb[24].mxu1 }
 0x2f7   : > { %v1339_v35 = vadd.f32 %v1338_v50, %v4714_v59  ;;  %v1452_v43 = vadd.f32 %v1451_v51, %v4717_v60  ;;  %v1340_v44 = vpop.f32.mrb[25].mxu0  ;;  %v1453_v45 = vpop.f32.mrb[25].mxu1 }
 0x2f8   : > { %v1341_v46 = vadd.f32 %v1340_v44, %v4720_v61  ;;  %v1454_v47 = vadd.f32 %v1453_v45, %v4723_v52  ;;  %v1342_v48 = vpop.f32.mrb[26].mxu0  ;;  %v1455_v49 = vpop.f32.mrb[26].mxu1 }
 0x2f9   : > { %1518 = vst [vmem:[#allocation3 + $0x180] sm:$0xff] %v1339_v35  ;;  %1520 = vst [vmem:[#allocation3 + $0x190] sm:$0xff] %v1452_v43  ;;  %v1343_v53 = vadd.f32 %v1342_v48, %v4714_v59  ;;  %v1456_v54 = vadd.f32 %v1455_v49, %v4717_v60  ;;  %v1344_v55 = vpop.f32.mrb[27].mxu0  ;;  %v1457_v56 = vpop.f32.mrb[27].mxu1 }
 0x2fa   : > { %1519 = vst [vmem:[#allocation3 + $0x188] sm:$0xff] %v1341_v46  ;;  %1521 = vst [vmem:[#allocation3 + $0x198] sm:$0xff] %v1454_v47  ;;  %v1345_v57 = vadd.f32 %v1344_v55, %v4720_v61  ;;  %v1458_v58 = vadd.f32 %v1457_v56, %v4723_v52 }
 0x2fb   : > { %1522 = vst [vmem:[#allocation3 + $0x1a0] sm:$0xff] %v1343_v53  ;;  %1524 = vst [vmem:[#allocation3 + $0x1b0] sm:$0xff] %v1456_v54 }
 0x2fc   : > { %1523 = vst [vmem:[#allocation3 + $0x1a8] sm:$0xff] %v1345_v57  ;;  %1525 = vst [vmem:[#allocation3 + $0x1b8] sm:$0xff] %v1458_v58 }
 0x2fe   : > { %v1348_v62 = vpop.f32.mrb[28].mxu0  ;;  %v1461_v63 = vpop.f32.mrb[28].mxu1 }
 0x2ff   : > { %v1349_v33 = vadd.f32 %v1348_v62, %v4714_v59  ;;  %v1462_v34 = vadd.f32 %v1461_v63, %v4717_v60  ;;  %v1350_v36 = vpop.f32.mrb[29].mxu0  ;;  %v1463_v37 = vpop.f32.mrb[29].mxu1 }
 0x300   : > { %v1351_v38 = vadd.f32 %v1350_v36, %v4720_v61  ;;  %v1464_v39 = vadd.f32 %v1463_v37, %v4723_v52  ;;  %v1352_v40 = vpop.f32.mrb[30].mxu0  ;;  %v1465_v41 = vpop.f32.mrb[30].mxu1 }
 0x301   : > { %1526 = vst [vmem:[#allocation3 + $0x1c0] sm:$0xff] %v1349_v33  ;;  %1528 = vst [vmem:[#allocation3 + $0x1d0] sm:$0xff] %v1462_v34  ;;  %v1353_v42 = vadd.f32 %v1352_v40, %v4714_v59  ;;  %v1466_v32 = vadd.f32 %v1465_v41, %v4717_v60  ;;  %v1354_v50 = vpop.f32.mrb[31].mxu0  ;;  %v1467_v51 = vpop.f32.mrb[31].mxu1 }
 0x302   : > { %1527 = vst [vmem:[#allocation3 + $0x1c8] sm:$0xff] %v1351_v38  ;;  %1529 = vst [vmem:[#allocation3 + $0x1d8] sm:$0xff] %v1464_v39  ;;  %v1355_v35 = vadd.f32 %v1354_v50, %v4720_v61  ;;  %v1468_v43 = vadd.f32 %v1467_v51, %v4723_v52 }
 0x303   : > { %1530 = vst [vmem:[#allocation3 + $0x1e0] sm:$0xff] %v1353_v42  ;;  %1532 = vst [vmem:[#allocation3 + $0x1f0] sm:$0xff] %v1466_v32 }
 0x304   : > { %1531 = vst [vmem:[#allocation3 + $0x1e8] sm:$0xff] %v1355_v35  ;;  %1533 = vst [vmem:[#allocation3 + $0x1f8] sm:$0xff] %v1468_v43 }
 0x305 PF: > { %v4791_v44 = vcombine.high %v4432_v0, %v4438_v2  ;;  %v4795_v59 = vcombine.low %v4432_v0, %v4438_v2  ;;  %v4799_v60 = vcombine.high %v4444_v4, %v4450_v6  ;;  %v4803_v61 = vcombine.high %v4435_v1, %v4441_v3  ;;  %v1539_v47 = vld [vmem:[#allocation3 + $0x28] sm:$0xff]  ;;  %v1537_v58 = vld [vmem:[#allocation3 + $0x18] sm:$0xff]  ;;  %v1536_v51 = vld [vmem:[#allocation3 + $0x10] sm:$0xff]  ;;  %p3312_p5 = scmp.ne.s32.totalorder %s4276_s14, 1 }
 0x306   : > { %v4808_v52 = vcombine.low %v4435_v1, %v4441_v3  ;;  %v4812_v45 = vcombine.high %v4447_v5, %v4453_v7  ;;  %v4817_v0 = vcombine.low %v4444_v4, %v4450_v6  ;;  %v4823_v2 = vcombine.high %v4456_v8, %v4462_v10  ;;  %v1541_v34 = vld [vmem:[#allocation3 + $0x38] sm:$0xff]  ;;  %v1540_v43 = vld [vmem:[#allocation3 + $0x30] sm:$0xff] }
 0x307   : > { %1702 = vmatprep.subr.bf16.mxu0 %v4791_v44  ;;  %1745 = vmatprep.subr.bf16.mxu1 %v4803_v61  ;;  %v4828_v1 = vcombine.low %v4447_v5, %v4453_v7  ;;  %v4833_v3 = vcombine.high %v4459_v9, %v4465_v11  ;;  %v4130_v4 = vmov 0   ;;  %v4839_v6 = vcombine.low %v4456_v8, %v4462_v10 }
 0x308   : > { %1703 = vmatpush1.bf16.msra.mxu0 %v4795_v59  ;;  %1746 = vmatpush1.bf16.msra.mxu1 %v4808_v52  ;;  %v4844_v5 = vcombine.high %v4468_v12, %v4474_v14  ;;  %v4849_v7 = vcombine.low %v4459_v9, %v4465_v11  ;;  %v4854_v46 = vcombine.high %v4471_v13, %v4477_v15 }
 0x309   : > { %1704 = vmatprep.subr.bf16.mxu0 %v4799_v60  ;;  %1747 = vmatprep.subr.bf16.mxu1 %v4812_v45  ;;  %v4860_v8 = vcombine.low %v4468_v12, %v4474_v14  ;;  %v4865_v9 = vcombine.high %v4480_v16, %v4486_v18  ;;  %v4870_v10 = vcombine.low %v4471_v13, %v4477_v15 }
 0x30a   : > { %1734 = vmatprep.mubr.bf16.mxu0 %v4130_v4  ;;  %1777 = vmatprep.mubr.bf16.mxu1 %v4130_v4  ;;  %v4875_v11 = vcombine.high %v4483_v17, %v4489_v19  ;;  %v4880_v12 = vcombine.low %v4480_v16, %v4486_v18  ;;  %v4885_v14 = vcombine.high %v4492_v20, %v4501_v22 }
 0x30b   : > { %v4890_v13 = vcombine.low %v4483_v17, %v4489_v19  ;;  %v4895_v15 = vcombine.high %v4498_v21, %v4504_v23  ;;  %v4900_v16 = vcombine.low %v4492_v20, %v4501_v22  ;;  %v4905_v18 = vcombine.high %v4507_v24, %v4513_v26 }
 0x30c   : > { %1705 = vmatpush1.bf16.msra.mxu0 %v4817_v0  ;;  %1748 = vmatpush1.bf16.msra.mxu1 %v4828_v1  ;;  %v4910_v17 = vcombine.low %v4498_v21, %v4504_v23  ;;  %v4915_v19 = vcombine.high %v4510_v25, %v4516_v27  ;;  %v4920_v20 = vcombine.low %v4507_v24, %v4513_v26  ;;  %v1534_v26 = vld [vmem:[#allocation3] sm:$0xff] }
 0x30d   : > { %1706 = vmatprep.subr.bf16.mxu0 %v4823_v2  ;;  %1749 = vmatprep.subr.bf16.mxu1 %v4833_v3  ;;  %v4925_v22 = vcombine.high %v4519_v28, %v4525_v30  ;;  %v4930_v21 = vcombine.low %v4510_v25, %v4516_v27  ;;  %v4935_v23 = vcombine.high %v4522_v29, %v4528_v31  ;;  %v1535_v27 = vld [vmem:[#allocation3 + $0x8] sm:$0xff] }
 0x30e   : > { %v4940_v24 = vcombine.low %v4519_v28, %v4525_v30  ;;  %v4946_v25 = vcombine.low %v4522_v29, %v4528_v31  ;;  %v1538_v29 = vld [vmem:[#allocation3 + $0x20] sm:$0xff] }
 0x310   : > { %1707 = vmatpush1.bf16.msra.mxu0 %v4839_v6  ;;  %1750 = vmatpush1.bf16.msra.mxu1 %v4849_v7 }
 0x311   : > { %1708 = vmatprep.subr.bf16.mxu0 %v4844_v5  ;;  %1751 = vmatprep.subr.bf16.mxu1 %v4854_v46 }
 0x314   : > { %1709 = vmatpush1.bf16.msra.mxu0 %v4860_v8  ;;  %1752 = vmatpush1.bf16.msra.mxu1 %v4870_v10 }
 0x315   : > { %1710 = vmatprep.subr.bf16.mxu0 %v4865_v9  ;;  %1753 = vmatprep.subr.bf16.mxu1 %v4875_v11 }
 0x318   : > { %1711 = vmatpush1.bf16.msra.mxu0 %v4880_v12  ;;  %1754 = vmatpush1.bf16.msra.mxu1 %v4890_v13 }
 0x319   : > { %1712 = vmatprep.subr.bf16.mxu0 %v4885_v14  ;;  %1755 = vmatprep.subr.bf16.mxu1 %v4895_v15 }
 0x31c   : > { %1713 = vmatpush1.bf16.msra.mxu0 %v4900_v16  ;;  %1756 = vmatpush1.bf16.msra.mxu1 %v4910_v17 }
 0x31d   : > { %1714 = vmatprep.subr.bf16.mxu0 %v4905_v18  ;;  %1757 = vmatprep.subr.bf16.mxu1 %v4915_v19 }
 0x320   : > { %1715 = vmatpush1.bf16.msra.mxu0 %v4920_v20  ;;  %1758 = vmatpush1.bf16.msra.mxu1 %v4930_v21 }
 0x321   : > { %1716 = vmatprep.subr.bf16.mxu0 %v4925_v22  ;;  %1759 = vmatprep.subr.bf16.mxu1 %v4935_v23 }
 0x324   : > { %1717 = vmatpush1.bf16.msra.mxu0 %v4940_v24  ;;  %1760 = vmatpush1.bf16.msra.mxu1 %v4946_v25 }
 0x325   : > { %1848 = vmatprep.subr.bf16.mxu0 %v4791_v44  ;;  %1891 = vmatprep.subr.bf16.mxu1 %v4803_v61 }
 0x327   : > { %1735 = vmatmul.mubr.bf16.vlgmr.msra.gmra.mrb[0].mxu0 %v4130_v4  ;;  %1778 = vmatmul.mubr.bf16.vlgmr.msra.gmra.mrb[0].mxu1 %v4130_v4 }
 0x328   : > { %1849 = vmatpush1.bf16.msra.mxu0 %v4795_v59  ;;  %1892 = vmatpush1.bf16.msra.mxu1 %v4808_v52 }
 0x329   : > { %1850 = vmatprep.subr.bf16.mxu0 %v4799_v60  ;;  %1893 = vmatprep.subr.bf16.mxu1 %v4812_v45 }
 0x32a   : > { %1880 = vmatprep.mubr.bf16.mxu0 %v4130_v4  ;;  %1923 = vmatprep.mubr.bf16.mxu1 %v4130_v4 }
 0x32c   : > { %1851 = vmatpush1.bf16.msra.mxu0 %v4817_v0  ;;  %1894 = vmatpush1.bf16.msra.mxu1 %v4828_v1 }
 0x32d   : > { %1852 = vmatprep.subr.bf16.mxu0 %v4823_v2  ;;  %1895 = vmatprep.subr.bf16.mxu1 %v4833_v3 }
 0x330   : > { %1853 = vmatpush1.bf16.msra.mxu0 %v4839_v6  ;;  %1896 = vmatpush1.bf16.msra.mxu1 %v4849_v7 }
 0x331   : > { %1854 = vmatprep.subr.bf16.mxu0 %v4844_v5  ;;  %1897 = vmatprep.subr.bf16.mxu1 %v4854_v46 }
 0x334   : > { %1855 = vmatpush1.bf16.msra.mxu0 %v4860_v8  ;;  %1898 = vmatpush1.bf16.msra.mxu1 %v4870_v10 }
 0x335   : > { %1856 = vmatprep.subr.bf16.mxu0 %v4865_v9  ;;  %1899 = vmatprep.subr.bf16.mxu1 %v4875_v11 }
 0x338   : > { %1857 = vmatpush1.bf16.msra.mxu0 %v4880_v12  ;;  %1900 = vmatpush1.bf16.msra.mxu1 %v4890_v13 }
 0x339   : > { %1858 = vmatprep.subr.bf16.mxu0 %v4885_v14  ;;  %1901 = vmatprep.subr.bf16.mxu1 %v4895_v15 }
 0x33c   : > { %1859 = vmatpush1.bf16.msra.mxu0 %v4900_v16  ;;  %1902 = vmatpush1.bf16.msra.mxu1 %v4910_v17 }
 0x33d   : > { %1860 = vmatprep.subr.bf16.mxu0 %v4905_v18  ;;  %1903 = vmatprep.subr.bf16.mxu1 %v4915_v19 }
 0x340   : > { %1861 = vmatpush1.bf16.msra.mxu0 %v4920_v20  ;;  %1904 = vmatpush1.bf16.msra.mxu1 %v4930_v21 }
 0x341   : > { %1862 = vmatprep.subr.bf16.mxu0 %v4925_v22  ;;  %1905 = vmatprep.subr.bf16.mxu1 %v4935_v23 }
 0x344   : > { %1863 = vmatpush1.bf16.msra.mxu0 %v4940_v24  ;;  %1906 = vmatpush1.bf16.msra.mxu1 %v4946_v25 }
 0x345   : > { %1994 = vmatprep.subr.bf16.mxu0 %v4791_v44  ;;  %2037 = vmatprep.subr.bf16.mxu1 %v4803_v61 }
 0x3fa   : > { %v1736_v28 = vpop.f32.mrb[0].mxu0  ;;  %v1779_v48 = vpop.f32.mrb[0].mxu1 }
 0x3fb   : > { %v1788_v30 = vadd.f32 %v1736_v28, %v1534_v26  ;;  %v1738_v31 = vpop.f32.mrb[1].mxu0  ;;  %v1781_v54 = vpop.f32.mrb[1].mxu1 }
 0x3fc   : > { %v1789_v49 = vadd.f32 %v1738_v31, %v1535_v27  ;;  %v1740_v53 = vpop.f32.mrb[2].mxu0  ;;  %v1783_v62 = vpop.f32.mrb[2].mxu1  ;;  %v1791_v41 = vadd.f32 %v1781_v54, %v1537_v58  ;;  %v1790_v27 = vadd.f32 %v1779_v48, %v1536_v51 }
 0x3fd   : > { %v1796_v55 = vsub.f32 0.0, %v1788_v30  ;;  %v1792_v56 = vadd.f32 %v1740_v53, %v1538_v29  ;;  %v1742_v57 = vpop.f32.mrb[3].mxu0  ;;  %v1785_v36 = vpop.f32.mrb[3].mxu1  ;;  %v1794_v28 = vadd.f32 %v1783_v62, %v1540_v43 }
 0x3fe   : > { %v1806_v63 = vsub.f32 0.0, %v1789_v49  ;;  %v1793_v33 = vadd.f32 %v1742_v57, %v1539_v47  ;;  %v1795_v32 = vadd.f32 %v1785_v36, %v1541_v34  ;;  %v1818_v35 = vsub.f32 0.0, %v1791_v41 }
 0x3ff   : > { %v1798_v37 = vmul.f32 1.442695, %v1796_v55  ;;  %v1797_v38 = vsub.f32 0.0, %v1792_v56 }
 0x400   : > { %v1808_v39 = vmul.f32 1.442695, %v1806_v63  ;;  %v1807_v40 = vsub.f32 0.0, %v1793_v33  ;;  %v1819_v26 = vsub.f32 0.0, %v1795_v32  ;;  %v1820_v29 = vmul.f32 1.442695, %v1818_v35 }
 0x401   : > { %3612 = vpow2.f32 %v1798_v37  ;;  %v1800_v42 = vmul.f32 1.442695, %v1797_v38 }
 0x402   : > { %3614 = vpow2.f32 %v1808_v39  ;;  %v1810_v50 = vmul.f32 1.442695, %v1807_v40  ;;  %v1822_v30 = vmul.f32 1.442695, %v1819_v26 }
 0x403   : > { %3616 = vpow2.f32 %v1800_v42 }
 0x404   : > { %3618 = vpow2.f32 %v1810_v50 }
 0x405   : > { %3620 = vtanh.f32 %v1790_v27 }
 0x406   : > { %3622 = vtanh.f32 %v1794_v28 }
 0x407   : > { %3624 = vpow2.f32 %v1820_v29 }
 0x408   : > { %3626 = vpow2.f32 %v1822_v30 }
 0x40b   : > { %v3613_v31 = vpop.eup %3612 }
 0x40c   : > { %v3615_v47 = vpop.eup %3614  ;;  %v1802_v49 = vadd.f32 1.0, %v3613_v31  ;;  %v1840_v31 = vld [vmem:[#allocation3 + $0x40] sm:$0xff] }
 0x40d   : > { %v3617_v53 = vpop.eup %3616  ;;  %v1812_v54 = vadd.f32 1.0, %v3615_v47  ;;  %v1841_v47 = vld [vmem:[#allocation3 + $0x48] sm:$0xff] }
 0x40e   : > { %v3619_v55 = vpop.eup %3618  ;;  %3628 = vrcp.f32 %v1802_v49  ;;  %v1803_v56 = vadd.f32 1.0, %v3617_v53 }
 0x40f   : > { %3630 = vrcp.f32 %v1812_v54  ;;  %v1813_v57 = vadd.f32 1.0, %v3619_v55  ;;  %v3621_v48 = vpop.eup %3620  ;;  %v1844_v54 = vld [vmem:[#allocation3 + $0x60] sm:$0xff] }
 0x410   : > { %3632 = vrcp.f32 %v1803_v56  ;;  %v3623_v58 = vpop.eup %3622 }
 0x411   : > { %3634 = vrcp.f32 %v1813_v57  ;;  %v3625_v62 = vpop.eup %3624 }
 0x412   : > { %v3627_v63 = vpop.eup %3626  ;;  %v1824_v37 = vadd.f32 1.0, %v3625_v62 }
 0x413   : > { %v1825_v42 = vadd.f32 1.0, %v3627_v63 }
 0x414   : > { %3636 = vrcp.f32 %v1824_v37 }
 0x418   : > { %v3629_v33 = vpop.eup %3628 }
 0x419   : > { %v3631_v34 = vpop.eup %3630  ;;  %v1830_v36 = vmul.f32 %v3629_v33, %v3621_v48  ;;  %v1845_v48 = vld [vmem:[#allocation3 + $0x68] sm:$0xff] }
 0x41a   : > { %v3633_v38 = vpop.eup %3632  ;;  %v1828_v39 = vmul.f32 0.0, %v3631_v34  ;;  %v1843_v34 = vld [vmem:[#allocation3 + $0x58] sm:$0xff] }
 0x41b   : > { %v3635_v40 = vpop.eup %3634  ;;  %v1831_v41 = vmul.f32 %v3633_v38, %v3623_v58 }
 0x41c   : > { %v1829_v32 = vmul.f32 0.0, %v3635_v40  ;;  %v4989_v50 = vadd.f32 %v1830_v36, %v1828_v39 }
 0x41e   : > { %3638 = vtanh.f32 %v4989_v50  ;;  %v4992_v51 = vadd.f32 %v1831_v41, %v1829_v32  ;;  %v3637_v35 = vpop.eup %3636  ;;  %v1847_v41 = vld [vmem:[#allocation3 + $0x78] sm:$0xff] }
 0x41f   : > { %3640 = vrcp.f32 %v1825_v42 }
 0x420   : > { %3642 = vtanh.f32 %v4992_v51 }
 0x428   : > { %v3639_v43 = vpop.eup %3638 }
 0x429   : > { %v3641_v26 = vpop.eup %3640  ;;  %v1836_v28 = vmul.f32 %v3639_v43, %v3637_v35 }
 0x42a   : > { %v3643_v27 = vpop.eup %3642 }
 0x42b   : > { %v1837_v29 = vmul.f32 %v3643_v27, %v3641_v26 }
 0x42d   : > { %v1838_v30 = vpack.c.bf16 %v1837_v29, %v1836_v28 }
 0x42f   : > { %1839 = vst [vmem:[#allocation2] sm:$0xff] %v1838_v30  ;;  %1881 = vmatmul.mubr.bf16.vlgmr.msra.gmra.mrb[4].mxu0 %v1838_v30  ;;  %1924 = vmatmul.mubr.bf16.vlgmr.msra.gmra.mrb[4].mxu1 %v1838_v30  ;;  %v1842_v30 = vld [vmem:[#allocation3 + $0x50] sm:$0xff] }
 0x430   : > { %1995 = vmatpush1.bf16.msra.mxu0 %v4795_v59  ;;  %2038 = vmatpush1.bf16.msra.mxu1 %v4808_v52 }
 0x431   : > { %1996 = vmatprep.subr.bf16.mxu0 %v4799_v60  ;;  %2039 = vmatprep.subr.bf16.mxu1 %v4812_v45 }
 0x432   : > { %2026 = vmatprep.mubr.bf16.mxu0 %v4130_v4  ;;  %2069 = vmatprep.mubr.bf16.mxu1 %v4130_v4 }
 0x434   : > { %1997 = vmatpush1.bf16.msra.mxu0 %v4817_v0  ;;  %2040 = vmatpush1.bf16.msra.mxu1 %v4828_v1 }
 0x435   : > { %1998 = vmatprep.subr.bf16.mxu0 %v4823_v2  ;;  %2041 = vmatprep.subr.bf16.mxu1 %v4833_v3 }
 0x438   : > { %1999 = vmatpush1.bf16.msra.mxu0 %v4839_v6  ;;  %2042 = vmatpush1.bf16.msra.mxu1 %v4849_v7 }
 0x439   : > { %2000 = vmatprep.subr.bf16.mxu0 %v4844_v5  ;;  %2043 = vmatprep.subr.bf16.mxu1 %v4854_v46 }
 0x43c   : > { %2001 = vmatpush1.bf16.msra.mxu0 %v4860_v8  ;;  %2044 = vmatpush1.bf16.msra.mxu1 %v4870_v10 }
 0x43d   : > { %2002 = vmatprep.subr.bf16.mxu0 %v4865_v9  ;;  %2045 = vmatprep.subr.bf16.mxu1 %v4875_v11 }
 0x440   : > { %2003 = vmatpush1.bf16.msra.mxu0 %v4880_v12  ;;  %2046 = vmatpush1.bf16.msra.mxu1 %v4890_v13 }
 0x441   : > { %2004 = vmatprep.subr.bf16.mxu0 %v4885_v14  ;;  %2047 = vmatprep.subr.bf16.mxu1 %v4895_v15 }
 0x444   : > { %2005 = vmatpush1.bf16.msra.mxu0 %v4900_v16  ;;  %2048 = vmatpush1.bf16.msra.mxu1 %v4910_v17 }
 0x445   : > { %2006 = vmatprep.subr.bf16.mxu0 %v4905_v18  ;;  %2049 = vmatprep.subr.bf16.mxu1 %v4915_v19 }
 0x448   : > { %2007 = vmatpush1.bf16.msra.mxu0 %v4920_v20  ;;  %2050 = vmatpush1.bf16.msra.mxu1 %v4930_v21 }
 0x449   : > { %2008 = vmatprep.subr.bf16.mxu0 %v4925_v22  ;;  %2051 = vmatprep.subr.bf16.mxu1 %v4935_v23 }
 0x44c   : > { %2009 = vmatpush1.bf16.msra.mxu0 %v4940_v24  ;;  %2052 = vmatpush1.bf16.msra.mxu1 %v4946_v25 }
 0x44d   : > { %2140 = vmatprep.subr.bf16.mxu0 %v4791_v44  ;;  %2183 = vmatprep.subr.bf16.mxu1 %v4803_v61 }
 0x502   : > { %v1882_v49 = vpop.f32.mrb[4].mxu0  ;;  %v1925_v53 = vpop.f32.mrb[4].mxu1 }
 0x503   : > { %v1934_v55 = vadd.f32 %v1882_v49, %v1840_v31  ;;  %v1884_v56 = vpop.f32.mrb[5].mxu0  ;;  %v1927_v57 = vpop.f32.mrb[5].mxu1  ;;  %v1936_v49 = vadd.f32 %v1925_v53, %v1842_v30 }
 0x504   : > { %v1935_v58 = vadd.f32 %v1884_v56, %v1841_v47  ;;  %v1886_v62 = vpop.f32.mrb[6].mxu0  ;;  %v1929_v63 = vpop.f32.mrb[6].mxu1  ;;  %v1937_v43 = vadd.f32 %v1927_v57, %v1843_v34 }
 0x505   : > { %v1942_v33 = vsub.f32 0.0, %v1934_v55  ;;  %v1938_v36 = vadd.f32 %v1886_v62, %v1844_v54  ;;  %v1888_v37 = vpop.f32.mrb[7].mxu0  ;;  %v1931_v38 = vpop.f32.mrb[7].mxu1  ;;  %v1846_v55 = vld [vmem:[#allocation3 + $0x70] sm:$0xff] }
 0x506   : > { %v1952_v39 = vsub.f32 0.0, %v1935_v58  ;;  %v1939_v40 = vadd.f32 %v1888_v37, %v1845_v48  ;;  %v1941_v28 = vadd.f32 %v1931_v38, %v1847_v41  ;;  %v1964_v31 = vsub.f32 0.0, %v1937_v43 }
 0x507   : > { %v1944_v42 = vmul.f32 1.442695, %v1942_v33  ;;  %v1943_v32 = vsub.f32 0.0, %v1938_v36  ;;  %v1940_v57 = vadd.f32 %v1929_v63, %v1846_v55 }
 0x508   : > { %v1954_v35 = vmul.f32 1.442695, %v1952_v39  ;;  %v1953_v26 = vsub.f32 0.0, %v1939_v40  ;;  %v1965_v47 = vsub.f32 0.0, %v1941_v28  ;;  %v1966_v54 = vmul.f32 1.442695, %v1964_v31 }
 0x509   : > { %3644 = vpow2.f32 %v1944_v42  ;;  %v1946_v27 = vmul.f32 1.442695, %v1943_v32 }
 0x50a   : > { %3646 = vpow2.f32 %v1954_v35  ;;  %v1956_v29 = vmul.f32 1.442695, %v1953_v26  ;;  %v1968_v56 = vmul.f32 1.442695, %v1965_v47 }
 0x50b   : > { %3648 = vpow2.f32 %v1946_v27 }
 0x50c   : > { %3650 = vpow2.f32 %v1956_v29 }
 0x50d   : > { %3652 = vtanh.f32 %v1936_v49 }
 0x50e   : > { %3654 = vpow2.f32 %v1966_v54 }
 0x50f   : > { %3656 = vpow2.f32 %v1968_v56 }
 0x513   : > { %v3645_v48 = vpop.eup %3644 }
 0x514   : > { %v3647_v58 = vpop.eup %3646  ;;  %v1948_v62 = vadd.f32 1.0, %v3645_v48 }
 0x515   : > { %v1958_v33 = vadd.f32 1.0, %v3647_v58  ;;  %v3649_v34 = vpop.eup %3648 }
 0x516   : > { %3658 = vrcp.f32 %v1948_v62  ;;  %v3651_v36 = vpop.eup %3650  ;;  %v1949_v37 = vadd.f32 1.0, %v3649_v34  ;;  %v1987_v62 = vld [vmem:[#allocation3 + $0x88] sm:$0xff]  ;;  %v1990_v34 = vld [vmem:[#allocation3 + $0xa0] sm:$0xff] }
 0x517   : > { %3660 = vrcp.f32 %v1958_v33  ;;  %v1959_v38 = vadd.f32 1.0, %v3651_v36  ;;  %v3653_v53 = vpop.eup %3652 }
 0x518   : > { %3662 = vtanh.f32 %v1940_v57  ;;  %v3655_v39 = vpop.eup %3654 }
 0x519   : > { %3664 = vrcp.f32 %v1949_v37  ;;  %v3657_v40 = vpop.eup %3656  ;;  %v1970_v43 = vadd.f32 1.0, %v3655_v39 }
 0x51a   : > { %3666 = vrcp.f32 %v1959_v38  ;;  %v1971_v30 = vadd.f32 1.0, %v3657_v40 }
 0x51b   : > { %3668 = vrcp.f32 %v1970_v43 }
 0x520   : > { %v3659_v41 = vpop.eup %3658 }
 0x521   : > { %v3661_v42 = vpop.eup %3660  ;;  %v1976_v32 = vmul.f32 %v3659_v41, %v3653_v53  ;;  %v1991_v53 = vld [vmem:[#allocation3 + $0xa8] sm:$0xff] }
 0x522   : > { %v3663_v35 = vpop.eup %3662  ;;  %v1974_v63 = vmul.f32 %v3661_v42, %v4989_v50 }
 0x523   : > { %v3665_v26 = vpop.eup %3664 }
 0x524   : > { %v3667_v27 = vpop.eup %3666  ;;  %v5030_v28 = vadd.f32 %v1976_v32, %v1974_v63  ;;  %v1977_v29 = vmul.f32 %v3665_v26, %v3663_v35  ;;  %v1989_v32 = vld [vmem:[#allocation3 + $0x98] sm:$0xff] }
 0x525   : > { %v1975_v31 = vmul.f32 %v3667_v27, %v4992_v51  ;;  %v3669_v49 = vpop.eup %3668  ;;  %v1986_v51 = vld [vmem:[#allocation3 + $0x80] sm:$0xff] }
 0x526   : > { %3670 = vtanh.f32 %v5030_v28 }
 0x527   : > { %v5034_v47 = vadd.f32 %v1977_v29, %v1975_v31  ;;  %3672 = vrcp.f32 %v1971_v30  ;;  %v1993_v29 = vld [vmem:[#allocation3 + $0xb8] sm:$0xff] }
 0x529   : > { %3674 = vtanh.f32 %v5034_v47 }
 0x530   : > { %v3671_v54 = vpop.eup %3670 }
 0x531   : > { %v3673_v50 = vpop.eup %3672  ;;  %v1982_v56 = vmul.f32 %v3671_v54, %v3669_v49 }
 0x533   : > { %v3675_v55 = vpop.eup %3674 }
 0x534   : > { %v1983_v48 = vmul.f32 %v3675_v55, %v3673_v50 }
 0x536   : > { %v1984_v58 = vpack.c.bf16 %v1983_v48, %v1982_v56 }
 0x538   : > { %1985 = vst [vmem:[#allocation2 + $0x8] sm:$0xff] %v1984_v58  ;;  %2027 = vmatmul.mubr.bf16.vlgmr.msra.gmra.mrb[8].mxu0 %v1984_v58  ;;  %2070 = vmatmul.mubr.bf16.vlgmr.msra.gmra.mrb[8].mxu1 %v1984_v58  ;;  %v1988_v58 = vld [vmem:[#allocation3 + $0x90] sm:$0xff] }
 0x539   : > { %2141 = vmatpush1.bf16.msra.mxu0 %v4795_v59  ;;  %2184 = vmatpush1.bf16.msra.mxu1 %v4808_v52 }
 0x53a   : > { %2142 = vmatprep.subr.bf16.mxu0 %v4799_v60  ;;  %2185 = vmatprep.subr.bf16.mxu1 %v4812_v45 }
 0x53b   : > { %2172 = vmatprep.mubr.bf16.mxu0 %v4130_v4  ;;  %2215 = vmatprep.mubr.bf16.mxu1 %v4130_v4 }
 0x53d   : > { %2143 = vmatpush1.bf16.msra.mxu0 %v4817_v0  ;;  %2186 = vmatpush1.bf16.msra.mxu1 %v4828_v1 }
 0x53e   : > { %2144 = vmatprep.subr.bf16.mxu0 %v4823_v2  ;;  %2187 = vmatprep.subr.bf16.mxu1 %v4833_v3 }
 0x541   : > { %2145 = vmatpush1.bf16.msra.mxu0 %v4839_v6  ;;  %2188 = vmatpush1.bf16.msra.mxu1 %v4849_v7 }
 0x542   : > { %2146 = vmatprep.subr.bf16.mxu0 %v4844_v5  ;;  %2189 = vmatprep.subr.bf16.mxu1 %v4854_v46 }
 0x545   : > { %2147 = vmatpush1.bf16.msra.mxu0 %v4860_v8  ;;  %2190 = vmatpush1.bf16.msra.mxu1 %v4870_v10 }
 0x546   : > { %2148 = vmatprep.subr.bf16.mxu0 %v4865_v9  ;;  %2191 = vmatprep.subr.bf16.mxu1 %v4875_v11 }
 0x549   : > { %2149 = vmatpush1.bf16.msra.mxu0 %v4880_v12  ;;  %2192 = vmatpush1.bf16.msra.mxu1 %v4890_v13 }
 0x54a   : > { %2150 = vmatprep.subr.bf16.mxu0 %v4885_v14  ;;  %2193 = vmatprep.subr.bf16.mxu1 %v4895_v15 }
 0x54d   : > { %2151 = vmatpush1.bf16.msra.mxu0 %v4900_v16  ;;  %2194 = vmatpush1.bf16.msra.mxu1 %v4910_v17 }
 0x54e   : > { %2152 = vmatprep.subr.bf16.mxu0 %v4905_v18  ;;  %2195 = vmatprep.subr.bf16.mxu1 %v4915_v19 }
 0x551   : > { %2153 = vmatpush1.bf16.msra.mxu0 %v4920_v20  ;;  %2196 = vmatpush1.bf16.msra.mxu1 %v4930_v21 }
 0x552   : > { %2154 = vmatprep.subr.bf16.mxu0 %v4925_v22  ;;  %2197 = vmatprep.subr.bf16.mxu1 %v4935_v23 }
 0x555   : > { %2155 = vmatpush1.bf16.msra.mxu0 %v4940_v24  ;;  %2198 = vmatpush1.bf16.msra.mxu1 %v4946_v25 }
 0x556   : > { %2286 = vmatprep.subr.bf16.mxu0 %v4791_v44  ;;  %2329 = vmatprep.subr.bf16.mxu1 %v4803_v61 }
 0x60b   : > { %v2028_v57 = vpop.f32.mrb[8].mxu0  ;;  %v2071_v33 = vpop.f32.mrb[8].mxu1 }
 0x60c   : > { %v2080_v36 = vadd.f32 %v2028_v57, %v1986_v51  ;;  %v2030_v37 = vpop.f32.mrb[9].mxu0  ;;  %v2073_v38 = vpop.f32.mrb[9].mxu1  ;;  %v2082_v57 = vadd.f32 %v2071_v33, %v1988_v58 }
 0x60d   : > { %v2081_v39 = vadd.f32 %v2030_v37, %v1987_v62  ;;  %v2032_v40 = vpop.f32.mrb[10].mxu0  ;;  %v2075_v41 = vpop.f32.mrb[10].mxu1  ;;  %v2083_v54 = vadd.f32 %v2073_v38, %v1989_v32 }
 0x60e   : > { %v2088_v42 = vsub.f32 0.0, %v2080_v36  ;;  %v2084_v35 = vadd.f32 %v2032_v40, %v1990_v34  ;;  %v2034_v63 = vpop.f32.mrb[11].mxu0  ;;  %v2077_v43 = vpop.f32.mrb[11].mxu1  ;;  %v1992_v36 = vld [vmem:[#allocation3 + $0xb0] sm:$0xff] }
 0x60f   : > { %v2098_v26 = vsub.f32 0.0, %v2081_v39  ;;  %v2085_v27 = vadd.f32 %v2034_v63, %v1991_v53  ;;  %v2087_v56 = vadd.f32 %v2077_v43, %v1993_v29  ;;  %v2110_v51 = vsub.f32 0.0, %v2083_v54 }
 0x610   : > { %v2090_v30 = vmul.f32 1.442695, %v2088_v42  ;;  %v2089_v31 = vsub.f32 0.0, %v2084_v35  ;;  %v2086_v38 = vadd.f32 %v2075_v41, %v1992_v36 }
 0x611   : > { %v2100_v49 = vmul.f32 1.442695, %v2098_v26  ;;  %v2099_v50 = vsub.f32 0.0, %v2085_v27  ;;  %v2111_v62 = vsub.f32 0.0, %v2087_v56  ;;  %v2112_v34 = vmul.f32 1.442695, %v2110_v51 }
 0x612   : > { %3676 = vpow2.f32 %v2090_v30  ;;  %v2092_v55 = vmul.f32 1.442695, %v2089_v31 }
 0x613   : > { %3678 = vpow2.f32 %v2100_v49  ;;  %v2102_v48 = vmul.f32 1.442695, %v2099_v50  ;;  %v2114_v37 = vmul.f32 1.442695, %v2111_v62 }
 0x614   : > { %3680 = vpow2.f32 %v2092_v55 }
 0x615   : > { %3682 = vpow2.f32 %v2102_v48 }
 0x616   : > { %3684 = vtanh.f32 %v2082_v57 }
 0x617   : > { %3686 = vpow2.f32 %v2112_v34 }
 0x618   : > { %3688 = vpow2.f32 %v2114_v37 }
 0x61c   : > { %v3677_v53 = vpop.eup %3676 }
 0x61d   : > { %v3679_v39 = vpop.eup %3678  ;;  %v2094_v40 = vadd.f32 1.0, %v3677_v53 }
 0x61e   : > { %v2104_v42 = vadd.f32 1.0, %v3679_v39  ;;  %v3681_v32 = vpop.eup %3680 }
 0x61f   : > { %3690 = vrcp.f32 %v2094_v40  ;;  %v3683_v35 = vpop.eup %3682  ;;  %v2095_v63 = vadd.f32 1.0, %v3681_v32  ;;  %v2133_v40 = vld [vmem:[#allocation3 + $0xc8] sm:$0xff]  ;;  %v2136_v32 = vld [vmem:[#allocation3 + $0xe0] sm:$0xff] }
 0x620   : > { %3692 = vrcp.f32 %v2104_v42  ;;  %v2105_v43 = vadd.f32 1.0, %v3683_v35  ;;  %v3685_v33 = vpop.eup %3684 }
 0x621   : > { %3694 = vtanh.f32 %v2086_v38  ;;  %v3687_v26 = vpop.eup %3686 }
 0x622   : > { %3696 = vrcp.f32 %v2095_v63  ;;  %v3689_v27 = vpop.eup %3688  ;;  %v2116_v54 = vadd.f32 1.0, %v3687_v26 }
 0x623   : > { %3698 = vrcp.f32 %v2105_v43  ;;  %v2117_v58 = vadd.f32 1.0, %v3689_v27 }
 0x624   : > { %3700 = vrcp.f32 %v2116_v54 }
 0x629   : > { %v3691_v29 = vpop.eup %3690 }
 0x62a   : > { %v3693_v30 = vpop.eup %3692  ;;  %v2122_v31 = vmul.f32 %v3691_v29, %v3685_v33  ;;  %v2137_v33 = vld [vmem:[#allocation3 + $0xe8] sm:$0xff] }
 0x62b   : > { %v3695_v49 = vpop.eup %3694  ;;  %v2120_v41 = vmul.f32 %v3693_v30, %v5030_v28 }
 0x62c   : > { %v3697_v50 = vpop.eup %3696 }
 0x62d   : > { %v3699_v55 = vpop.eup %3698  ;;  %v5072_v56 = vadd.f32 %v2122_v31, %v2120_v41  ;;  %v2123_v48 = vmul.f32 %v3697_v50, %v3695_v49  ;;  %v2135_v31 = vld [vmem:[#allocation3 + $0xd8] sm:$0xff] }
 0x62e   : > { %v2121_v51 = vmul.f32 %v3699_v55, %v5034_v47  ;;  %v3701_v57 = vpop.eup %3700  ;;  %v2132_v47 = vld [vmem:[#allocation3 + $0xc0] sm:$0xff] }
 0x62f   : > { %3702 = vtanh.f32 %v5072_v56 }
 0x630   : > { %v5076_v62 = vadd.f32 %v2123_v48, %v2121_v51  ;;  %3704 = vrcp.f32 %v2117_v58  ;;  %v2139_v48 = vld [vmem:[#allocation3 + $0xf8] sm:$0xff] }
 0x632   : > { %3706 = vtanh.f32 %v5076_v62 }
 0x639   : > { %v3703_v34 = vpop.eup %3702 }
 0x63a   : > { %v3705_v28 = vpop.eup %3704  ;;  %v2128_v37 = vmul.f32 %v3703_v34, %v3701_v57 }
 0x63c   : > { %v3707_v36 = vpop.eup %3706 }
 0x63d   : > { %v2129_v53 = vmul.f32 %v3707_v36, %v3705_v28 }
 0x63f   : > { %v2130_v39 = vpack.c.bf16 %v2129_v53, %v2128_v37 }
 0x641   : > { %2131 = vst [vmem:[#allocation2 + $0x10] sm:$0xff] %v2130_v39  ;;  %2173 = vmatmul.mubr.bf16.vlgmr.msra.gmra.mrb[12].mxu0 %v2130_v39  ;;  %2216 = vmatmul.mubr.bf16.vlgmr.msra.gmra.mrb[12].mxu1 %v2130_v39  ;;  %v2134_v39 = vld [vmem:[#allocation3 + $0xd0] sm:$0xff] }
 0x642   : > { %2287 = vmatpush1.bf16.msra.mxu0 %v4795_v59  ;;  %2330 = vmatpush1.bf16.msra.mxu1 %v4808_v52 }
 0x643   : > { %2288 = vmatprep.subr.bf16.mxu0 %v4799_v60  ;;  %2331 = vmatprep.subr.bf16.mxu1 %v4812_v45 }
 0x644   : > { %2318 = vmatprep.mubr.bf16.mxu0 %v4130_v4  ;;  %2361 = vmatprep.mubr.bf16.mxu1 %v4130_v4 }
 0x646   : > { %2289 = vmatpush1.bf16.msra.mxu0 %v4817_v0  ;;  %2332 = vmatpush1.bf16.msra.mxu1 %v4828_v1 }
 0x647   : > { %2290 = vmatprep.subr.bf16.mxu0 %v4823_v2  ;;  %2333 = vmatprep.subr.bf16.mxu1 %v4833_v3 }
 0x64a   : > { %2291 = vmatpush1.bf16.msra.mxu0 %v4839_v6  ;;  %2334 = vmatpush1.bf16.msra.mxu1 %v4849_v7 }
 0x64b   : > { %2292 = vmatprep.subr.bf16.mxu0 %v4844_v5  ;;  %2335 = vmatprep.subr.bf16.mxu1 %v4854_v46 }
 0x64e   : > { %2293 = vmatpush1.bf16.msra.mxu0 %v4860_v8  ;;  %2336 = vmatpush1.bf16.msra.mxu1 %v4870_v10 }
 0x64f   : > { %2294 = vmatprep.subr.bf16.mxu0 %v4865_v9  ;;  %2337 = vmatprep.subr.bf16.mxu1 %v4875_v11 }
 0x652   : > { %2295 = vmatpush1.bf16.msra.mxu0 %v4880_v12  ;;  %2338 = vmatpush1.bf16.msra.mxu1 %v4890_v13 }
 0x653   : > { %2296 = vmatprep.subr.bf16.mxu0 %v4885_v14  ;;  %2339 = vmatprep.subr.bf16.mxu1 %v4895_v15 }
 0x656   : > { %2297 = vmatpush1.bf16.msra.mxu0 %v4900_v16  ;;  %2340 = vmatpush1.bf16.msra.mxu1 %v4910_v17 }
 0x657   : > { %2298 = vmatprep.subr.bf16.mxu0 %v4905_v18  ;;  %2341 = vmatprep.subr.bf16.mxu1 %v4915_v19 }
 0x65a   : > { %2299 = vmatpush1.bf16.msra.mxu0 %v4920_v20  ;;  %2342 = vmatpush1.bf16.msra.mxu1 %v4930_v21 }
 0x65b   : > { %2300 = vmatprep.subr.bf16.mxu0 %v4925_v22  ;;  %2343 = vmatprep.subr.bf16.mxu1 %v4935_v23 }
 0x65e   : > { %2301 = vmatpush1.bf16.msra.mxu0 %v4940_v24  ;;  %2344 = vmatpush1.bf16.msra.mxu1 %v4946_v25 }
 0x65f   : > { %2432 = vmatprep.subr.bf16.mxu0 %v4791_v44  ;;  %2475 = vmatprep.subr.bf16.mxu1 %v4803_v61 }
 0x714   : > { %v2174_v38 = vpop.f32.mrb[12].mxu0  ;;  %v2217_v42 = vpop.f32.mrb[12].mxu1 }
 0x715   : > { %v2226_v35 = vadd.f32 %v2174_v38, %v2132_v47  ;;  %v2176_v63 = vpop.f32.mrb[13].mxu0  ;;  %v2219_v43 = vpop.f32.mrb[13].mxu1  ;;  %v2228_v38 = vadd.f32 %v2217_v42, %v2134_v39 }
 0x716   : > { %v2227_v26 = vadd.f32 %v2176_v63, %v2133_v40  ;;  %v2178_v27 = vpop.f32.mrb[14].mxu0  ;;  %v2221_v29 = vpop.f32.mrb[14].mxu1  ;;  %v2229_v34 = vadd.f32 %v2219_v43, %v2135_v31 }
 0x717   : > { %v2234_v30 = vsub.f32 0.0, %v2226_v35  ;;  %v2230_v49 = vadd.f32 %v2178_v27, %v2136_v32  ;;  %v2180_v41 = vpop.f32.mrb[15].mxu0  ;;  %v2223_v54 = vpop.f32.mrb[15].mxu1  ;;  %v2138_v35 = vld [vmem:[#allocation3 + $0xf0] sm:$0xff] }
 0x718   : > { %v2244_v50 = vsub.f32 0.0, %v2227_v26  ;;  %v2231_v55 = vadd.f32 %v2180_v41, %v2137_v33  ;;  %v2233_v37 = vadd.f32 %v2223_v54, %v2139_v48  ;;  %v2256_v47 = vsub.f32 0.0, %v2229_v34 }
 0x719   : > { %v2236_v58 = vmul.f32 1.442695, %v2234_v30  ;;  %v2235_v51 = vsub.f32 0.0, %v2230_v49  ;;  %v2232_v43 = vadd.f32 %v2221_v29, %v2138_v35 }
 0x71a   : > { %v2246_v57 = vmul.f32 1.442695, %v2244_v50  ;;  %v2245_v28 = vsub.f32 0.0, %v2231_v55  ;;  %v2257_v40 = vsub.f32 0.0, %v2233_v37  ;;  %v2258_v32 = vmul.f32 1.442695, %v2256_v47 }
 0x71b   : > { %3708 = vpow2.f32 %v2236_v58  ;;  %v2238_v36 = vmul.f32 1.442695, %v2235_v51 }
 0x71c   : > { %3710 = vpow2.f32 %v2246_v57  ;;  %v2248_v53 = vmul.f32 1.442695, %v2245_v28  ;;  %v2260_v63 = vmul.f32 1.442695, %v2257_v40 }
 0x71d   : > { %3712 = vpow2.f32 %v2238_v36 }
 0x71e   : > { %3714 = vpow2.f32 %v2248_v53 }
 0x71f   : > { %3716 = vtanh.f32 %v2228_v38 }
 0x720   : > { %3718 = vpow2.f32 %v2258_v32 }
 0x721   : > { %3720 = vpow2.f32 %v2260_v63 }
 0x725   : > { %v3709_v33 = vpop.eup %3708 }
 0x726   : > { %v3711_v26 = vpop.eup %3710  ;;  %v2240_v27 = vadd.f32 1.0, %v3709_v33 }
 0x727   : > { %v2250_v30 = vadd.f32 1.0, %v3711_v26  ;;  %v3713_v31 = vpop.eup %3712 }
 0x728   : > { %3722 = vrcp.f32 %v2240_v27  ;;  %v3715_v49 = vpop.eup %3714  ;;  %v2241_v41 = vadd.f32 1.0, %v3713_v31  ;;  %v2279_v27 = vld [vmem:[#allocation3 + $0x108] sm:$0xff]  ;;  %v2282_v31 = vld [vmem:[#allocation3 + $0x120] sm:$0xff] }
 0x729   : > { %3724 = vrcp.f32 %v2250_v30  ;;  %v2251_v54 = vadd.f32 1.0, %v3715_v49  ;;  %v3717_v42 = vpop.eup %3716 }
 0x72a   : > { %3726 = vtanh.f32 %v2232_v43  ;;  %v3719_v50 = vpop.eup %3718 }
 0x72b   : > { %3728 = vrcp.f32 %v2241_v41  ;;  %v3721_v55 = vpop.eup %3720  ;;  %v2262_v34 = vadd.f32 1.0, %v3719_v50 }
 0x72c   : > { %3730 = vrcp.f32 %v2251_v54  ;;  %v2263_v39 = vadd.f32 1.0, %v3721_v55 }
 0x72d   : > { %3732 = vrcp.f32 %v2262_v34 }
 0x732   : > { %v3723_v48 = vpop.eup %3722 }
 0x733   : > { %v3725_v58 = vpop.eup %3724  ;;  %v2268_v51 = vmul.f32 %v3723_v48, %v3717_v42  ;;  %v2283_v42 = vld [vmem:[#allocation3 + $0x128] sm:$0xff] }
 0x734   : > { %v3727_v57 = vpop.eup %3726  ;;  %v2266_v29 = vmul.f32 %v3725_v58, %v5072_v56 }
 0x735   : > { %v3729_v28 = vpop.eup %3728 }
 0x736   : > { %v3731_v36 = vpop.eup %3730  ;;  %v5114_v37 = vadd.f32 %v2268_v51, %v2266_v29  ;;  %v2269_v53 = vmul.f32 %v3729_v28, %v3727_v57  ;;  %v2281_v51 = vld [vmem:[#allocation3 + $0x118] sm:$0xff] }
 0x737   : > { %v2267_v47 = vmul.f32 %v3731_v36, %v5076_v62  ;;  %v3733_v38 = vpop.eup %3732  ;;  %v2278_v62 = vld [vmem:[#allocation3 + $0x100] sm:$0xff] }
 0x738   : > { %3734 = vtanh.f32 %v5114_v37 }
 0x739   : > { %v5118_v40 = vadd.f32 %v2269_v53, %v2267_v47  ;;  %3736 = vrcp.f32 %v2263_v39  ;;  %v2285_v53 = vld [vmem:[#allocation3 + $0x138] sm:$0xff] }
 0x73b   : > { %3738 = vtanh.f32 %v5118_v40 }
 0x742   : > { %v3735_v32 = vpop.eup %3734 }
 0x743   : > { %v3737_v56 = vpop.eup %3736  ;;  %v2274_v63 = vmul.f32 %v3735_v32, %v3733_v38 }
 0x745   : > { %v3739_v35 = vpop.eup %3738 }
 0x746   : > { %v2275_v33 = vmul.f32 %v3739_v35, %v3737_v56 }
 0x748   : > { %v2276_v26 = vpack.c.bf16 %v2275_v33, %v2274_v63 }
 0x74a   : > { %2277 = vst [vmem:[#allocation2 + $0x18] sm:$0xff] %v2276_v26  ;;  %2319 = vmatmul.mubr.bf16.vlgmr.msra.gmra.mrb[16].mxu0 %v2276_v26  ;;  %2362 = vmatmul.mubr.bf16.vlgmr.msra.gmra.mrb[16].mxu1 %v2276_v26  ;;  %v2280_v26 = vld [vmem:[#allocation3 + $0x110] sm:$0xff] }
 0x74b   : > { %2433 = vmatpush1.bf16.msra.mxu0 %v4795_v59  ;;  %2476 = vmatpush1.bf16.msra.mxu1 %v4808_v52 }
 0x74c   : > { %2434 = vmatprep.subr.bf16.mxu0 %v4799_v60  ;;  %2477 = vmatprep.subr.bf16.mxu1 %v4812_v45 }
 0x74d   : > { %2464 = vmatprep.mubr.bf16.mxu0 %v4130_v4  ;;  %2507 = vmatprep.mubr.bf16.mxu1 %v4130_v4 }
 0x74f   : > { %2435 = vmatpush1.bf16.msra.mxu0 %v4817_v0  ;;  %2478 = vmatpush1.bf16.msra.mxu1 %v4828_v1 }
 0x750   : > { %2436 = vmatprep.subr.bf16.mxu0 %v4823_v2  ;;  %2479 = vmatprep.subr.bf16.mxu1 %v4833_v3 }
 0x753   : > { %2437 = vmatpush1.bf16.msra.mxu0 %v4839_v6  ;;  %2480 = vmatpush1.bf16.msra.mxu1 %v4849_v7 }
 0x754   : > { %2438 = vmatprep.subr.bf16.mxu0 %v4844_v5  ;;  %2481 = vmatprep.subr.bf16.mxu1 %v4854_v46 }
 0x757   : > { %2439 = vmatpush1.bf16.msra.mxu0 %v4860_v8  ;;  %2482 = vmatpush1.bf16.msra.mxu1 %v4870_v10 }
 0x758   : > { %2440 = vmatprep.subr.bf16.mxu0 %v4865_v9  ;;  %2483 = vmatprep.subr.bf16.mxu1 %v4875_v11 }
 0x75b   : > { %2441 = vmatpush1.bf16.msra.mxu0 %v4880_v12  ;;  %2484 = vmatpush1.bf16.msra.mxu1 %v4890_v13 }
 0x75c   : > { %2442 = vmatprep.subr.bf16.mxu0 %v4885_v14  ;;  %2485 = vmatprep.subr.bf16.mxu1 %v4895_v15 }
 0x75f   : > { %2443 = vmatpush1.bf16.msra.mxu0 %v4900_v16  ;;  %2486 = vmatpush1.bf16.msra.mxu1 %v4910_v17 }
 0x760   : > { %2444 = vmatprep.subr.bf16.mxu0 %v4905_v18  ;;  %2487 = vmatprep.subr.bf16.mxu1 %v4915_v19 }
 0x763   : > { %2445 = vmatpush1.bf16.msra.mxu0 %v4920_v20  ;;  %2488 = vmatpush1.bf16.msra.mxu1 %v4930_v21 }
 0x764   : > { %2446 = vmatprep.subr.bf16.mxu0 %v4925_v22  ;;  %2489 = vmatprep.subr.bf16.mxu1 %v4935_v23 }
 0x767   : > { %2447 = vmatpush1.bf16.msra.mxu0 %v4940_v24  ;;  %2490 = vmatpush1.bf16.msra.mxu1 %v4946_v25 }
 0x768   : > { %2578 = vmatprep.subr.bf16.mxu0 %v4791_v44  ;;  %2621 = vmatprep.subr.bf16.mxu1 %v4803_v61 }
 0x81d   : > { %v2320_v43 = vpop.f32.mrb[16].mxu0  ;;  %v2363_v30 = vpop.f32.mrb[16].mxu1 }
 0x81e   : > { %v2372_v49 = vadd.f32 %v2320_v43, %v2278_v62  ;;  %v2322_v41 = vpop.f32.mrb[17].mxu0  ;;  %v2365_v54 = vpop.f32.mrb[17].mxu1  ;;  %v2374_v43 = vadd.f32 %v2363_v30, %v2280_v26 }
 0x81f   : > { %v2373_v50 = vadd.f32 %v2322_v41, %v2279_v27  ;;  %v2324_v55 = vpop.f32.mrb[18].mxu0  ;;  %v2367_v48 = vpop.f32.mrb[18].mxu1  ;;  %v2375_v32 = vadd.f32 %v2365_v54, %v2281_v51 }
 0x820   : > { %v2380_v58 = vsub.f32 0.0, %v2372_v49  ;;  %v2376_v57 = vadd.f32 %v2324_v55, %v2282_v31  ;;  %v2326_v29 = vpop.f32.mrb[19].mxu0  ;;  %v2369_v34 = vpop.f32.mrb[19].mxu1  ;;  %v2284_v49 = vld [vmem:[#allocation3 + $0x130] sm:$0xff] }
 0x821   : > { %v2390_v28 = vsub.f32 0.0, %v2373_v50  ;;  %v2377_v36 = vadd.f32 %v2326_v29, %v2283_v42  ;;  %v2379_v63 = vadd.f32 %v2369_v34, %v2285_v53  ;;  %v2402_v62 = vsub.f32 0.0, %v2375_v32 }
 0x822   : > { %v2382_v39 = vmul.f32 1.442695, %v2380_v58  ;;  %v2381_v47 = vsub.f32 0.0, %v2376_v57  ;;  %v2378_v54 = vadd.f32 %v2367_v48, %v2284_v49 }
 0x823   : > { %v2392_v38 = vmul.f32 1.442695, %v2390_v28  ;;  %v2391_v56 = vsub.f32 0.0, %v2377_v36  ;;  %v2403_v27 = vsub.f32 0.0, %v2379_v63  ;;  %v2404_v31 = vmul.f32 1.442695, %v2402_v62 }
 0x824   : > { %3740 = vpow2.f32 %v2382_v39  ;;  %v2384_v35 = vmul.f32 1.442695, %v2381_v47 }
 0x825   : > { %3742 = vpow2.f32 %v2392_v38  ;;  %v2394_v33 = vmul.f32 1.442695, %v2391_v56  ;;  %v2406_v41 = vmul.f32 1.442695, %v2403_v27 }
 0x826   : > { %3744 = vpow2.f32 %v2384_v35 }
 0x827   : > { %3746 = vpow2.f32 %v2394_v33 }
 0x828   : > { %3748 = vtanh.f32 %v2374_v43 }
 0x829   : > { %3750 = vpow2.f32 %v2404_v31 }
 0x82a   : > { %3752 = vpow2.f32 %v2406_v41 }
 0x82e   : > { %v3741_v42 = vpop.eup %3740 }
 0x82f   : > { %v3743_v50 = vpop.eup %3742  ;;  %v2386_v55 = vadd.f32 1.0, %v3741_v42 }
 0x830   : > { %v2396_v58 = vadd.f32 1.0, %v3743_v50  ;;  %v3745_v51 = vpop.eup %3744 }
 0x831   : > { %3754 = vrcp.f32 %v2386_v55  ;;  %v3747_v57 = vpop.eup %3746  ;;  %v2387_v29 = vadd.f32 1.0, %v3745_v51  ;;  %v2425_v55 = vld [vmem:[#allocation3 + $0x148] sm:$0xff]  ;;  %v2428_v51 = vld [vmem:[#allocation3 + $0x160] sm:$0xff] }
 0x832   : > { %3756 = vrcp.f32 %v2396_v58  ;;  %v2397_v34 = vadd.f32 1.0, %v3747_v57  ;;  %v3749_v30 = vpop.eup %3748 }
 0x833   : > { %3758 = vtanh.f32 %v2378_v54  ;;  %v3751_v28 = vpop.eup %3750 }
 0x834   : > { %3760 = vrcp.f32 %v2387_v29  ;;  %v3753_v36 = vpop.eup %3752  ;;  %v2408_v32 = vadd.f32 1.0, %v3751_v28 }
 0x835   : > { %3762 = vrcp.f32 %v2397_v34  ;;  %v2409_v26 = vadd.f32 1.0, %v3753_v36 }
 0x836   : > { %3764 = vrcp.f32 %v2408_v32 }
 0x83b   : > { %v3755_v53 = vpop.eup %3754 }
 0x83c   : > { %v3757_v39 = vpop.eup %3756  ;;  %v2414_v47 = vmul.f32 %v3755_v53, %v3749_v30  ;;  %v2429_v30 = vld [vmem:[#allocation3 + $0x168] sm:$0xff] }
 0x83d   : > { %v3759_v38 = vpop.eup %3758  ;;  %v2412_v48 = vmul.f32 %v3757_v39, %v5114_v37 }
 0x83e   : > { %v3761_v56 = vpop.eup %3760 }
 0x83f   : > { %v3763_v35 = vpop.eup %3762  ;;  %v5156_v63 = vadd.f32 %v2414_v47, %v2412_v48  ;;  %v2415_v33 = vmul.f32 %v3761_v56, %v3759_v38  ;;  %v2427_v47 = vld [vmem:[#allocation3 + $0x158] sm:$0xff] }
 0x840   : > { %v2413_v62 = vmul.f32 %v3763_v35, %v5118_v40  ;;  %v3765_v43 = vpop.eup %3764  ;;  %v2424_v40 = vld [vmem:[#allocation3 + $0x140] sm:$0xff] }
 0x841   : > { %3766 = vtanh.f32 %v5156_v63 }
 0x842   : > { %v5160_v27 = vadd.f32 %v2415_v33, %v2413_v62  ;;  %3768 = vrcp.f32 %v2409_v26 }
 0x844   : > { %3770 = vtanh.f32 %v5160_v27 }
 0x84b   : > { %v3767_v31 = vpop.eup %3766 }
 0x84c   : > { %v3769_v37 = vpop.eup %3768  ;;  %v2420_v41 = vmul.f32 %v3767_v31, %v3765_v43 }
 0x84e   : > { %v3771_v49 = vpop.eup %3770 }
 0x84f   : > { %v2421_v42 = vmul.f32 %v3771_v49, %v3769_v37 }
 0x851   : > { %v2422_v50 = vpack.c.bf16 %v2421_v42, %v2420_v41  ;;  %v2426_v41 = vld [vmem:[#allocation3 + $0x150] sm:$0xff] }
 0x853   : > { %2423 = vst [vmem:[#allocation2 + $0x20] sm:$0xff] %v2422_v50  ;;  %2465 = vmatmul.mubr.bf16.vlgmr.msra.gmra.mrb[20].mxu0 %v2422_v50  ;;  %2508 = vmatmul.mubr.bf16.vlgmr.msra.gmra.mrb[20].mxu1 %v2422_v50 }
 0x854   : > { %2579 = vmatpush1.bf16.msra.mxu0 %v4795_v59  ;;  %2622 = vmatpush1.bf16.msra.mxu1 %v4808_v52 }
 0x855   : > { %2580 = vmatprep.subr.bf16.mxu0 %v4799_v60  ;;  %2623 = vmatprep.subr.bf16.mxu1 %v4812_v45 }
 0x856   : > { %2610 = vmatprep.mubr.bf16.mxu0 %v4130_v4  ;;  %2653 = vmatprep.mubr.bf16.mxu1 %v4130_v4 }
 0x858   : > { %2581 = vmatpush1.bf16.msra.mxu0 %v4817_v0  ;;  %2624 = vmatpush1.bf16.msra.mxu1 %v4828_v1 }
 0x859   : > { %2582 = vmatprep.subr.bf16.mxu0 %v4823_v2  ;;  %2625 = vmatprep.subr.bf16.mxu1 %v4833_v3 }
 0x85c   : > { %2583 = vmatpush1.bf16.msra.mxu0 %v4839_v6  ;;  %2626 = vmatpush1.bf16.msra.mxu1 %v4849_v7 }
 0x85d   : > { %2584 = vmatprep.subr.bf16.mxu0 %v4844_v5  ;;  %2627 = vmatprep.subr.bf16.mxu1 %v4854_v46 }
 0x860   : > { %2585 = vmatpush1.bf16.msra.mxu0 %v4860_v8  ;;  %2628 = vmatpush1.bf16.msra.mxu1 %v4870_v10 }
 0x861   : > { %2586 = vmatprep.subr.bf16.mxu0 %v4865_v9  ;;  %2629 = vmatprep.subr.bf16.mxu1 %v4875_v11 }
 0x864   : > { %2587 = vmatpush1.bf16.msra.mxu0 %v4880_v12  ;;  %2630 = vmatpush1.bf16.msra.mxu1 %v4890_v13 }
 0x865   : > { %2588 = vmatprep.subr.bf16.mxu0 %v4885_v14  ;;  %2631 = vmatprep.subr.bf16.mxu1 %v4895_v15 }
 0x868   : > { %2589 = vmatpush1.bf16.msra.mxu0 %v4900_v16  ;;  %2632 = vmatpush1.bf16.msra.mxu1 %v4910_v17 }
 0x869   : > { %2590 = vmatprep.subr.bf16.mxu0 %v4905_v18  ;;  %2633 = vmatprep.subr.bf16.mxu1 %v4915_v19 }
 0x86c   : > { %2591 = vmatpush1.bf16.msra.mxu0 %v4920_v20  ;;  %2634 = vmatpush1.bf16.msra.mxu1 %v4930_v21 }
 0x86d   : > { %2592 = vmatprep.subr.bf16.mxu0 %v4925_v22  ;;  %2635 = vmatprep.subr.bf16.mxu1 %v4935_v23 }
 0x870   : > { %2593 = vmatpush1.bf16.msra.mxu0 %v4940_v24  ;;  %2636 = vmatpush1.bf16.msra.mxu1 %v4946_v25 }
 0x871   : > { %2724 = vmatprep.subr.bf16.mxu0 %v4791_v44  ;;  %2767 = vmatprep.subr.bf16.mxu1 %v4803_v61  ;;  %v2431_v61 = vld [vmem:[#allocation3 + $0x178] sm:$0xff] }
 0x926   : > { %v2466_v54 = vpop.f32.mrb[20].mxu0  ;;  %v2509_v58 = vpop.f32.mrb[20].mxu1 }
 0x927   : > { %v2518_v57 = vadd.f32 %v2466_v54, %v2424_v40  ;;  %v2468_v29 = vpop.f32.mrb[21].mxu0  ;;  %v2511_v34 = vpop.f32.mrb[21].mxu1  ;;  %v2520_v40 = vadd.f32 %v2509_v58, %v2426_v41  ;;  %v2430_v54 = vld [vmem:[#allocation3 + $0x170] sm:$0xff] }
 0x928   : > { %v2519_v28 = vadd.f32 %v2468_v29, %v2425_v55  ;;  %v2470_v36 = vpop.f32.mrb[22].mxu0  ;;  %v2513_v53 = vpop.f32.mrb[22].mxu1  ;;  %v2521_v62 = vadd.f32 %v2511_v34, %v2427_v47 }
 0x929   : > { %v2526_v39 = vsub.f32 0.0, %v2518_v57  ;;  %v2522_v38 = vadd.f32 %v2470_v36, %v2428_v51  ;;  %v2472_v48 = vpop.f32.mrb[23].mxu0  ;;  %v2515_v32 = vpop.f32.mrb[23].mxu1  ;;  %v2524_v34 = vadd.f32 %v2513_v53, %v2430_v54 }
 0x92a   : > { %v2536_v44 = vsub.f32 0.0, %v2519_v28  ;;  %v2523_v56 = vadd.f32 %v2472_v48, %v2429_v30  ;;  %v2525_v37 = vadd.f32 %v2515_v32, %v2431_v61  ;;  %v2548_v42 = vsub.f32 0.0, %v2521_v62 }
 0x92b   : > { %v2528_v35 = vmul.f32 1.442695, %v2526_v39  ;;  %v2527_v33 = vsub.f32 0.0, %v2522_v38 }
 0x92c   : > { %v2538_v26 = vmul.f32 1.442695, %v2536_v44  ;;  %v2537_v43 = vsub.f32 0.0, %v2523_v56  ;;  %v2549_v50 = vsub.f32 0.0, %v2525_v37  ;;  %v2550_v55 = vmul.f32 1.442695, %v2548_v42 }
 0x92d   : > { %3772 = vpow2.f32 %v2528_v35  ;;  %v2530_v31 = vmul.f32 1.442695, %v2527_v33 }
 0x92e   : > { %3774 = vpow2.f32 %v2538_v26  ;;  %v2540_v49 = vmul.f32 1.442695, %v2537_v43  ;;  %v2552_v51 = vmul.f32 1.442695, %v2549_v50 }
 0x92f   : > { %3776 = vpow2.f32 %v2530_v31 }
 0x930   : > { %3778 = vpow2.f32 %v2540_v49 }
 0x931   : > { %3780 = vtanh.f32 %v2520_v40 }
 0x932   : > { %3782 = vpow2.f32 %v2550_v55 }
 0x933   : > { %3784 = vpow2.f32 %v2552_v51 }
 0x937   : > { %v3773_v57 = vpop.eup %3772 }
 0x938   : > { %v3775_v29 = vpop.eup %3774  ;;  %v2532_v30 = vadd.f32 1.0, %v3773_v57 }
 0x939   : > { %v2542_v28 = vadd.f32 1.0, %v3775_v29  ;;  %v3777_v36 = vpop.eup %3776  ;;  %v2576_v29 = vld [vmem:[#allocation3 + $0x1b0] sm:$0xff] }
 0x93a   : > { %3786 = vrcp.f32 %v2532_v30  ;;  %v3779_v39 = vpop.eup %3778  ;;  %v2533_v47 = vadd.f32 1.0, %v3777_v36 }
 0x93b   : > { %3788 = vrcp.f32 %v2542_v28  ;;  %v2543_v38 = vadd.f32 1.0, %v3779_v39  ;;  %v3781_v58 = vpop.eup %3780 }
 0x93c   : > { %3790 = vtanh.f32 %v2524_v34  ;;  %v3783_v48 = vpop.eup %3782 }
 0x93d   : > { %3792 = vrcp.f32 %v2533_v47  ;;  %v3785_v32 = vpop.eup %3784  ;;  %v2554_v33 = vadd.f32 1.0, %v3783_v48 }
 0x93e   : > { %3794 = vrcp.f32 %v2543_v38  ;;  %v2555_v37 = vadd.f32 1.0, %v3785_v32 }
 0x93f   : > { %3796 = vrcp.f32 %v2554_v33 }
 0x944   : > { %v3787_v44 = vpop.eup %3786 }
 0x945   : > { %v3789_v56 = vpop.eup %3788  ;;  %v2560_v61 = vmul.f32 %v3787_v44, %v3781_v58 }
 0x946   : > { %v3791_v35 = vpop.eup %3790  ;;  %v2558_v53 = vmul.f32 %v3789_v56, %v5156_v63 }
 0x947   : > { %v3793_v26 = vpop.eup %3792 }
 0x948   : > { %v3795_v62 = vpop.eup %3794  ;;  %v5198_v43 = vadd.f32 %v2560_v61, %v2558_v53  ;;  %v2561_v31 = vmul.f32 %v3793_v26, %v3791_v35 }
 0x949   : > { %v2559_v49 = vmul.f32 %v3795_v62, %v5160_v27  ;;  %v3797_v42 = vpop.eup %3796 }
 0x94a   : > { %3798 = vtanh.f32 %v5198_v43 }
 0x94b   : > { %v5202_v41 = vadd.f32 %v2561_v31, %v2559_v49  ;;  %3800 = vrcp.f32 %v2555_v37 }
 0x94d   : > { %3802 = vtanh.f32 %v5202_v41 }
 0x954   : > { %v3799_v50 = vpop.eup %3798 }
 0x955   : > { %v3801_v63 = vpop.eup %3800  ;;  %v2566_v55 = vmul.f32 %v3799_v50, %v3797_v42 }
 0x957   : > { %v3803_v40 = vpop.eup %3802 }
 0x958   : > { %v2567_v54 = vmul.f32 %v3803_v40, %v3801_v63 }
 0x95a   : > { %v2568_v51 = vpack.c.bf16 %v2567_v54, %v2566_v55 }
 0x95c   : > { %2569 = vst [vmem:[#allocation2 + $0x28] sm:$0xff] %v2568_v51  ;;  %2611 = vmatmul.mubr.bf16.vlgmr.msra.gmra.mrb[24].mxu0 %v2568_v51  ;;  %2654 = vmatmul.mubr.bf16.vlgmr.msra.gmra.mrb[24].mxu1 %v2568_v51 }
 0x95d   : > { %2725 = vmatpush1.bf16.msra.mxu0 %v4795_v59  ;;  %2768 = vmatpush1.bf16.msra.mxu1 %v4808_v52  ;;  %v2570_v59 = vld [vmem:[#allocation3 + $0x180] sm:$0xff] }
 0x95e   : > { %2726 = vmatprep.subr.bf16.mxu0 %v4799_v60  ;;  %2769 = vmatprep.subr.bf16.mxu1 %v4812_v45  ;;  %v2571_v60 = vld [vmem:[#allocation3 + $0x188] sm:$0xff] }
 0x95f   : > { %2756 = vmatprep.mubr.bf16.mxu0 %v4130_v4  ;;  %2799 = vmatprep.mubr.bf16.mxu1 %v4130_v4  ;;  %v2575_v4 = vld [vmem:[#allocation3 + $0x1a8] sm:$0xff] }
 0x961   : > { %2727 = vmatpush1.bf16.msra.mxu0 %v4817_v0  ;;  %2770 = vmatpush1.bf16.msra.mxu1 %v4828_v1  ;;  %v2574_v0 = vld [vmem:[#allocation3 + $0x1a0] sm:$0xff] }
 0x962   : > { %2728 = vmatprep.subr.bf16.mxu0 %v4823_v2  ;;  %2771 = vmatprep.subr.bf16.mxu1 %v4833_v3 }
 0x965   : > { %2729 = vmatpush1.bf16.msra.mxu0 %v4839_v6  ;;  %2772 = vmatpush1.bf16.msra.mxu1 %v4849_v7 }
 0x966   : > { %2730 = vmatprep.subr.bf16.mxu0 %v4844_v5  ;;  %2773 = vmatprep.subr.bf16.mxu1 %v4854_v46 }
 0x969   : > { %2731 = vmatpush1.bf16.msra.mxu0 %v4860_v8  ;;  %2774 = vmatpush1.bf16.msra.mxu1 %v4870_v10  ;;  %v2573_v8 = vld [vmem:[#allocation3 + $0x198] sm:$0xff] }
 0x96a   : > { %2732 = vmatprep.subr.bf16.mxu0 %v4865_v9  ;;  %2775 = vmatprep.subr.bf16.mxu1 %v4875_v11 }
 0x96d   : > { %2733 = vmatpush1.bf16.msra.mxu0 %v4880_v12  ;;  %2776 = vmatpush1.bf16.msra.mxu1 %v4890_v13  ;;  %v2577_v13 = vld [vmem:[#allocation3 + $0x1b8] sm:$0xff] }
 0x96e   : > { %2734 = vmatprep.subr.bf16.mxu0 %v4885_v14  ;;  %2777 = vmatprep.subr.bf16.mxu1 %v4895_v15 }
 0x971   : > { %2735 = vmatpush1.bf16.msra.mxu0 %v4900_v16  ;;  %2778 = vmatpush1.bf16.msra.mxu1 %v4910_v17 }
 0x972   : > { %2736 = vmatprep.subr.bf16.mxu0 %v4905_v18  ;;  %2779 = vmatprep.subr.bf16.mxu1 %v4915_v19 }
 0x975   : > { %2737 = vmatpush1.bf16.msra.mxu0 %v4920_v20  ;;  %2780 = vmatpush1.bf16.msra.mxu1 %v4930_v21 }
 0x976   : > { %2738 = vmatprep.subr.bf16.mxu0 %v4925_v22  ;;  %2781 = vmatprep.subr.bf16.mxu1 %v4935_v23  ;;  %v2572_v23 = vld [vmem:[#allocation3 + $0x190] sm:$0xff] }
 0x979   : > { %2739 = vmatpush1.bf16.msra.mxu0 %v4940_v24  ;;  %2782 = vmatpush1.bf16.msra.mxu1 %v4946_v25 }
 0xa2f   : > { %v2612_v52 = vpop.f32.mrb[24].mxu0  ;;  %v2655_v45 = vpop.f32.mrb[24].mxu1 }
 0xa30   : > { %v2664_v2 = vadd.f32 %v2612_v52, %v2570_v59  ;;  %v2614_v1 = vpop.f32.mrb[25].mxu0  ;;  %v2657_v3 = vpop.f32.mrb[25].mxu1  ;;  %v2666_v27 = vadd.f32 %v2655_v45, %v2572_v23 }
 0xa31   : > { %v2665_v6 = vadd.f32 %v2614_v1, %v2571_v60  ;;  %v2616_v5 = vpop.f32.mrb[26].mxu0  ;;  %v2659_v7 = vpop.f32.mrb[26].mxu1  ;;  %v2667_v17 = vadd.f32 %v2657_v3, %v2573_v8  ;;  %v2720_v3 = vld [vmem:[#allocation3 + $0x1e0] sm:$0xff] }
 0xa32   : > { %v2672_v46 = vsub.f32 0.0, %v2664_v2  ;;  %v2668_v9 = vadd.f32 %v2616_v5, %v2574_v0  ;;  %v2618_v10 = vpop.f32.mrb[27].mxu0  ;;  %v2661_v11 = vpop.f32.mrb[27].mxu1  ;;  %v2670_v39 = vadd.f32 %v2659_v7, %v2576_v29  ;;  %v2716_v0 = vld [vmem:[#allocation3 + $0x1c0] sm:$0xff]  ;;  %v2721_v7 = vld [vmem:[#allocation3 + $0x1e8] sm:$0xff] }
 0xa33   : > { %v2682_v12 = vsub.f32 0.0, %v2665_v6  ;;  %v2669_v14 = vadd.f32 %v2618_v10, %v2575_v4  ;;  %v2671_v22 = vadd.f32 %v2661_v11, %v2577_v13  ;;  %v2694_v24 = vsub.f32 0.0, %v2667_v17  ;;  %v2719_v11 = vld [vmem:[#allocation3 + $0x1d8] sm:$0xff] }
 0xa34   : > { %v2674_v15 = vmul.f32 1.442695, %v2672_v46  ;;  %v2673_v16 = vsub.f32 0.0, %v2668_v9 }
 0xa35   : > { %v2684_v18 = vmul.f32 1.442695, %v2682_v12  ;;  %v2683_v19 = vsub.f32 0.0, %v2669_v14  ;;  %v2695_v25 = vsub.f32 0.0, %v2671_v22  ;;  %v2696_v57 = vmul.f32 1.442695, %v2694_v24 }
 0xa36   : > { %3804 = vpow2.f32 %v2674_v15  ;;  %v2676_v20 = vmul.f32 1.442695, %v2673_v16 }
 0xa37   : > { %3806 = vpow2.f32 %v2684_v18  ;;  %v2686_v21 = vmul.f32 1.442695, %v2683_v19  ;;  %v2698_v30 = vmul.f32 1.442695, %v2695_v25  ;;  %v2723_v18 = vld [vmem:[#allocation3 + $0x1f8] sm:$0xff] }
 0xa38   : > { %3808 = vpow2.f32 %v2676_v20 }
 0xa39   : > { %3810 = vpow2.f32 %v2686_v21 }
 0xa3a   : > { %3812 = vtanh.f32 %v2666_v27  ;;  %v2718_v27 = vld [vmem:[#allocation3 + $0x1d0] sm:$0xff] }
 0xa3b   : > { %3814 = vpow2.f32 %v2696_v57 }
 0xa3c   : > { %3816 = vpow2.f32 %v2698_v30 }
 0xa40   : > { %v3805_v34 = vpop.eup %3804 }
 0xa41   : > { %v3807_v28 = vpop.eup %3806  ;;  %v2678_v36 = vadd.f32 1.0, %v3805_v34 }
 0xa42   : > { %v2688_v47 = vadd.f32 1.0, %v3807_v28  ;;  %v3809_v38 = vpop.eup %3808  ;;  %v2722_v28 = vld [vmem:[#allocation3 + $0x1f0] sm:$0xff] }
 0xa43   : > { %3818 = vrcp.f32 %v2678_v36  ;;  %v3811_v58 = vpop.eup %3810  ;;  %v2679_v48 = vadd.f32 1.0, %v3809_v38 }
 0xa44   : > { %3820 = vrcp.f32 %v2688_v47  ;;  %v2689_v32 = vadd.f32 1.0, %v3811_v58  ;;  %v3813_v44 = vpop.eup %3812 }
 0xa45   : > { %3822 = vtanh.f32 %v2670_v39  ;;  %v3815_v56 = vpop.eup %3814 }
 0xa46   : > { %3824 = vrcp.f32 %v2679_v48  ;;  %v3817_v61 = vpop.eup %3816  ;;  %v2700_v31 = vadd.f32 1.0, %v3815_v56 }
 0xa47   : > { %3826 = vrcp.f32 %v2689_v32  ;;  %v2701_v63 = vadd.f32 1.0, %v3817_v61 }
 0xa48   : > { %3828 = vrcp.f32 %v2700_v31 }
 0xa4d   : > { %v3819_v35 = vpop.eup %3818 }
 0xa4e   : > { %v3821_v53 = vpop.eup %3820  ;;  %v2706_v33 = vmul.f32 %v3819_v35, %v3813_v44 }
 0xa4f   : > { %v3823_v26 = vpop.eup %3822  ;;  %v2704_v62 = vmul.f32 %v3821_v53, %v5198_v43 }
 0xa50   : > { %v3825_v37 = vpop.eup %3824 }
 0xa51   : > { %v3827_v49 = vpop.eup %3826  ;;  %v5238_v42 = vadd.f32 %v2706_v33, %v2704_v62  ;;  %v2707_v50 = vmul.f32 %v3825_v37, %v3823_v26 }
 0xa52   : > { %v2705_v40 = vmul.f32 %v3827_v49, %v5202_v41  ;;  %v3829_v54 = vpop.eup %3828  ;;  %v2717_v41 = vld [vmem:[#allocation3 + $0x1c8] sm:$0xff] }
 0xa53   : > { %3830 = vtanh.f32 %v5238_v42 }
 0xa54   : > { %v5242_v55 = vadd.f32 %v2707_v50, %v2705_v40  ;;  %3832 = vrcp.f32 %v2701_v63 }
 0xa56   : > { %3834 = vtanh.f32 %v5242_v55 }
 0xa5d   : > { %v3831_v51 = vpop.eup %3830 }
 0xa5e   : > { %v3833_v43 = vpop.eup %3832  ;;  %v2712_v60 = vmul.f32 %v3831_v51, %v3829_v54 }
 0xa60   : > { %v3835_v59 = vpop.eup %3834 }
 0xa61   : > { %v2713_v52 = vmul.f32 %v3835_v59, %v3833_v43 }
 0xa63   : > { %v2714_v45 = vpack.c.bf16 %v2713_v52, %v2712_v60 }
 0xa65   : > { %2715 = vst [vmem:[#allocation2 + $0x30] sm:$0xff] %v2714_v45  ;;  %2757 = vmatmul.mubr.bf16.vlgmr.msra.gmra.mrb[28].mxu0 %v2714_v45  ;;  %2800 = vmatmul.mubr.bf16.vlgmr.msra.gmra.mrb[28].mxu1 %v2714_v45 }
 0xb38   : > { %v2758_v2 = vpop.f32.mrb[28].mxu0  ;;  %v2801_v1 = vpop.f32.mrb[28].mxu1 }
 0xb39   : > { %v2810_v4 = vadd.f32 %v2758_v2, %v2716_v0  ;;  %v2760_v6 = vpop.f32.mrb[29].mxu0  ;;  %v2803_v5 = vpop.f32.mrb[29].mxu1  ;;  %v2812_v30 = vadd.f32 %v2801_v1, %v2718_v27 }
 0xb3a   : > { %v2811_v46 = vadd.f32 %v2760_v6, %v2717_v41  ;;  %v2762_v8 = vpop.f32.mrb[30].mxu0  ;;  %v2805_v9 = vpop.f32.mrb[30].mxu1  ;;  %v2813_v22 = vadd.f32 %v2803_v5, %v2719_v11  ;;  %v2873_v5 = vld [vmem:[#allocation10 + $0x18] sm:$0xff] (!%p3312_p5) }
 0xb3b   : > { %v2818_v10 = vsub.f32 0.0, %v2810_v4  ;;  %v2814_v12 = vadd.f32 %v2762_v8, %v2720_v3  ;;  %v2764_v14 = vpop.f32.mrb[31].mxu0  ;;  %v2807_v13 = vpop.f32.mrb[31].mxu1  ;;  %v2816_v58 = vadd.f32 %v2805_v9, %v2722_v28  ;;  %v2871_v3 = vld [vmem:[#allocation10 + $0x8] sm:$0xff] (!%p3312_p5)  ;;  %v2872_v4 = vld [vmem:[#allocation10 + $0x10] sm:$0xff] (!%p3312_p5)  ;;  %v2877_v11 = vld [vmem:[#allocation10 + $0x38] sm:$0xff] (!%p3312_p5) }
 0xb3c   : > { %v2828_v15 = vsub.f32 0.0, %v2811_v46  ;;  %v2815_v16 = vadd.f32 %v2764_v14, %v2721_v7  ;;  %v2817_v24 = vadd.f32 %v2807_v13, %v2723_v18  ;;  %v2840_v57 = vsub.f32 0.0, %v2813_v22  ;;  %v2874_v46 = vld [vmem:[#allocation10 + $0x20] sm:$0xff] (!%p3312_p5)  ;;  %v2875_v8 = vld [vmem:[#allocation10 + $0x28] sm:$0xff] (!%p3312_p5)  ;;  %v2881_v18 = vld [vmem:[#allocation10 + $0x58] sm:$0xff] (!%p3312_p5) }
 0xb3d   : > { %v2820_v17 = vmul.f32 1.442695, %v2818_v10  ;;  %v2819_v19 = vsub.f32 0.0, %v2814_v12  ;;  %v3385_v7 = vpack.c.bf16 (!%p3312_p5), %v2873_v5, %v2872_v4  ;;  %v3389_v9 = vpack.c.bf16 (!%p3312_p5), %v2875_v8, %v2874_v46  ;;  %v2876_v10 = vld [vmem:[#allocation10 + $0x30] sm:$0xff] (!%p3312_p5)  ;;  %v2878_v14 = vld [vmem:[#allocation10 + $0x40] sm:$0xff] (!%p3312_p5)  ;;  %v2879_v13 = vld [vmem:[#allocation10 + $0x48] sm:$0xff] (!%p3312_p5) }
 0xb3e   : > { %v2830_v20 = vmul.f32 1.442695, %v2828_v15  ;;  %v2829_v21 = vsub.f32 0.0, %v2815_v16  ;;  %v2841_v29 = vsub.f32 0.0, %v2817_v24  ;;  %v2842_v34 = vmul.f32 1.442695, %v2840_v57 }
 0xb3f   : > { %3836 = vpow2.f32 %v2820_v17  ;;  %v2822_v23 = vmul.f32 1.442695, %v2819_v19  ;;  %v3393_v12 = vpack.c.bf16 (!%p3312_p5), %v2877_v11, %v2876_v10  ;;  %v3397_v15 = vpack.c.bf16 (!%p3312_p5), %v2879_v13, %v2878_v14  ;;  %v2880_v16 = vld [vmem:[#allocation10 + $0x50] sm:$0xff] (!%p3312_p5)  ;;  %v2882_v19 = vld [vmem:[#allocation10 + $0x60] sm:$0xff] (!%p3312_p5) }
 0xb40   : > { %3838 = vpow2.f32 %v2830_v20  ;;  %v2832_v25 = vmul.f32 1.442695, %v2829_v21  ;;  %v2844_v36 = vmul.f32 1.442695, %v2841_v29  ;;  %v3401_v17 = vpack.c.bf16 (!%p3312_p5), %v2881_v18, %v2880_v16  ;;  %v2883_v20 = vld [vmem:[#allocation10 + $0x68] sm:$0xff] (!%p3312_p5)  ;;  %v2884_v21 = vld [vmem:[#allocation10 + $0x70] sm:$0xff] (!%p3312_p5) }
 0xb41   : > { %3840 = vpow2.f32 %v2822_v23  ;;  %v3405_v22 = vpack.c.bf16 (!%p3312_p5), %v2883_v20, %v2882_v19  ;;  %v2885_v23 = vld [vmem:[#allocation10 + $0x78] sm:$0xff] (!%p3312_p5) }
 0xb42   : > { %3842 = vpow2.f32 %v2832_v25  ;;  %v3409_v24 = vpack.c.bf16 (!%p3312_p5), %v2885_v23, %v2884_v21  ;;  %v3313_v25 = vld [vmem:[%s5375_s5] ss:$0 sm:$0xff] (!%p3312_p5) }
 0xb43   : > { %3844 = vtanh.f32 %v2812_v30 }
 0xb44   : > { %3846 = vpow2.f32 %v2842_v34 }
 0xb45   : > { %3848 = vpow2.f32 %v2844_v36 }
 0xb49   : > { %v3837_v39 = vpop.eup %3836 }
 0xb4a   : > { %v3839_v47 = vpop.eup %3838  ;;  %v2824_v38 = vadd.f32 1.0, %v3837_v39 }
 0xb4b   : > { %v2834_v48 = vadd.f32 1.0, %v3839_v47  ;;  %v3841_v32 = vpop.eup %3840 }
 0xb4c   : > { %3850 = vrcp.f32 %v2824_v38  ;;  %v3843_v44 = vpop.eup %3842  ;;  %v2825_v56 = vadd.f32 1.0, %v3841_v32 }
 0xb4d   : > { %3852 = vrcp.f32 %v2834_v48  ;;  %v2835_v61 = vadd.f32 1.0, %v3843_v44  ;;  %v3845_v35 = vpop.eup %3844 }
 0xb4e   : > { %3854 = vtanh.f32 %v2816_v58  ;;  %v3847_v53 = vpop.eup %3846 }
 0xb4f   : > { %3856 = vrcp.f32 %v2825_v56  ;;  %v3849_v33 = vpop.eup %3848  ;;  %v2846_v37 = vadd.f32 1.0, %v3847_v53 }
 0xb50   : > { %3858 = vrcp.f32 %v2835_v61  ;;  %v2847_v43 = vadd.f32 1.0, %v3849_v33 }
 0xb51   : > { %3860 = vrcp.f32 %v2846_v37 }
 0xb56   : > { %v3851_v26 = vpop.eup %3850 }
 0xb57   : > { %v3853_v62 = vpop.eup %3852  ;;  %v2852_v31 = vmul.f32 %v3851_v26, %v3845_v35 }
 0xb58   : > { %v3855_v49 = vpop.eup %3854  ;;  %v2850_v50 = vmul.f32 %v3853_v62, %v5238_v42 }
 0xb59   : > { %v3857_v63 = vpop.eup %3856 }
 0xb5a   : > { %v3859_v40 = vpop.eup %3858  ;;  %v2854_v54 = vadd.f32 %v2852_v31, %v2850_v50  ;;  %v2853_v51 = vmul.f32 %v3857_v63, %v3855_v49 }
 0xb5b   : > { %v2851_v59 = vmul.f32 %v3859_v40, %v5242_v55  ;;  %v3861_v52 = vpop.eup %3860  ;;  %v2870_v55 = vld [vmem:[#allocation10] sm:$0xff] (!%p3312_p5) }
 0xb5c   : > { %3862 = vtanh.f32 %v2854_v54  ;;  %2864 = vst [vmem:[%s4536_s10] sm:$0xff] %v2854_v54  ;;  %v3381_v6 = vpack.c.bf16 (!%p3312_p5), %v2871_v3, %v2870_v55 }
 0xb5d   : > { %v2855_v60 = vadd.f32 %v2853_v51, %v2851_v59  ;;  %3864 = vrcp.f32 %v2847_v43 }
 0xb5e   : > { %3382 = vmatprep.subr.bf16.mxu0 (!%p3312_p5), %v3381_v6 }
 0xb5f   : > { %3866 = vtanh.f32 %v2855_v60  ;;  %2865 = vst [vmem:[%s4536_s10 + $0x8] sm:$0xff] %v2855_v60  ;;  %3384 = vmatpush3.bf16.msra.mxu0 (!%p3312_p5), %v3381_v6 }
 0xb60   : > { %3386 = vmatprep.subr.bf16.mxu0 (!%p3312_p5), %v3385_v7 }
 0xb63   : > { %3388 = vmatpush3.bf16.msra.mxu0 (!%p3312_p5), %v3385_v7 }
 0xb64   : > { %3390 = vmatprep.subr.bf16.mxu0 (!%p3312_p5), %v3389_v9 }
 0xb66   : > { %v3863_v45 = vpop.eup %3862 }
 0xb67   : > { %v2858_v0 = vmul.f32 %v3863_v45, %v3861_v52  ;;  %v3865_v42 = vpop.eup %3864  ;;  %3392 = vmatpush3.bf16.msra.mxu0 (!%p3312_p5), %v3389_v9 }
 0xb68   : > { %2869 = sbr.rel (%p3312_p5) target bundleno = 3158 (0xc56), region = 72  ;;  %3394 = vmatprep.subr.bf16.mxu0 (!%p3312_p5), %v3393_v12 }
 0xb69   : > { %v3867_v41 = vpop.eup %3866  ;;  %2862 = vst [vmem:[%s4533_s20] sm:$0xff] %v2858_v0  ;;  %3378 = vmatprep.mubr.f32.mxu0 (!%p3312_p5), %v2858_v0 }
 0xb6a   : > { %v2859_v2 = vmul.f32 %v3867_v41, %v3865_v42 }
 0xb6b   : > { %3396 = vmatpush3.bf16.msra.mxu0 (!%p3312_p5), %v3393_v12 }
 0xb6c   : > { %v2860_v1 = vpack.c.bf16 %v2859_v2, %v2858_v0  ;;  %2863 = vst [vmem:[%s4533_s20 + $0x8] sm:$0xff] %v2859_v2  ;;  %3398 = vmatprep.subr.bf16.mxu0 (!%p3312_p5), %v3397_v15 }
 0xb6e   : > { %2861 = vst [vmem:[#allocation2 + $0x38] sm:$0xff] %v2860_v1 }
 0xb6f   : > { %3400 = vmatpush3.bf16.msra.mxu0 %v3397_v15 }
 0xb70   : > { %3402 = vmatprep.subr.bf16.mxu0 %v3401_v17 }
 0xb73   : > { %3404 = vmatpush3.bf16.msra.mxu0 %v3401_v17 }
 0xb74   : > { %3406 = vmatprep.subr.bf16.mxu0 %v3405_v22 }
 0xb77   : > { %3408 = vmatpush3.bf16.msra.mxu0 %v3405_v22 }
 0xb78   : > { %3410 = vmatprep.subr.bf16.mxu0 %v3409_v24 }
 0xb7b   : > { %3412 = vmatpush3.bf16.msra.mxu0 %v3409_v24 }
 0xb7e   : > { %3379 = vmatmul.mubr.f32.vlgmr.msra.gmra.mrb[0].mxu0 %v2859_v2 }
 0xc51   : > { %v3380_v27 = vpop.f32.mrb[0].mxu0 }
 0xc52   : > { %v2965_v57 = vadd.f32 %v3380_v27, %v3313_v25  ;;  %v2959_v29 = vpop.f32.mrb[1].mxu0 }
 0xc53   : > { %v2960_v30 = vadd.f32 %v3313_v25, %v2959_v29 }
 0xc54   : > { %2969 = vst [vmem:[#allocation12 + $0x8] sm:$0xff] %v2965_v57 }
 0xc55   : > { %2968 = vst [vmem:[#allocation12] sm:$0xff] %v2960_v30 }
 0xc56 PF: > { %s3326_s15 = sshll.u32 %s4276_s14, 8  ;;  %s3002_s9 = sshll.u32 %s4533_s20, 4  ;;  %s5262_s9 = int_to_ptr.vmem [resolvable:$true] %s3002_s9 }
 0xc57   : > { %s5259_s29 = scalar_lea.hbm %s5377_s7, %s3326_s15  ;;  %s5267_s12 = scalar_lea.hbm %s5378_s8, %s3326_s15 }
 0xc58   : > { %s5271_s23 = scalar_lea.sflag [#allocation14], %s346_s22  ;;  %s3984_s11 = scalar_lea.vmem %s5262_s9, 256 }
 0xc59   : > { %p3985_p1 = scmp.ne.s32.totalorder %s5262_s9, %s3984_s11  ;;  %p5416_p4 = scmp.ne.s32.totalorder %s5401_s16, 0 }
 0xc5a   : > { %s4131_s19 = smov [#allocation13]  }
 0xc5b   : > { %p3986_p9 = pnand %p3985_p1, %p5416_p4  ;;  %s3988_s17 = sshll.u32 %s4131_s19, 4  ;;  %s3989_s17 = int_to_ptr.vmem [resolvable:$false] %s3988_s17 }
 0xc5c   : > { %s3990_s18 = scalar_lea.vmem %s3989_s17, 512  ;;  %p3991_p0 = scmp.lt.s32.totalorder %s5262_s9, %s3989_s17 }
 0xc5d   : > { %p3987_p12 = pneg %p3986_p9  ;;  %p3992_p7 = scmp.lt.s32.totalorder %s3990_s18, %s3984_s11 }
 0xc5f   : > { %p3993_p2 = por %p3992_p7, %p3991_p0 }
 0xc61   : > { %p3994_p6 = pnand %p3993_p2, %p3987_p12 }
 0xc63   : > { %3997 = shalt.err (!%p3994_p6)
}
 0xc64   : > { %s3998_s22 = scalar_lea.hbm %s5259_s29, 256  ;;  %s4002_s20 = scalar_lea.hbm %s5377_s7, 512 }
 0xc65   : > { %p3999_p13 = scmp.ne.s32.totalorder %s5259_s29, %s3998_s22  ;;  %p4003_p3 = scmp.lt.u32.totalorder %s5259_s29, %s5377_s7 }
 0xc66   : > { %p4004_p10 = scmp.lt.u32.totalorder %s4002_s20, %s3998_s22  ;;  %p4006_p1 = scmp.lt.u32.totalorder %s3998_s22, %s5259_s29 }
 0xc67   : > { %p4000_p11 = pnand %p3999_p13, %p5416_p4 }
 0xc68   : > { %p4005_p5 = por %p4004_p10, %p4003_p3 }
 0xc69   : > { %p4001_p8 = pneg %p4000_p11 }
 0xc6a   : > { %p4007_p9 = por %p4006_p1, %p4005_p5 }
 0xc6c   : > { %p4008_p12 = pnand %p4007_p9, %p4001_p8 }
 0xc6e   : > { %4011 = shalt.err (!%p4008_p12)
}
 0xc6f   : > { %s4132_s15 = smov 128   ;;  %s4133_s26 = smov 8  }
 0xc70   : > { %3427 = dma.vmem_to_hbm [thread:$0]  (%p5416_p4), %s5262_s9, 256, %s5259_s29, %s5271_s23, %s4132_s15, %s4132_s15, %s4133_s26  }
 0xc71   : > { %s3018_s30 = sshll.u32 %s4536_s10, 4  ;;  %s4134_s21 = smov [#allocation12]   ;;  %s5299_s30 = int_to_ptr.vmem [resolvable:$true] %s3018_s30 }
 0xc72   : > { %s2986_s1 = sshll.u32 %s4134_s21, 4  ;;  %p5417_p7 = scmp.eq.s32.totalorder %s4276_s14, 1  ;;  %s2987_s1 = int_to_ptr.vmem [resolvable:$true] %s2986_s1 }
 0xc73   : > { %s4012_s11 = scalar_lea.vmem %s2987_s1, 256  ;;  %p4019_p13 = scmp.lt.s32.totalorder %s2987_s1, %s2987_s1 }
 0xc74   : > { %p4013_p0 = scmp.ne.s32.totalorder %s2987_s1, %s4012_s11  ;;  %p4020_p11 = scmp.lt.s32.totalorder %s4012_s11, %s4012_s11 }
 0xc76   : > { %p4014_p2 = pnand %p4013_p0, %p5417_p7  ;;  %p4021_p8 = por %p4020_p11, %p4019_p13 }
 0xc78   : > { %p4015_p6 = pneg %p4014_p2 }
 0xc7a   : > { %p4022_p3 = pnand %p4021_p8, %p4015_p6 }
 0xc7c   : > { %4025 = shalt.err (!%p4022_p3)
}
 0xc7d   : > { %s4026_s10 = scalar_lea.hbm %s5376_s6, 256  ;;  %p5418_p5 = pmov %p5417_p7 }
 0xc7e   : > { %p4027_p10 = scmp.ne.s32.totalorder %s5376_s6, %s4026_s10  ;;  %p4032_p12 = scmp.lt.u32.totalorder %s4026_s10, %s5376_s6 }
 0xc80   : > { %p4028_p1 = pnand %p4027_p10, %p5418_p5 }
 0xc82   : > { %p4029_p9 = pneg %p4028_p1 }
 0xc84   : > { %p4034_p0 = pnand %p4032_p12, %p4029_p9 }
 0xc86   : > { %4037 = shalt.err (!%p4034_p0)
}
 0xc87   : > { %p5419_p7 = pmov %p5418_p5  ;;  %s4038_s20 = scalar_lea.vmem %s5299_s30, 256 }
 0xc88   : > { %p4039_p2 = scmp.ne.s32.totalorder %s5299_s30, %s4038_s20  ;;  %s4135_s24 = smov [#allocation15]  }
 0xc89   : > { %3426 = dma.vmem_to_hbm [thread:$0]  (%p5419_p7), %s2987_s1, 256, %s5376_s6, [#allocation6], %s4132_s15, %s4132_s15, %s4133_s26  }
 0xc8a   : > { %p4040_p6 = pnand %p4039_p2, %p5416_p4  ;;  %s4042_s13 = sshll.u32 %s4135_s24, 4  ;;  %s4043_s13 = int_to_ptr.vmem [resolvable:$false] %s4042_s13 }
 0xc8b   : > { %s4044_s21 = scalar_lea.vmem %s4043_s13, 512  ;;  %p4045_p11 = scmp.lt.s32.totalorder %s5299_s30, %s4043_s13 }
 0xc8c   : > { %p4041_p13 = pneg %p4040_p6  ;;  %p4046_p8 = scmp.lt.s32.totalorder %s4044_s21, %s4038_s20 }
 0xc8e   : > { %p4047_p3 = por %p4046_p8, %p4045_p11 }
 0xc90   : > { %p4048_p10 = pnand %p4047_p3, %p4041_p13 }
 0xc92   : > { %4051 = shalt.err (!%p4048_p10)
}
 0xc93   : > { %s4052_s1 = scalar_lea.hbm %s5267_s12, 256  ;;  %s4056_s17 = scalar_lea.hbm %s5378_s8, 512 }
 0xc94   : > { %p4053_p5 = scmp.ne.s32.totalorder %s5267_s12, %s4052_s1  ;;  %p4057_p12 = scmp.lt.u32.totalorder %s5267_s12, %s5378_s8 }
 0xc95   : > { %p4058_p0 = scmp.lt.u32.totalorder %s4056_s17, %s4052_s1  ;;  %p4060_p2 = scmp.lt.u32.totalorder %s4052_s1, %s5267_s12 }
 0xc96   : > { %p4054_p1 = pnand %p4053_p5, %p5416_p4 }
 0xc97   : > { %p4059_p7 = por %p4058_p0, %p4057_p12 }
 0xc98   : > { %p4055_p9 = pneg %p4054_p1 }
 0xc99   : > { %p4061_p6 = por %p4060_p2, %p4059_p7 }
 0xc9b   : > { %p4062_p13 = pnand %p4061_p6, %p4055_p9 }
 0xc9d   : > { %4065 = shalt.err (!%p4062_p13)
}
 0xc9e   : > { %3428 = dma.vmem_to_hbm [thread:$0]  (%p5416_p4), %s5299_s30, 256, %s5267_s12, %s5271_s23, %s4132_s15, %s4132_s15, %s4133_s26  }
 0xc9f   : > { %p5420_p11 = scmp.eq.s32.totalorder %s4276_s14, 1 }
 0xca1   : > { %4095 = dma.done.wait (%p5420_p11), [#allocation6], 256   ;;  %p5421_p8 = pmov %p5420_p11 }
 0xca3   : > { %4097 = vsyncadd (%p5421_p8), [#allocation6], 4294967040 }
 0xca4 PF: > { %s5422_s9 = sld [smem:[#allocation22_spill]]  ;;  %s5424_s22 = sld [smem:[#allocation25_spill]] }
 0xcaa   : > { %s5423_s18 = sadd.s32 4294967294, %s5422_s9   ;;  %p5425_p3 = scmp.ne.s32.totalorder %s5424_s22, 0 }
 0xcab   : > { %s3037_s25 = sand.u32 1, %s5423_s18   ;;  %p5426_p10 = scmp.ge.s32.totalorder %s5422_s9, 2 }
 0xcac   : > { %s3038_s16 = scalar_lea.sflag [#allocation14], %s3037_s25 }
 0xcad   : > { %p3448_p5 = pnand %p5426_p10, %p5425_p3 }
 0xcaf   : > { %4099 = dma.done.wait (!%p3448_p5), %s3038_s16, 512  }
 0xcb0   : > { %4101 = vsyncadd (!%p3448_p5), %s3038_s16, 4294966784  ;;  %s5427_s30 = sld [smem:[#allocation23_spill]]  ;;  %s5428_s12 = sld [smem:[#allocation21_spill]] }
 0xcb1   : > { %s5429_s29 = sld [smem:[#allocation24_spill]]  ;;  %s5430_s27 = smov %s4108_s28 }
 0xcb6   : > { %p25_p4 = scmp.ge.s32.totalorder %s5427_s30, 4   ;;  %s5431_s28 = smov %s5428_s12 }
 0xcb8   :  { %27 = sbr.rel (!%p25_p4) target bundleno = 10 (0xa), region = 148 }
 0xcbf   :  { %3052 = vsyncpa [#allocation5], 1 }
 0xcc0   :  { %3054 = vsyncpa [#allocation5 + $0x1], 1 }
 0xcc1   :  { %3055 = vsyncpa [#allocation8], 1 }
 0xcc2   :  { %3057 = vsyncpa [#allocation8 + $0x1], 1 }
 0xcc3   :  { %3058 = vsyncpa [#allocation11], 1 }
 0xcc4   :  { %3059 = vsyncpa [#allocation6], 1 }
 0xcc5   :  { %3061 = vsyncpa [#allocation6 + $0x1], 1 }
 0xcc6   :  { %3062 = vsyncpa [#allocation14], 1 }
 0xcc7   :  { %3064 = vsyncpa [#allocation14 + $0x1], 1 }

</bundles_post_ra>
